<compile_context>
chip_gen: v7x
topology: tpu7x:2x2x1
jax: 0.10.0
libtpu: 0.0.40
codegen_flags: <defaults>
</compile_context>

<pallas_src>
import functools

import jax
import jax.numpy as jnp
from jax.experimental import pallas as pl
from jax.experimental.pallas import tpu as pltpu

LANE = 128      # vreg lane width
MID_PAD = 128   # fc2 output width (100) padded to one full lane group


def _round_up(n, m):
    return ((n + m - 1) // m) * m


def _pad_axis(a, axis, target):
    pad = target - a.shape[axis]
    if pad == 0:
        return a
    widths = [(0, 0)] * a.ndim
    widths[axis] = (0, pad)
    return jnp.pad(a, widths)


def _net_kernel(x_ref, w1_ref, b1_ref, w2_ref, b2_ref, w3_ref, b3_ref, o_ref):
    # fc1 (bf16 operands, f32 accumulation) + bias + ReLU in f32.
    # Dropout = identity in eval mode.
    h1 = jnp.dot(x_ref[...], w1_ref[...], preferred_element_type=jnp.float32)
    h1 = jnp.maximum(h1 + b1_ref[...], 0.0)
    # fc2: cast the activation operand to the weight dtype (bf16) for the MXU;
    # padded columns of w2/b2 are exactly zero so lane padding is exact.
    h2 = jnp.dot(h1.astype(w2_ref.dtype), w2_ref[...],
                 preferred_element_type=jnp.float32)
    h2 = jnp.maximum(h2 + b2_ref[...], 0.0)
    # fc3 (output width 1): VPU multiply + XLU lane reduction in f32 instead of
    # an N=1 MXU matmul; b3 is a scalar read from SMEM.
    y = jnp.sum(h2 * w3_ref[...], axis=-1, keepdims=True) + b3_ref[0]
    # Lane-dense writeback: broadcast the (tb, 1) column across 128 lanes so
    # stores are unmasked full-width vst; the wrapper slices column 0.
    o_ref[...] = jnp.broadcast_to(y, o_ref.shape).astype(o_ref.dtype)


def prepare_params(params, *, use_bf16=True):
    """One-time prep: zero-pad feature dims to full lane widths and cast the
    MXU operands (w1, w2) to bf16.  Exact w.r.t. padding: relu(0)=0 and the
    padded lanes of w2/w3 are zero.  Call once; reuse the result every step."""
    mxu_dtype = jnp.bfloat16 if use_bf16 else jnp.float32
    w1, b1 = params["w1"], params["b1"]   # (numInputs, H), (1, H)
    w2, b2 = params["w2"], params["b2"]   # (H, 100),       (1, 100)
    w3, b3 = params["w3"], params["b3"]   # (100, 1),       (1, 1)
    h_pad = _round_up(w1.shape[1], LANE)  # 500 -> 512
    return {
        "w1": _pad_axis(w1, 1, h_pad).astype(mxu_dtype),                   # (in, 512)
        "b1": _pad_axis(b1, 1, h_pad).astype(jnp.float32),                 # (1, 512)
        "w2": _pad_axis(_pad_axis(w2, 0, h_pad), 1, MID_PAD).astype(mxu_dtype),  # (512, 128)
        "b2": _pad_axis(b2, 1, MID_PAD).astype(jnp.float32),               # (1, 128)
        "w3": _pad_axis(w3.reshape(1, -1), 1, MID_PAD).astype(jnp.float32),  # (1, 128)
        "b3": b3.reshape(1).astype(jnp.float32),                           # (1,) scalar
    }


@functools.partial(jax.jit, static_argnames=("block_b",))
def net_forward(x, prepared, *, block_b=1024):
    """x: (B, numInputs) float32.  prepared: output of prepare_params()."""
    w1, b1 = prepared["w1"], prepared["b1"]
    w2, b2 = prepared["w2"], prepared["b2"]
    w3, b3 = prepared["w3"], prepared["b3"]

    B, num_inputs = x.shape
    h_pad = w1.shape[1]
    mid_pad = w2.shape[1]
    mxu_dtype = w1.dtype

    # Adaptive batch tile: single grid step for small/medium B; tiles of
    # block_b (default 1024) for large B.  tb is always a multiple of 8.
    tb = min(_round_up(block_b, 8), _round_up(B, 8))
    n_blocks = pl.cdiv(B, tb)
    pb = n_blocks * tb
    xp = _pad_axis(x, 0, pb).astype(mxu_dtype)

    const = lambda i: (0, 0)   # weights/biases: same block every grid step

    out = pl.pallas_call(
        _net_kernel,
        out_shape=jax.ShapeDtypeStruct((pb, LANE), jnp.float32),
        grid=(n_blocks,),
        in_specs=[
            pl.BlockSpec((tb, num_inputs), lambda i: (i, 0)),  # x: batch-tiled
            pl.BlockSpec((num_inputs, h_pad), const),          # w1 (VMEM-resident)
            pl.BlockSpec((1, h_pad), const),                   # b1
            pl.BlockSpec((h_pad, mid_pad), const),             # w2
            pl.BlockSpec((1, mid_pad), const),                 # b2
            pl.BlockSpec((1, mid_pad), const),                 # w3 row
            pl.BlockSpec(memory_space=pltpu.MemorySpace.SMEM), # b3 scalar
        ],
        out_specs=pl.BlockSpec((tb, LANE), lambda i: (i, 0)),
        compiler_params=pltpu.CompilerParams(
            dimension_semantics=("parallel",),
        ),
    )(xp, w1, b1, w2, b2, w3, b3)

    return out[:B, :1]


def init_params(key, num_inputs, hidden_layers):
    """Deterministic init mirroring nn.Linear's U(-1/sqrt(fan_in), 1/sqrt(fan_in)).
    Weights are stored transposed: (in_features, out_features)."""
    def linear(k, fan_in, fan_out):
        kw, kb = jax.random.split(k)
        bound = 1.0 / jnp.sqrt(fan_in)
        w = jax.random.uniform(kw, (fan_in, fan_out), jnp.float32, -bound, bound)
        b = jax.random.uniform(kb, (1, fan_out), jnp.float32, -bound, bound)
        return w, b

    k1, k2, k3 = jax.random.split(key, 3)
    w1, b1 = linear(k1, num_inputs, hidden_layers)
    w2, b2 = linear(k2, hidden_layers, 100)
    w3, b3 = linear(k3, 100, 1)
    return {"w1": w1, "b1": b1, "w2": w2, "b2": b2, "w3": w3, "b3": b3}


if __name__ == "__main__":
    # hiddenLayers=500 as in the module; B=512 collapses to a single grid step.
    B, NUM_INPUTS, HIDDEN = 512, 32, 500

    key = jax.random.PRNGKey(0)
    kx, kp = jax.random.split(key)
    x = jax.random.normal(kx, (B, NUM_INPUTS), dtype=jnp.float32)
    params = init_params(kp, NUM_INPUTS, HIDDEN)

    # Prep (pad + bf16 cast) once, outside the per-call path.
    prepared = prepare_params(params, use_bf16=True)

    out = net_forward(x, prepared, block_b=1024)
    jax.block_until_ready(out)
    assert out.shape == (B, 1)

    # Reference 1: numerics-matched (bf16 matmul operands, f32 accumulation,
    # f32 VPU math) -> tight tolerance.
    def ref_forward(x, p, mxu_dtype):
        dot = lambda a, b: jnp.dot(a.astype(mxu_dtype), b.astype(mxu_dtype),
                                   preferred_element_type=jnp.float32)
        h1 = jnp.maximum(dot(x, p["w1"]) + p["b1"], 0.0)
        h2 = jnp.maximum(dot(h1, p["w2"]) + p["b2"], 0.0)
        return jnp.sum(h2 * p["w3"].reshape(1, -1), axis=-1, keepdims=True) + p["b3"]

    ref_matched = ref_forward(x, params, jnp.bfloat16)
    err_matched = float(jnp.max(jnp.abs(out - ref_matched)))
    assert jnp.allclose(out, ref_matched, atol=2e-4, rtol=2e-4), (
        f"matched-ref max_err={err_matched}")

    # Reference 2: full-f32 HIGHEST-precision reference -> loose tolerance
    # documents the (intentional) bf16-operand precision trade-off.
    dot_hi = lambda a, b: jnp.dot(a, b, precision=jax.lax.Precision.HIGHEST)
    h1 = jnp.maximum(dot_hi(x, params["w1"]) + params["b1"], 0.0)
    h2 = jnp.maximum(dot_hi(h1, params["w2"]) + params["b2"], 0.0)
    ref_f32 = dot_hi(h2, params["w3"]) + params["b3"]
    err_f32 = float(jnp.max(jnp.abs(out - ref_f32)))
    assert jnp.allclose(out, ref_f32, atol=5e-2, rtol=5e-2), (
        f"f32-ref max_err={err_f32}")

    print("KERNEL_OK")
</pallas_src>

<mosaic_0001>
module attributes {stable_mosaic.version = 11 : i64} {
  func.func @_net_kernel(%arg0: i32, %arg1: memref<512x32xbf16, #tpu.memory_space<vmem>>, %arg2: memref<32x512xbf16, #tpu.memory_space<vmem>>, %arg3: memref<1x512xf32, #tpu.memory_space<vmem>>, %arg4: memref<512x128xbf16, #tpu.memory_space<vmem>>, %arg5: memref<1x128xf32, #tpu.memory_space<vmem>>, %arg6: memref<1x128xf32, #tpu.memory_space<vmem>>, %arg7: memref<1xf32, #tpu.memory_space<smem>>, %arg8: memref<512x128xf32, #tpu.memory_space<vmem>>) attributes {dimension_semantics = [#tpu.dimension_semantics<parallel>], iteration_bounds = array<i64: 1>, scalar_prefetch = 0 : i64, scratch_operands = 0 : i64, tpu.core_type = #tpu.core_type<tc>, window_params = [{transform_indices = @transform_0, window_bounds = array<i64: 512, 32>}, {pipeline_mode = #tpu.pipeline_mode<synchronous>, transform_indices = @transform_1, window_bounds = array<i64: 32, 512>}, {pipeline_mode = #tpu.pipeline_mode<synchronous>, transform_indices = @transform_2, window_bounds = array<i64: 1, 512>}, {pipeline_mode = #tpu.pipeline_mode<synchronous>, transform_indices = @transform_3, window_bounds = array<i64: 512, 128>}, {pipeline_mode = #tpu.pipeline_mode<synchronous>, transform_indices = @transform_4, window_bounds = array<i64: 1, 128>}, {pipeline_mode = #tpu.pipeline_mode<synchronous>, transform_indices = @transform_5, window_bounds = array<i64: 1, 128>}, {transform_indices = @transform_6, window_bounds = array<i64: 1>}, {transform_indices = @transform_7, window_bounds = array<i64: 512, 128>}]} {
    %c0 = arith.constant 0 : index
    %c0_0 = arith.constant 0 : index
    %0 = vector.load %arg1[%c0, %c0_0] : memref<512x32xbf16, #tpu.memory_space<vmem>>, vector<512x32xbf16>
    %c0_1 = arith.constant 0 : index
    %c0_2 = arith.constant 0 : index
    %1 = vector.load %arg2[%c0_1, %c0_2] : memref<32x512xbf16, #tpu.memory_space<vmem>>, vector<32x512xbf16>
    %cst = arith.constant dense<0.000000e+00> : vector<512x512xf32>
    %2 = tpu.matmul %0, %1, %cst {dimension_numbers = #tpu.dot_dimension_numbers<[1], [0], [0], [1], [0, 0, 1, 1], [], []>} : vector<512x32xbf16>, vector<32x512xbf16>, vector<512x512xf32> -> vector<512x512xf32>
    %c0_3 = arith.constant 0 : index
    %c0_4 = arith.constant 0 : index
    %3 = vector.load %arg3[%c0_3, %c0_4] : memref<1x512xf32, #tpu.memory_space<vmem>>, vector<1x512xf32>
    %4 = vector.broadcast %3 : vector<1x512xf32> to vector<512x512xf32>
    %5 = arith.addf %2, %4 : vector<512x512xf32>
    %cst_5 = arith.constant 0.000000e+00 : f32
    %6 = vector.broadcast %cst_5 : f32 to vector<512x512xf32>
    %7 = arith.maximumf %5, %6 : vector<512x512xf32>
    %8 = arith.truncf %7 : vector<512x512xf32> to vector<512x512xbf16>
    %c0_6 = arith.constant 0 : index
    %c0_7 = arith.constant 0 : index
    %9 = vector.load %arg4[%c0_6, %c0_7] : memref<512x128xbf16, #tpu.memory_space<vmem>>, vector<512x128xbf16>
    %cst_8 = arith.constant dense<0.000000e+00> : vector<512x128xf32>
    %10 = tpu.matmul %8, %9, %cst_8 {dimension_numbers = #tpu.dot_dimension_numbers<[1], [0], [0], [1], [0, 0, 1, 1], [], []>} : vector<512x512xbf16>, vector<512x128xbf16>, vector<512x128xf32> -> vector<512x128xf32>
    %c0_9 = arith.constant 0 : index
    %c0_10 = arith.constant 0 : index
    %11 = vector.load %arg5[%c0_9, %c0_10] : memref<1x128xf32, #tpu.memory_space<vmem>>, vector<1x128xf32>
    %12 = vector.broadcast %11 : vector<1x128xf32> to vector<512x128xf32>
    %13 = arith.addf %10, %12 : vector<512x128xf32>
    %cst_11 = arith.constant 0.000000e+00 : f32
    %14 = vector.broadcast %cst_11 : f32 to vector<512x128xf32>
    %15 = arith.maximumf %13, %14 : vector<512x128xf32>
    %c0_12 = arith.constant 0 : index
    %c0_13 = arith.constant 0 : index
    %16 = vector.load %arg6[%c0_12, %c0_13] : memref<1x128xf32, #tpu.memory_space<vmem>>, vector<1x128xf32>
    %17 = vector.broadcast %16 : vector<1x128xf32> to vector<512x128xf32>
    %18 = arith.mulf %15, %17 : vector<512x128xf32>
    %cst_14 = arith.constant dense<0.000000e+00> : vector<512xf32>
    %19 = vector.multi_reduction <add>, %18, %cst_14 [1] : vector<512x128xf32> to vector<512xf32>
    %20 = vector.shape_cast %19 : vector<512xf32> to vector<512x1xf32>
    %c0_15 = arith.constant 0 : index
    %21 = memref.load %arg7[%c0_15] : memref<1xf32, #tpu.memory_space<smem>>
    %22 = vector.broadcast %21 : f32 to vector<512x1xf32>
    %23 = arith.addf %20, %22 : vector<512x1xf32>
    %24 = vector.shape_cast %23 : vector<512x1xf32> to vector<512x1xf32>
    %25 = vector.broadcast %24 : vector<512x1xf32> to vector<512x128xf32>
    %c0_16 = arith.constant 0 : index
    %c0_17 = arith.constant 0 : index
    %26 = vector.load %arg8[%c0_16, %c0_17] : memref<512x128xf32, #tpu.memory_space<vmem>>, vector<512x128xf32>
    tpu.vector_store %arg8[%c0_16, %c0_17], %25 {strides = array<i32>} : memref<512x128xf32, #tpu.memory_space<vmem>>, vector<512x128xf32>,
    return
  }
  func.func @transform_0(%arg0: i32) -> (i32, i32) {
    %c0_i32 = arith.constant 0 : i32
    %c0_i32_0 = arith.constant 0 : i32
    return %arg0, %c0_i32 : i32, i32
  }
  func.func @transform_1(%arg0: i32) -> (i32, i32) {
    %c0_i32 = arith.constant 0 : i32
    %c0_i32_0 = arith.constant 0 : i32
    %c0_i32_1 = arith.constant 0 : i32
    return %c0_i32, %c0_i32_0 : i32, i32
  }
  func.func @transform_2(%arg0: i32) -> (i32, i32) {
    %c0_i32 = arith.constant 0 : i32
    %c0_i32_0 = arith.constant 0 : i32
    %c0_i32_1 = arith.constant 0 : i32
    return %c0_i32, %c0_i32_0 : i32, i32
  }
  func.func @transform_3(%arg0: i32) -> (i32, i32) {
    %c0_i32 = arith.constant 0 : i32
    %c0_i32_0 = arith.constant 0 : i32
    %c0_i32_1 = arith.constant 0 : i32
    return %c0_i32, %c0_i32_0 : i32, i32
  }
  func.func @transform_4(%arg0: i32) -> (i32, i32) {
    %c0_i32 = arith.constant 0 : i32
    %c0_i32_0 = arith.constant 0 : i32
    %c0_i32_1 = arith.constant 0 : i32
    return %c0_i32, %c0_i32_0 : i32, i32
  }
  func.func @transform_5(%arg0: i32) -> (i32, i32) {
    %c0_i32 = arith.constant 0 : i32
    %c0_i32_0 = arith.constant 0 : i32
    %c0_i32_1 = arith.constant 0 : i32
    return %c0_i32, %c0_i32_0 : i32, i32
  }
  func.func @transform_6(%arg0: i32) -> i32 {
    %c0_i32 = arith.constant 0 : i32
    %c0_i32_0 = arith.constant 0 : i32
    return %c0_i32 : i32
  }
  func.func @transform_7(%arg0: i32) -> (i32, i32) {
    %c0_i32 = arith.constant 0 : i32
    %c0_i32_0 = arith.constant 0 : i32
    return %arg0, %c0_i32 : i32, i32
  }
}

</mosaic_0001>

<bundles_post_ra>
// kernel: net_forward.1
= control target key start
LH: loop header
LB: loop body
LE: loop exit
PB: predicated region body
PF: predicated region fallthrough
CT: control target
= control target key end

     0   :  { %v3092_v1 = vmov 0   ;;  %vm322_vm0 = vcmask 261120   ;;  %s4569_s1 = inlined_call_operand.vmem [shape: bf16[32,512], index: 1, kind: input, shape index: {}]   ;;  %s4570_s0 = inlined_call_operand.vmem [shape: bf16[512,32], index: 0, kind: input, shape index: {}]   ;;  %s4571_s3 = inlined_call_operand.vmem [shape: bf16[512,128], index: 3, kind: input, shape index: {}]   ;;  %s4572_s2 = inlined_call_operand.vmem [shape: f32[1,512], index: 2, kind: input, shape index: {}]   ;;  %s4573_s4 = inlined_call_operand.vmem [shape: f32[1,128], index: 4, kind: input, shape index: {}]   ;;  %s4574_s5 = inlined_call_operand.vmem [shape: f32[1,128], index: 5, kind: input, shape index: {}]   ;;  %s4575_s6 = inlined_call_operand.<no memory space> [shape: f32[1], index: 6, kind: input, shape index: {}]   ;;  %s4576_s7 = inlined_call_operand.vmem [shape: f32[512,128], index: 7, kind: output, shape index: {}]  }
   0x1   :  { %v3014_v0 = vld [vmem:[%s4569_s1 + $0x4] ss:$16 sps:$4 sm:$0xff]   ;;  %451 = vmatprep.mubr.bf16.mxu0 %v3092_v1  ;;  %804 = vmatprep.mubr.bf16.mxu1 %v3092_v1  ;;  %v3016_v2 = vld [vmem:[%s4569_s1 + $0xc] ss:$16 sps:$4 sm:$0xff]   ;;  %v3018_v3 = vld [vmem:[%s4569_s1] ss:$16 sps:$4 sm:$0xff]  }
   0x2   :  { %419 = vmatprep.subr.bf16.mxu0 %v3014_v0  ;;  %v3019_v4 = vld [vmem:[%s4569_s1 + $0x8] ss:$16 sps:$4 sm:$0xff]   ;;  %772 = vmatprep.subr.bf16.mxu1 %v3016_v2  ;;  %v3020_v5 = vld [vmem:[%s4569_s1 + $0x24] ss:$16 sps:$4 sm:$0xff]   ;;  %v3022_v6 = vld [vmem:[%s4569_s1 + $0x2c] ss:$16 sps:$4 sm:$0xff]  }
   0x3   :  { %420 = vmatpush1.bf16.msra.mxu0 %v3018_v3  ;;  %773 = vmatpush1.bf16.msra.mxu1 %v3019_v4  ;;  %v3024_v7 = vld [vmem:[%s4569_s1 + $0x20] ss:$16 sps:$4 sm:$0xff]   ;;  %v3025_v8 = vld [vmem:[%s4569_s1 + $0x28] ss:$16 sps:$4 sm:$0xff]   ;;  %v102_v4 = vlaneseq }
   0x4   :  { %421 = vmatprep.subr.bf16.mxu0 %v3020_v5  ;;  %774 = vmatprep.subr.bf16.mxu1 %v3022_v6  ;;  %v3026_v9 = vld [vmem:[%s4570_s0] sm:$0xff]   ;;  %v3031_v12 = vld [vmem:[%s4571_s3 + $0x8] sm:$0xff]   ;;  %v3035_v15 = vld [vmem:[%s4571_s3 + $0x10] sm:$0xff]  }
   0x5   :  { %v3027_v10 = vld [vmem:[%s4571_s3] sm:$0xff]   ;;  %v3032_v13 = vld [vmem:[%s4571_s3 + $0x88] sm:$0xff]   ;;  %v3036_v16 = vld [vmem:[%s4571_s3 + $0x90] sm:$0xff]   ;;  %v103_v5 = vshrl.u32 %v102_v4, 7 }
   0x6   :  { %v3028_v11 = vld [vmem:[%s4571_s3 + $0x80] sm:$0xff]   ;;  %v3029_v14 = vld [vmem:[%s4570_s0 + $0x8] sm:$0xff]   ;;  %v3039_v17 = vld [vmem:[%s4571_s3 + $0x18] sm:$0xff]  }
   0x7   :  { %422 = vmatpush1.bf16.msra.mxu0 %v3024_v7  ;;  %775 = vmatpush1.bf16.msra.mxu1 %v3025_v8  ;;  %v3040_v18 = vld [vmem:[%s4571_s3 + $0x98] sm:$0xff]   ;;  %v3030_v19 = vld [vmem:[%s4570_s0 + $0x10] sm:$0xff]   ;;  %v3043_v20 = vld [vmem:[%s4571_s3 + $0x20] sm:$0xff]   ;;  %v104_v7 = vsub.s32 0, %v103_v5  ;;  %v112_v8 = vsub.s32 2, %v103_v5 }
   0x8   :  { %1772 = vmatprep.subr.bf16.mxu1 %v3092_v1  ;;  %2061 = vmatprep.subr.bf16.mxu0 %v3092_v1  ;;  %v3044_v21 = vld [vmem:[%s4571_s3 + $0xa0] sm:$0xff]   ;;  %v3047_v22 = vld [vmem:[%s4571_s3 + $0x28] sm:$0xff]   ;;  %v3033_v24 = vld [vmem:[%s4570_s0 + $0x18] sm:$0xff]  }
   0x9   :  { %v3048_v23 = vld [vmem:[%s4571_s3 + $0xa8] sm:$0xff]   ;;  %v3051_v25 = vld [vmem:[%s4571_s3 + $0x30] sm:$0xff]   ;;  %v3055_v27 = vld [vmem:[%s4571_s3 + $0x38] sm:$0xff]  }
   0xa   :  { %2787 = vmatmul.mubr.msk.bf16.vlgmr.msra.gmra.mrb[0].mxu0 %vm322_vm0, %v3026_v9  ;;  %2819 = vmatmul.mubr.msk.bf16.vlgmr.msra.gmra.mrb[0].mxu1 %vm322_vm0, %v3026_v9  ;;  %v3052_v26 = vld [vmem:[%s4571_s3 + $0xb0] sm:$0xff]   ;;  %v3056_v28 = vld [vmem:[%s4571_s3 + $0xb8] sm:$0xff]   ;;  %v3034_v29 = vld [vmem:[%s4570_s0 + $0x20] sm:$0xff]  }
   0xb   :  { %1773 = vmatpush1.bf16.msra.mxu1 %v3027_v10  ;;  %2062 = vmatpush1.bf16.msra.mxu0 %v3028_v11  ;;  %v3059_v30 = vld [vmem:[%s4571_s3 + $0x40] sm:$0xff]   ;;  %v3063_v32 = vld [vmem:[%s4571_s3 + $0x48] sm:$0xff]   ;;  %v3067_v35 = vld [vmem:[%s4571_s3 + $0x50] sm:$0xff]   ;;  %v108_v10 = vsub.s32 1, %v103_v5  ;;  %v116_v11 = vsub.s32 3, %v103_v5 }
   0xc   :  { %461 = vmatprep.mubr.bf16.mxu0 %v3092_v1  ;;  %814 = vmatprep.mubr.bf16.mxu1 %v3092_v1  ;;  %v3060_v31 = vld [vmem:[%s4571_s3 + $0xc0] sm:$0xff]   ;;  %v3064_v33 = vld [vmem:[%s4571_s3 + $0xc8] sm:$0xff]   ;;  %v3068_v36 = vld [vmem:[%s4571_s3 + $0xd0] sm:$0xff]  }
   0xd   :  { %1774 = vmatprep.subr.bf16.mxu1 %v3092_v1  ;;  %2063 = vmatprep.subr.bf16.mxu0 %v3092_v1  ;;  %v3037_v34 = vld [vmem:[%s4570_s0 + $0x28] sm:$0xff]   ;;  %v3038_v37 = vld [vmem:[%s4570_s0 + $0x30] sm:$0xff]   ;;  %v3071_v38 = vld [vmem:[%s4571_s3 + $0x58] sm:$0xff]  }
   0xe   :  { %v3072_v39 = vld [vmem:[%s4571_s3 + $0xd8] sm:$0xff]   ;;  %v3042_v41 = vld [vmem:[%s4570_s0 + $0x40] sm:$0xff]   ;;  %v3045_v44 = vld [vmem:[%s4570_s0 + $0x48] sm:$0xff]  }
   0xf   :  { %1775 = vmatpush1.bf16.msra.mxu1 %v3031_v12  ;;  %2064 = vmatpush1.bf16.msra.mxu0 %v3032_v13  ;;  %v3041_v40 = vld [vmem:[%s4570_s0 + $0x38] sm:$0xff]   ;;  %v3075_v42 = vld [vmem:[%s4571_s3 + $0x60] sm:$0xff]   ;;  %v3046_v45 = vld [vmem:[%s4570_s0 + $0x50] sm:$0xff]  }
  0x10   :  { %1776 = vmatprep.subr.bf16.mxu1 %v3092_v1  ;;  %2065 = vmatprep.subr.bf16.mxu0 %v3092_v1  ;;  %v3076_v43 = vld [vmem:[%s4571_s3 + $0xe0] sm:$0xff]   ;;  %v3079_v46 = vld [vmem:[%s4571_s3 + $0x68] sm:$0xff]   ;;  %v3049_v47 = vld [vmem:[%s4570_s0 + $0x58] sm:$0xff]  }
  0x11   :  { %v3080_v48 = vld [vmem:[%s4571_s3 + $0xe8] sm:$0xff]   ;;  %v3050_v49 = vld [vmem:[%s4570_s0 + $0x60] sm:$0xff]   ;;  %v3083_v50 = vld [vmem:[%s4571_s3 + $0x70] sm:$0xff]  }
  0x12   :  { %2788 = vmatmul.mubr.msk.bf16.gmra.mrb[4].mxu0 %vm322_vm0, %v3029_v14  ;;  %2820 = vmatmul.mubr.msk.bf16.gmra.mrb[4].mxu1 %vm322_vm0, %v3029_v14  ;;  %v3053_v51 = vld [vmem:[%s4570_s0 + $0x68] sm:$0xff]   ;;  %v3084_v52 = vld [vmem:[%s4571_s3 + $0xf0] sm:$0xff]   ;;  %v3087_v54 = vld [vmem:[%s4571_s3 + $0x78] sm:$0xff]  }
  0x13   :  { %471 = vmatprep.mubr.bf16.mxu0 %v3092_v1  ;;  %824 = vmatprep.mubr.bf16.mxu1 %v3092_v1  ;;  %v3054_v53 = vld [vmem:[%s4570_s0 + $0x70] sm:$0xff]   ;;  %v3057_v55 = vld [vmem:[%s4570_s0 + $0x78] sm:$0xff]   ;;  %v3058_v57 = vld [vmem:[%s4570_s0 + $0x80] sm:$0xff]  }
  0x14   :  { %1777 = vmatpush1.bf16.msra.mxu1 %v3035_v15  ;;  %2066 = vmatpush1.bf16.msra.mxu0 %v3036_v16  ;;  %v3088_v56 = vld [vmem:[%s4571_s3 + $0xf8] sm:$0xff]   ;;  %v3061_v58 = vld [vmem:[%s4570_s0 + $0x88] sm:$0xff]   ;;  %v3062_v59 = vld [vmem:[%s4570_s0 + $0x90] sm:$0xff]  }
  0x15   :  { %1778 = vmatprep.subr.bf16.mxu1 %v3092_v1  ;;  %2067 = vmatprep.subr.bf16.mxu0 %v3092_v1  ;;  %v3065_v60 = vld [vmem:[%s4570_s0 + $0x98] sm:$0xff]   ;;  %v3066_v61 = vld [vmem:[%s4570_s0 + $0xa0] sm:$0xff]   ;;  %v3069_v62 = vld [vmem:[%s4570_s0 + $0xa8] sm:$0xff]  }
  0x16   :  { %v3070_v63 = vld [vmem:[%s4570_s0 + $0xb0] sm:$0xff]   ;;  %v3073_v0 = vld [vmem:[%s4570_s0 + $0xb8] sm:$0xff]   ;;  %v3074_v2 = vld [vmem:[%s4570_s0 + $0xc0] sm:$0xff]  }
  0x17   :  { %v3077_v3 = vld [vmem:[%s4570_s0 + $0xc8] sm:$0xff]   ;;  %v3078_v6 = vld [vmem:[%s4570_s0 + $0xd0] sm:$0xff]   ;;  %v100_v9 = vld [vmem:[%s4572_s2] sm:$0xf] }
  0x18   :  { %1779 = vmatpush1.bf16.msra.mxu1 %v3039_v17  ;;  %2068 = vmatpush1.bf16.msra.mxu0 %v3040_v18  ;;  %v3477_v12 = vrot.slane %v100_v9, %v104_v7  ;;  %v3479_v13 = vrot.slane %v100_v9, %v112_v8  ;;  %v3481_v14 = vrot.slane %v100_v9, %v108_v10 }
  0x19   :  { %1780 = vmatprep.subr.bf16.mxu1 %v3092_v1  ;;  %2069 = vmatprep.subr.bf16.mxu0 %v3092_v1  ;;  %v3483_v15 = vrot.slane %v100_v9, %v116_v11 }
  0x1a   :  { %2789 = vmatmul.mubr.msk.bf16.gmra.mrb[8].mxu0 %vm322_vm0, %v3030_v19  ;;  %2821 = vmatmul.mubr.msk.bf16.gmra.mrb[8].mxu1 %vm322_vm0, %v3030_v19 }
  0x1b   :  { %481 = vmatprep.mubr.bf16.mxu0 %v3092_v1  ;;  %834 = vmatprep.mubr.bf16.mxu1 %v3092_v1 }
  0x1c   :  { %1781 = vmatpush1.bf16.msra.mxu1 %v3043_v20  ;;  %2070 = vmatpush1.bf16.msra.mxu0 %v3044_v21 }
  0x1d   :  { %1782 = vmatprep.subr.bf16.mxu1 %v3092_v1  ;;  %2071 = vmatprep.subr.bf16.mxu0 %v3092_v1 }
  0x20   :  { %1783 = vmatpush1.bf16.msra.mxu1 %v3047_v22  ;;  %2072 = vmatpush1.bf16.msra.mxu0 %v3048_v23  ;;  %v3081_v22 = vld [vmem:[%s4570_s0 + $0xd8] sm:$0xff]  }
  0x21   :  { %1784 = vmatprep.subr.bf16.mxu1 %v3092_v1  ;;  %2073 = vmatprep.subr.bf16.mxu0 %v3092_v1 }
  0x22   :  { %2790 = vmatmul.mubr.msk.bf16.gmra.mrb[12].mxu0 %vm322_vm0, %v3033_v24  ;;  %2822 = vmatmul.mubr.msk.bf16.gmra.mrb[12].mxu1 %vm322_vm0, %v3033_v24 }
  0x23   :  { %491 = vmatprep.mubr.bf16.mxu0 %v3092_v1  ;;  %844 = vmatprep.mubr.bf16.mxu1 %v3092_v1 }
  0x24   :  { %1785 = vmatpush1.bf16.msra.mxu1 %v3051_v25  ;;  %2074 = vmatpush1.bf16.msra.mxu0 %v3052_v26 }
  0x25   :  { %1786 = vmatprep.subr.bf16.mxu1 %v3092_v1  ;;  %2075 = vmatprep.subr.bf16.mxu0 %v3092_v1 }
  0x28   :  { %1787 = vmatpush1.bf16.msra.mxu1 %v3055_v27  ;;  %2076 = vmatpush1.bf16.msra.mxu0 %v3056_v28 }
  0x29   :  { %1788 = vmatprep.subr.bf16.mxu1 %v3092_v1  ;;  %2077 = vmatprep.subr.bf16.mxu0 %v3092_v1 }
  0x2a   :  { %2791 = vmatmul.mubr.msk.bf16.gmra.mrb[16].mxu0 %vm322_vm0, %v3034_v29  ;;  %2823 = vmatmul.mubr.msk.bf16.gmra.mrb[16].mxu1 %vm322_vm0, %v3034_v29 }
  0x2b   :  { %501 = vmatprep.mubr.bf16.mxu0 %v3092_v1  ;;  %854 = vmatprep.mubr.bf16.mxu1 %v3092_v1 }
  0x2c   :  { %1789 = vmatpush1.bf16.msra.mxu1 %v3059_v30  ;;  %2078 = vmatpush1.bf16.msra.mxu0 %v3060_v31 }
  0x2d   :  { %1790 = vmatprep.subr.bf16.mxu1 %v3092_v1  ;;  %2079 = vmatprep.subr.bf16.mxu0 %v3092_v1 }
  0x30   :  { %1791 = vmatpush1.bf16.msra.mxu1 %v3063_v32  ;;  %2080 = vmatpush1.bf16.msra.mxu0 %v3064_v33 }
  0x31   :  { %1792 = vmatprep.subr.bf16.mxu1 %v3092_v1  ;;  %2081 = vmatprep.subr.bf16.mxu0 %v3092_v1 }
  0x32   :  { %2792 = vmatmul.mubr.msk.bf16.gmra.mrb[20].mxu0 %vm322_vm0, %v3037_v34  ;;  %2824 = vmatmul.mubr.msk.bf16.gmra.mrb[20].mxu1 %vm322_vm0, %v3037_v34 }
  0x33   :  { %511 = vmatprep.mubr.bf16.mxu0 %v3092_v1  ;;  %864 = vmatprep.mubr.bf16.mxu1 %v3092_v1 }
  0x34   :  { %1793 = vmatpush1.bf16.msra.mxu1 %v3067_v35  ;;  %2082 = vmatpush1.bf16.msra.mxu0 %v3068_v36 }
  0x35   :  { %1794 = vmatprep.subr.bf16.mxu1 %v3092_v1  ;;  %2083 = vmatprep.subr.bf16.mxu0 %v3092_v1 }
  0x38   :  { %1795 = vmatpush1.bf16.msra.mxu1 %v3071_v38  ;;  %2084 = vmatpush1.bf16.msra.mxu0 %v3072_v39 }
  0x39   :  { %1796 = vmatprep.subr.bf16.mxu1 %v3092_v1  ;;  %2085 = vmatprep.subr.bf16.mxu0 %v3092_v1 }
  0x3a   :  { %2793 = vmatmul.mubr.msk.bf16.gmra.mrb[24].mxu0 %vm322_vm0, %v3038_v37  ;;  %2825 = vmatmul.mubr.msk.bf16.gmra.mrb[24].mxu1 %vm322_vm0, %v3038_v37 }
  0x3b   :  { %521 = vmatprep.mubr.bf16.mxu0 %v3092_v1  ;;  %874 = vmatprep.mubr.bf16.mxu1 %v3092_v1 }
  0x3c   :  { %1797 = vmatpush1.bf16.msra.mxu1 %v3075_v42  ;;  %2086 = vmatpush1.bf16.msra.mxu0 %v3076_v43 }
  0x3d   :  { %1798 = vmatprep.subr.bf16.mxu1 %v3092_v1  ;;  %2087 = vmatprep.subr.bf16.mxu0 %v3092_v1 }
  0x40   :  { %1799 = vmatpush1.bf16.msra.mxu1 %v3079_v46  ;;  %2088 = vmatpush1.bf16.msra.mxu0 %v3080_v48 }
  0x41   :  { %1800 = vmatprep.subr.bf16.mxu1 %v3092_v1  ;;  %2089 = vmatprep.subr.bf16.mxu0 %v3092_v1 }
  0x42   :  { %2794 = vmatmul.mubr.msk.bf16.gmra.mrb[28].mxu0 %vm322_vm0, %v3041_v40  ;;  %2826 = vmatmul.mubr.msk.bf16.gmra.mrb[28].mxu1 %vm322_vm0, %v3041_v40 }
  0x43   :  { %531 = vmatprep.mubr.bf16.mxu0 %v3092_v1  ;;  %884 = vmatprep.mubr.bf16.mxu1 %v3092_v1 }
  0x44   :  { %1801 = vmatpush1.bf16.msra.mxu1 %v3083_v50  ;;  %2090 = vmatpush1.bf16.msra.mxu0 %v3084_v52 }
  0x45   :  { %1802 = vmatprep.subr.bf16.mxu1 %v3092_v1  ;;  %2091 = vmatprep.subr.bf16.mxu0 %v3092_v1 }
  0x48   :  { %1803 = vmatpush1.bf16.msra.mxu1 %v3087_v54  ;;  %2092 = vmatpush1.bf16.msra.mxu0 %v3088_v56 }
  0x4a   :  { %2795 = vmatmul.mubr.msk.bf16.gmra.mrb[32].mxu0 %vm322_vm0, %v3042_v41  ;;  %2827 = vmatmul.mubr.msk.bf16.gmra.mrb[32].mxu1 %vm322_vm0, %v3042_v41 }
  0x4b   :  { %541 = vmatprep.mubr.bf16.mxu0 %v3092_v1  ;;  %894 = vmatprep.mubr.bf16.mxu1 %v3092_v1 }
  0x52   :  { %2796 = vmatmul.mubr.msk.bf16.gmra.mrb[36].mxu0 %vm322_vm0, %v3045_v44  ;;  %2828 = vmatmul.mubr.msk.bf16.gmra.mrb[36].mxu1 %vm322_vm0, %v3045_v44 }
  0x53   :  { %551 = vmatprep.mubr.bf16.mxu0 %v3092_v1  ;;  %904 = vmatprep.mubr.bf16.mxu1 %v3092_v1 }
  0x5a   :  { %2797 = vmatmul.mubr.msk.bf16.gmra.mrb[40].mxu0 %vm322_vm0, %v3046_v45  ;;  %2829 = vmatmul.mubr.msk.bf16.gmra.mrb[40].mxu1 %vm322_vm0, %v3046_v45 }
  0x5b   :  { %561 = vmatprep.mubr.bf16.mxu0 %v3092_v1  ;;  %914 = vmatprep.mubr.bf16.mxu1 %v3092_v1 }
  0x62   :  { %2798 = vmatmul.mubr.msk.bf16.gmra.mrb[44].mxu0 %vm322_vm0, %v3049_v47  ;;  %2830 = vmatmul.mubr.msk.bf16.gmra.mrb[44].mxu1 %vm322_vm0, %v3049_v47 }
  0x63   :  { %571 = vmatprep.mubr.bf16.mxu0 %v3092_v1  ;;  %924 = vmatprep.mubr.bf16.mxu1 %v3092_v1 }
  0x6a   :  { %2799 = vmatmul.mubr.msk.bf16.gmra.mrb[48].mxu0 %vm322_vm0, %v3050_v49  ;;  %2831 = vmatmul.mubr.msk.bf16.gmra.mrb[48].mxu1 %vm322_vm0, %v3050_v49 }
  0x6b   :  { %581 = vmatprep.mubr.bf16.mxu0 %v3092_v1  ;;  %934 = vmatprep.mubr.bf16.mxu1 %v3092_v1 }
  0x72   :  { %2800 = vmatmul.mubr.msk.bf16.gmra.mrb[52].mxu0 %vm322_vm0, %v3053_v51  ;;  %2832 = vmatmul.mubr.msk.bf16.gmra.mrb[52].mxu1 %vm322_vm0, %v3053_v51  ;;  %v3082_v51 = vld [vmem:[%s4570_s0 + $0xe0] sm:$0xff]  }
  0x73   :  { %591 = vmatprep.mubr.bf16.mxu0 %v3092_v1  ;;  %944 = vmatprep.mubr.bf16.mxu1 %v3092_v1 }
  0x7a   :  { %2801 = vmatmul.mubr.msk.bf16.gmra.mrb[56].mxu0 %vm322_vm0, %v3054_v53  ;;  %2833 = vmatmul.mubr.msk.bf16.gmra.mrb[56].mxu1 %vm322_vm0, %v3054_v53 }
  0x7b   :  { %601 = vmatprep.mubr.bf16.mxu0 %v3092_v1  ;;  %954 = vmatprep.mubr.bf16.mxu1 %v3092_v1 }
  0x82   :  { %2802 = vmatmul.mubr.msk.bf16.gmra.mrb[60].mxu0 %vm322_vm0, %v3057_v55  ;;  %2834 = vmatmul.mubr.msk.bf16.gmra.mrb[60].mxu1 %vm322_vm0, %v3057_v55 }
  0x83   :  { %611 = vmatprep.mubr.bf16.mxu0 %v3092_v1  ;;  %964 = vmatprep.mubr.bf16.mxu1 %v3092_v1 }
  0x8a   :  { %2803 = vmatmul.mubr.msk.bf16.gmra.mrb[64].mxu0 %vm322_vm0, %v3058_v57  ;;  %2835 = vmatmul.mubr.msk.bf16.gmra.mrb[64].mxu1 %vm322_vm0, %v3058_v57 }
  0x8b   :  { %621 = vmatprep.mubr.bf16.mxu0 %v3092_v1  ;;  %974 = vmatprep.mubr.bf16.mxu1 %v3092_v1 }
  0x92   :  { %2804 = vmatmul.mubr.msk.bf16.gmra.mrb[68].mxu0 %vm322_vm0, %v3061_v58  ;;  %2836 = vmatmul.mubr.msk.bf16.gmra.mrb[68].mxu1 %vm322_vm0, %v3061_v58 }
  0x93   :  { %631 = vmatprep.mubr.bf16.mxu0 %v3092_v1  ;;  %984 = vmatprep.mubr.bf16.mxu1 %v3092_v1 }
  0x9a   :  { %2805 = vmatmul.mubr.msk.bf16.gmra.mrb[72].mxu0 %vm322_vm0, %v3062_v59  ;;  %2837 = vmatmul.mubr.msk.bf16.gmra.mrb[72].mxu1 %vm322_vm0, %v3062_v59 }
  0x9b   :  { %641 = vmatprep.mubr.bf16.mxu0 %v3092_v1  ;;  %994 = vmatprep.mubr.bf16.mxu1 %v3092_v1 }
  0xa2   :  { %2806 = vmatmul.mubr.msk.bf16.gmra.mrb[76].mxu0 %vm322_vm0, %v3065_v60  ;;  %2838 = vmatmul.mubr.msk.bf16.gmra.mrb[76].mxu1 %vm322_vm0, %v3065_v60 }
  0xa3   :  { %651 = vmatprep.mubr.bf16.mxu0 %v3092_v1  ;;  %1004 = vmatprep.mubr.bf16.mxu1 %v3092_v1 }
  0xaa   :  { %2807 = vmatmul.mubr.msk.bf16.gmra.mrb[80].mxu0 %vm322_vm0, %v3066_v61  ;;  %2839 = vmatmul.mubr.msk.bf16.gmra.mrb[80].mxu1 %vm322_vm0, %v3066_v61 }
  0xab   :  { %661 = vmatprep.mubr.bf16.mxu0 %v3092_v1  ;;  %1014 = vmatprep.mubr.bf16.mxu1 %v3092_v1 }
  0xb2   :  { %2808 = vmatmul.mubr.msk.bf16.gmra.mrb[84].mxu0 %vm322_vm0, %v3069_v62  ;;  %2840 = vmatmul.mubr.msk.bf16.gmra.mrb[84].mxu1 %vm322_vm0, %v3069_v62 }
  0xb3   :  { %671 = vmatprep.mubr.bf16.mxu0 %v3092_v1  ;;  %1024 = vmatprep.mubr.bf16.mxu1 %v3092_v1 }
  0xba   :  { %2809 = vmatmul.mubr.msk.bf16.gmra.mrb[88].mxu0 %vm322_vm0, %v3070_v63  ;;  %2841 = vmatmul.mubr.msk.bf16.gmra.mrb[88].mxu1 %vm322_vm0, %v3070_v63 }
  0xbb   :  { %681 = vmatprep.mubr.bf16.mxu0 %v3092_v1  ;;  %1034 = vmatprep.mubr.bf16.mxu1 %v3092_v1 }
  0xc2   :  { %2810 = vmatmul.mubr.msk.bf16.gmra.mrb[92].mxu0 %vm322_vm0, %v3073_v0  ;;  %2842 = vmatmul.mubr.msk.bf16.gmra.mrb[92].mxu1 %vm322_vm0, %v3073_v0 }
  0xc3   :  { %691 = vmatprep.mubr.bf16.mxu0 %v3092_v1  ;;  %1044 = vmatprep.mubr.bf16.mxu1 %v3092_v1 }
  0xca   :  { %2811 = vmatmul.mubr.msk.bf16.gmra.mrb[96].mxu0 %vm322_vm0, %v3074_v2  ;;  %2843 = vmatmul.mubr.msk.bf16.gmra.mrb[96].mxu1 %vm322_vm0, %v3074_v2 }
  0xcb   :  { %701 = vmatprep.mubr.bf16.mxu0 %v3092_v1  ;;  %1054 = vmatprep.mubr.bf16.mxu1 %v3092_v1 }
  0xd2   :  { %2812 = vmatmul.mubr.msk.bf16.gmra.mrb[100].mxu0 %vm322_vm0, %v3077_v3  ;;  %2844 = vmatmul.mubr.msk.bf16.gmra.mrb[100].mxu1 %vm322_vm0, %v3077_v3 }
  0xd3   :  { %711 = vmatprep.mubr.bf16.mxu0 %v3092_v1  ;;  %1064 = vmatprep.mubr.bf16.mxu1 %v3092_v1 }
  0xda   :  { %2813 = vmatmul.mubr.msk.bf16.gmra.mrb[104].mxu0 %vm322_vm0, %v3078_v6  ;;  %2845 = vmatmul.mubr.msk.bf16.gmra.mrb[104].mxu1 %vm322_vm0, %v3078_v6 }
  0xdb   :  { %721 = vmatprep.mubr.bf16.mxu0 %v3092_v1  ;;  %1074 = vmatprep.mubr.bf16.mxu1 %v3092_v1 }
  0xdd   :  { %v453_v16 = vpop.f32.mrb[0].mxu0  ;;  %v806_v17 = vpop.f32.mrb[0].mxu1 }
  0xde   :  { %v454_v18 = vadd.f32 %v453_v16, %v3477_v12  ;;  %v807_v19 = vadd.f32 %v806_v17, %v3479_v13  ;;  %v455_v20 = vpop.f32.mrb[1].mxu0  ;;  %v808_v21 = vpop.f32.mrb[1].mxu1 }
  0xdf   :  { %v456_v23 = vadd.f32 %v455_v20, %v3481_v14  ;;  %v809_v24 = vadd.f32 %v808_v21, %v3483_v15  ;;  %v457_v25 = vpop.f32.mrb[2].mxu0  ;;  %v810_v26 = vpop.f32.mrb[2].mxu1  ;;  %v3085_v21 = vld [vmem:[%s4570_s0 + $0xe8] sm:$0xff]  }
  0xe0   :  { %v1125_v27 = vmax.f32 %v454_v18, 0.0  ;;  %v458_v28 = vadd.f32 %v457_v25, %v3477_v12  ;;  %v811_v29 = vadd.f32 %v810_v26, %v3479_v13  ;;  %v459_v30 = vpop.f32.mrb[3].mxu0  ;;  %v812_v31 = vpop.f32.mrb[3].mxu1  ;;  %v1127_v35 = vmax.f32 %v807_v19, 0.0 }
  0xe1   :  { %v1126_v32 = vmax.f32 %v456_v23, 0.0  ;;  %v460_v33 = vadd.f32 %v459_v30, %v3481_v14  ;;  %v813_v34 = vadd.f32 %v812_v31, %v3483_v15  ;;  %v1128_v38 = vmax.f32 %v809_v24, 0.0 }
  0xe2   :  { %v1129_v36 = vmax.f32 %v458_v28, 0.0  ;;  %v1131_v37 = vmax.f32 %v811_v29, 0.0  ;;  %2814 = vmatmul.mubr.msk.bf16.gmra.mrb[108].mxu0 %vm322_vm0, %v3081_v22  ;;  %2846 = vmatmul.mubr.msk.bf16.gmra.mrb[108].mxu1 %vm322_vm0, %v3081_v22 }
  0xe3   :  { %v1130_v39 = vmax.f32 %v460_v33, 0.0  ;;  %v1132_v40 = vmax.f32 %v813_v34, 0.0  ;;  %731 = vmatprep.mubr.bf16.mxu0 %v3092_v1  ;;  %1084 = vmatprep.mubr.bf16.mxu1 %v3092_v1 }
  0xe4   :  { %v3502_v41 = vpack.c.bf16 %v1129_v36, %v1125_v27  ;;  %v3504_v42 = vpack.c.bf16 %v1131_v37, %v1127_v35 }
  0xe5   :  { %v3506_v43 = vpack.c.bf16 %v1130_v39, %v1126_v32  ;;  %v3508_v44 = vpack.c.bf16 %v1132_v40, %v1128_v38  ;;  %v463_v45 = vpop.f32.mrb[4].mxu0  ;;  %v816_v46 = vpop.f32.mrb[4].mxu1 }
  0xe6   :  { %v464_v47 = vadd.f32 %v463_v45, %v3477_v12  ;;  %v817_v48 = vadd.f32 %v816_v46, %v3479_v13  ;;  %v465_v49 = vpop.f32.mrb[5].mxu0  ;;  %v818_v50 = vpop.f32.mrb[5].mxu1 }
  0xe7   :  { %v466_v52 = vadd.f32 %v465_v49, %v3481_v14  ;;  %v819_v53 = vadd.f32 %v818_v50, %v3483_v15  ;;  %v467_v54 = vpop.f32.mrb[6].mxu0  ;;  %v820_v55 = vpop.f32.mrb[6].mxu1 }
  0xe8   :  { %v1133_v56 = vmax.f32 %v464_v47, 0.0  ;;  %v468_v57 = vadd.f32 %v467_v54, %v3477_v12  ;;  %v821_v58 = vadd.f32 %v820_v55, %v3479_v13  ;;  %v469_v59 = vpop.f32.mrb[7].mxu0  ;;  %v822_v60 = vpop.f32.mrb[7].mxu1  ;;  %v1135_v0 = vmax.f32 %v817_v48, 0.0  ;;  %v3086_v54 = vld [vmem:[%s4570_s0 + $0xf0] sm:$0xff]  }
  0xe9   :  { %v1134_v61 = vmax.f32 %v466_v52, 0.0  ;;  %v470_v62 = vadd.f32 %v469_v59, %v3481_v14  ;;  %v823_v63 = vadd.f32 %v822_v60, %v3483_v15  ;;  %v1136_v4 = vmax.f32 %v819_v53, 0.0 }
  0xea   :  { %v1137_v2 = vmax.f32 %v468_v57, 0.0  ;;  %v1139_v3 = vmax.f32 %v821_v58, 0.0  ;;  %2815 = vmatmul.mubr.msk.bf16.gmra.mrb[112].mxu0 %vm322_vm0, %v3082_v51  ;;  %2847 = vmatmul.mubr.msk.bf16.gmra.mrb[112].mxu1 %vm322_vm0, %v3082_v51 }
  0xeb   :  { %v1138_v5 = vmax.f32 %v470_v62, 0.0  ;;  %v1140_v6 = vmax.f32 %v823_v63, 0.0  ;;  %741 = vmatprep.mubr.bf16.mxu0 %v3092_v1  ;;  %1094 = vmatprep.mubr.bf16.mxu1 %v3092_v1 }
  0xec   :  { %v3525_v7 = vpack.c.bf16 %v1137_v2, %v1133_v56  ;;  %v3527_v8 = vpack.c.bf16 %v1139_v3, %v1135_v0 }
  0xed   :  { %v3529_v9 = vpack.c.bf16 %v1138_v5, %v1134_v61  ;;  %v3531_v10 = vpack.c.bf16 %v1140_v6, %v1136_v4  ;;  %v473_v11 = vpop.f32.mrb[8].mxu0  ;;  %v826_v16 = vpop.f32.mrb[8].mxu1 }
  0xee   :  { %v474_v17 = vadd.f32 %v473_v11, %v3477_v12  ;;  %v827_v18 = vadd.f32 %v826_v16, %v3479_v13  ;;  %v475_v19 = vpop.f32.mrb[9].mxu0  ;;  %v828_v20 = vpop.f32.mrb[9].mxu1 }
  0xef   :  { %v476_v22 = vadd.f32 %v475_v19, %v3481_v14  ;;  %v829_v23 = vadd.f32 %v828_v20, %v3483_v15  ;;  %v477_v24 = vpop.f32.mrb[10].mxu0  ;;  %v830_v25 = vpop.f32.mrb[10].mxu1 }
  0xf0   :  { %v1141_v26 = vmax.f32 %v474_v17, 0.0  ;;  %v478_v27 = vadd.f32 %v477_v24, %v3477_v12  ;;  %v831_v28 = vadd.f32 %v830_v25, %v3479_v13  ;;  %v479_v29 = vpop.f32.mrb[11].mxu0  ;;  %v832_v30 = vpop.f32.mrb[11].mxu1  ;;  %v1143_v34 = vmax.f32 %v827_v18, 0.0 }
  0xf1   :  { %v1142_v31 = vmax.f32 %v476_v22, 0.0  ;;  %v480_v32 = vadd.f32 %v479_v29, %v3481_v14  ;;  %v833_v33 = vadd.f32 %v832_v30, %v3483_v15  ;;  %v1144_v37 = vmax.f32 %v829_v23, 0.0 }
  0xf2   :  { %v1145_v35 = vmax.f32 %v478_v27, 0.0  ;;  %v1147_v36 = vmax.f32 %v831_v28, 0.0  ;;  %2816 = vmatmul.mubr.msk.bf16.gmra.mrb[116].mxu0 %vm322_vm0, %v3085_v21  ;;  %2848 = vmatmul.mubr.msk.bf16.gmra.mrb[116].mxu1 %vm322_vm0, %v3085_v21 }
  0xf3   :  { %v1146_v38 = vmax.f32 %v480_v32, 0.0  ;;  %v1148_v39 = vmax.f32 %v833_v33, 0.0  ;;  %751 = vmatprep.mubr.bf16.mxu0 %v3092_v1  ;;  %1104 = vmatprep.mubr.bf16.mxu1 %v3092_v1 }
  0xf4   :  { %v3548_v40 = vpack.c.bf16 %v1145_v35, %v1141_v26  ;;  %v3550_v45 = vpack.c.bf16 %v1147_v36, %v1143_v34 }
  0xf5   :  { %v3552_v46 = vpack.c.bf16 %v1146_v38, %v1142_v31  ;;  %v3554_v47 = vpack.c.bf16 %v1148_v39, %v1144_v37  ;;  %v483_v48 = vpop.f32.mrb[12].mxu0  ;;  %v836_v49 = vpop.f32.mrb[12].mxu1 }
  0xf6   :  { %v484_v50 = vadd.f32 %v483_v48, %v3477_v12  ;;  %v837_v51 = vadd.f32 %v836_v49, %v3479_v13  ;;  %v485_v52 = vpop.f32.mrb[13].mxu0  ;;  %v838_v53 = vpop.f32.mrb[13].mxu1 }
  0xf7   :  { %v486_v55 = vadd.f32 %v485_v52, %v3481_v14  ;;  %v839_v56 = vadd.f32 %v838_v53, %v3483_v15  ;;  %v487_v57 = vpop.f32.mrb[14].mxu0  ;;  %v840_v58 = vpop.f32.mrb[14].mxu1 }
  0xf8   :  { %v1149_v59 = vmax.f32 %v484_v50, 0.0  ;;  %v488_v60 = vadd.f32 %v487_v57, %v3477_v12  ;;  %v841_v61 = vadd.f32 %v840_v58, %v3479_v13  ;;  %v489_v62 = vpop.f32.mrb[15].mxu0  ;;  %v842_v63 = vpop.f32.mrb[15].mxu1  ;;  %v1151_v4 = vmax.f32 %v837_v51, 0.0 }
  0xf9   :  { %v1150_v0 = vmax.f32 %v486_v55, 0.0  ;;  %v490_v2 = vadd.f32 %v489_v62, %v3481_v14  ;;  %v843_v3 = vadd.f32 %v842_v63, %v3483_v15  ;;  %v1152_v11 = vmax.f32 %v839_v56, 0.0 }
  0xfa   :  { %v1153_v5 = vmax.f32 %v488_v60, 0.0  ;;  %v1155_v6 = vmax.f32 %v841_v61, 0.0  ;;  %2817 = vmatmul.mubr.msk.bf16.gmra.mrb[120].mxu0 %vm322_vm0, %v3086_v54  ;;  %2849 = vmatmul.mubr.msk.bf16.gmra.mrb[120].mxu1 %vm322_vm0, %v3086_v54 }
  0xfb   :  { %v1154_v16 = vmax.f32 %v490_v2, 0.0  ;;  %v1156_v17 = vmax.f32 %v843_v3, 0.0  ;;  %761 = vmatprep.mubr.bf16.mxu0 %v3092_v1  ;;  %1114 = vmatprep.mubr.bf16.mxu1 %v3092_v1  ;;  %v3089_v1 = vld [vmem:[%s4570_s0 + $0xf8] sm:$0xff]  }
  0xfc   :  { %v3571_v18 = vpack.c.bf16 %v1153_v5, %v1149_v59  ;;  %v3573_v19 = vpack.c.bf16 %v1155_v6, %v1151_v4 }
  0xfd   :  { %v3575_v20 = vpack.c.bf16 %v1154_v16, %v1150_v0  ;;  %v3577_v21 = vpack.c.bf16 %v1156_v17, %v1152_v11  ;;  %v493_v22 = vpop.f32.mrb[16].mxu0  ;;  %v846_v23 = vpop.f32.mrb[16].mxu1 }
  0xfe   :  { %v494_v24 = vadd.f32 %v493_v22, %v3477_v12  ;;  %v847_v25 = vadd.f32 %v846_v23, %v3479_v13  ;;  %v495_v26 = vpop.f32.mrb[17].mxu0  ;;  %v848_v27 = vpop.f32.mrb[17].mxu1 }
  0xff   :  { %v496_v28 = vadd.f32 %v495_v26, %v3481_v14  ;;  %v849_v29 = vadd.f32 %v848_v27, %v3483_v15  ;;  %v497_v30 = vpop.f32.mrb[18].mxu0  ;;  %v850_v31 = vpop.f32.mrb[18].mxu1 }
 0x100   :  { %v1157_v32 = vmax.f32 %v494_v24, 0.0  ;;  %v498_v33 = vadd.f32 %v497_v30, %v3477_v12  ;;  %v851_v34 = vadd.f32 %v850_v31, %v3479_v13  ;;  %v499_v35 = vpop.f32.mrb[19].mxu0  ;;  %v852_v36 = vpop.f32.mrb[19].mxu1  ;;  %v1159_v48 = vmax.f32 %v847_v25, 0.0 }
 0x101   :  { %v1158_v37 = vmax.f32 %v496_v28, 0.0  ;;  %v500_v38 = vadd.f32 %v499_v35, %v3481_v14  ;;  %v853_v39 = vadd.f32 %v852_v36, %v3483_v15  ;;  %v1160_v51 = vmax.f32 %v849_v29, 0.0 }
 0x102   :  { %v1161_v49 = vmax.f32 %v498_v33, 0.0  ;;  %v1163_v50 = vmax.f32 %v851_v34, 0.0  ;;  %2818 = vmatmul.mubr.msk.bf16.gmra.mrb[124].mxu0 %vm322_vm0, %v3089_v1  ;;  %2850 = vmatmul.mubr.msk.bf16.gmra.mrb[124].mxu1 %vm322_vm0, %v3089_v1 }
 0x103   :  { %v1162_v52 = vmax.f32 %v500_v38, 0.0  ;;  %v1164_v53 = vmax.f32 %v853_v39, 0.0  ;;  %1804 = vmatprep.mubr.bf16.mxu1 %v3506_v43  ;;  %2093 = vmatprep.mubr.bf16.mxu0 %v3508_v44 }
 0x104   :  { %v3594_v54 = vpack.c.bf16 %v1161_v49, %v1157_v32  ;;  %v3596_v55 = vpack.c.bf16 %v1163_v50, %v1159_v48 }
 0x105   :  { %v3598_v56 = vpack.c.bf16 %v1162_v52, %v1158_v37  ;;  %v3600_v57 = vpack.c.bf16 %v1164_v53, %v1160_v51  ;;  %v503_v58 = vpop.f32.mrb[20].mxu0  ;;  %v856_v59 = vpop.f32.mrb[20].mxu1 }
 0x106   :  { %v504_v60 = vadd.f32 %v503_v58, %v3477_v12  ;;  %v857_v61 = vadd.f32 %v856_v59, %v3479_v13  ;;  %v505_v62 = vpop.f32.mrb[21].mxu0  ;;  %v858_v63 = vpop.f32.mrb[21].mxu1 }
 0x107   :  { %v506_v43 = vadd.f32 %v505_v62, %v3481_v14  ;;  %v859_v44 = vadd.f32 %v858_v63, %v3483_v15  ;;  %v507_v0 = vpop.f32.mrb[22].mxu0  ;;  %v860_v2 = vpop.f32.mrb[22].mxu1 }
 0x108   :  { %v1165_v3 = vmax.f32 %v504_v60, 0.0  ;;  %v508_v4 = vadd.f32 %v507_v0, %v3477_v12  ;;  %v861_v5 = vadd.f32 %v860_v2, %v3479_v13  ;;  %v509_v6 = vpop.f32.mrb[23].mxu0  ;;  %v862_v11 = vpop.f32.mrb[23].mxu1  ;;  %v1167_v23 = vmax.f32 %v857_v61, 0.0 }
 0x109   :  { %v1166_v16 = vmax.f32 %v506_v43, 0.0  ;;  %v510_v17 = vadd.f32 %v509_v6, %v3481_v14  ;;  %v863_v22 = vadd.f32 %v862_v11, %v3483_v15  ;;  %v1168_v26 = vmax.f32 %v859_v44, 0.0 }
 0x10a   :  { %v1169_v24 = vmax.f32 %v508_v4, 0.0  ;;  %v1171_v25 = vmax.f32 %v861_v5, 0.0  ;;  %1805 = vmatmul.mubr.bf16.vlgmr.msra.gmra.mrb[128].mxu1 %v3502_v41  ;;  %2094 = vmatmul.mubr.bf16.vlgmr.msra.gmra.mrb[128].mxu0 %v3504_v42 }
 0x10b   :  { %v1170_v27 = vmax.f32 %v510_v17, 0.0  ;;  %v1172_v1 = vmax.f32 %v863_v22, 0.0  ;;  %1812 = vmatprep.mubr.bf16.mxu1 %v3529_v9  ;;  %2101 = vmatprep.mubr.bf16.mxu0 %v3531_v10 }
 0x10c   :  { %v3614_v28 = vpack.c.bf16 %v1169_v24, %v1165_v3  ;;  %v3616_v29 = vpack.c.bf16 %v1171_v25, %v1167_v23 }
 0x10d   :  { %v3618_v30 = vpack.c.bf16 %v1170_v27, %v1166_v16  ;;  %v3620_v31 = vpack.c.bf16 %v1172_v1, %v1168_v26  ;;  %v513_v32 = vpop.f32.mrb[24].mxu0  ;;  %v866_v33 = vpop.f32.mrb[24].mxu1 }
 0x10e   :  { %v514_v41 = vadd.f32 %v513_v32, %v3477_v12  ;;  %v867_v42 = vadd.f32 %v866_v33, %v3479_v13  ;;  %v515_v34 = vpop.f32.mrb[25].mxu0  ;;  %v868_v35 = vpop.f32.mrb[25].mxu1 }
 0x10f   :  { %v516_v9 = vadd.f32 %v515_v34, %v3481_v14  ;;  %v869_v10 = vadd.f32 %v868_v35, %v3483_v15  ;;  %v517_v36 = vpop.f32.mrb[26].mxu0  ;;  %v870_v37 = vpop.f32.mrb[26].mxu1 }
 0x110   :  { %v1173_v38 = vmax.f32 %v514_v41, 0.0  ;;  %v518_v39 = vadd.f32 %v517_v36, %v3477_v12  ;;  %v871_v48 = vadd.f32 %v870_v37, %v3479_v13  ;;  %v519_v49 = vpop.f32.mrb[27].mxu0  ;;  %v872_v50 = vpop.f32.mrb[27].mxu1  ;;  %v1175_v58 = vmax.f32 %v867_v42, 0.0 }
 0x111   :  { %v1174_v51 = vmax.f32 %v516_v9, 0.0  ;;  %v520_v52 = vadd.f32 %v519_v49, %v3481_v14  ;;  %v873_v53 = vadd.f32 %v872_v50, %v3483_v15  ;;  %v1176_v61 = vmax.f32 %v869_v10, 0.0 }
 0x112   :  { %v1177_v59 = vmax.f32 %v518_v39, 0.0  ;;  %v1179_v60 = vmax.f32 %v871_v48, 0.0  ;;  %1813 = vmatmul.mubr.bf16.gmra.mrb[132].mxu1 %v3525_v7  ;;  %2102 = vmatmul.mubr.bf16.gmra.mrb[132].mxu0 %v3527_v8 }
 0x113   :  { %v1178_v62 = vmax.f32 %v520_v52, 0.0  ;;  %v1180_v63 = vmax.f32 %v873_v53, 0.0  ;;  %1820 = vmatprep.mubr.bf16.mxu1 %v3552_v46  ;;  %2109 = vmatprep.mubr.bf16.mxu0 %v3554_v47 }
 0x114   :  { %v3634_v43 = vpack.c.bf16 %v1177_v59, %v1173_v38  ;;  %v3636_v44 = vpack.c.bf16 %v1179_v60, %v1175_v58 }
 0x115   :  { %v3638_v0 = vpack.c.bf16 %v1178_v62, %v1174_v51  ;;  %v3640_v2 = vpack.c.bf16 %v1180_v63, %v1176_v61  ;;  %v523_v3 = vpop.f32.mrb[28].mxu0  ;;  %v876_v4 = vpop.f32.mrb[28].mxu1 }
 0x116   :  { %v524_v7 = vadd.f32 %v523_v3, %v3477_v12  ;;  %v877_v8 = vadd.f32 %v876_v4, %v3479_v13  ;;  %v525_v5 = vpop.f32.mrb[29].mxu0  ;;  %v878_v6 = vpop.f32.mrb[29].mxu1 }
 0x117   :  { %v526_v46 = vadd.f32 %v525_v5, %v3481_v14  ;;  %v879_v47 = vadd.f32 %v878_v6, %v3483_v15  ;;  %v527_v11 = vpop.f32.mrb[30].mxu0  ;;  %v880_v16 = vpop.f32.mrb[30].mxu1 }
 0x118   :  { %v1181_v17 = vmax.f32 %v524_v7, 0.0  ;;  %v528_v22 = vadd.f32 %v527_v11, %v3477_v12  ;;  %v881_v23 = vadd.f32 %v880_v16, %v3479_v13  ;;  %v529_v24 = vpop.f32.mrb[31].mxu0  ;;  %v882_v25 = vpop.f32.mrb[31].mxu1  ;;  %v1183_v32 = vmax.f32 %v877_v8, 0.0 }
 0x119   :  { %v1182_v26 = vmax.f32 %v526_v46, 0.0  ;;  %v530_v27 = vadd.f32 %v529_v24, %v3481_v14  ;;  %v883_v1 = vadd.f32 %v882_v25, %v3483_v15  ;;  %v1184_v42 = vmax.f32 %v879_v47, 0.0 }
 0x11a   :  { %v1185_v33 = vmax.f32 %v528_v22, 0.0  ;;  %v1187_v41 = vmax.f32 %v881_v23, 0.0  ;;  %1821 = vmatmul.mubr.bf16.gmra.mrb[136].mxu1 %v3548_v40  ;;  %2110 = vmatmul.mubr.bf16.gmra.mrb[136].mxu0 %v3550_v45 }
 0x11b   :  { %v1186_v34 = vmax.f32 %v530_v27, 0.0  ;;  %v1188_v35 = vmax.f32 %v883_v1, 0.0  ;;  %1828 = vmatprep.mubr.bf16.mxu1 %v3575_v20  ;;  %2117 = vmatprep.mubr.bf16.mxu0 %v3577_v21 }
 0x11c   :  { %v3654_v9 = vpack.c.bf16 %v1185_v33, %v1181_v17  ;;  %v3656_v10 = vpack.c.bf16 %v1187_v41, %v1183_v32 }
 0x11d   :  { %v3658_v36 = vpack.c.bf16 %v1186_v34, %v1182_v26  ;;  %v3660_v37 = vpack.c.bf16 %v1188_v35, %v1184_v42  ;;  %v533_v38 = vpop.f32.mrb[32].mxu0  ;;  %v886_v39 = vpop.f32.mrb[32].mxu1 }
 0x11e   :  { %v534_v40 = vadd.f32 %v533_v38, %v3477_v12  ;;  %v887_v45 = vadd.f32 %v886_v39, %v3479_v13  ;;  %v535_v48 = vpop.f32.mrb[33].mxu0  ;;  %v888_v49 = vpop.f32.mrb[33].mxu1 }
 0x11f   :  { %v536_v20 = vadd.f32 %v535_v48, %v3481_v14  ;;  %v889_v21 = vadd.f32 %v888_v49, %v3483_v15  ;;  %v537_v50 = vpop.f32.mrb[34].mxu0  ;;  %v890_v51 = vpop.f32.mrb[34].mxu1 }
 0x120   :  { %v1189_v52 = vmax.f32 %v534_v40, 0.0  ;;  %v538_v53 = vadd.f32 %v537_v50, %v3477_v12  ;;  %v891_v58 = vadd.f32 %v890_v51, %v3479_v13  ;;  %v539_v59 = vpop.f32.mrb[35].mxu0  ;;  %v892_v60 = vpop.f32.mrb[35].mxu1  ;;  %v1191_v3 = vmax.f32 %v887_v45, 0.0 }
 0x121   :  { %v1190_v61 = vmax.f32 %v536_v20, 0.0  ;;  %v540_v62 = vadd.f32 %v539_v59, %v3481_v14  ;;  %v893_v63 = vadd.f32 %v892_v60, %v3483_v15  ;;  %v1192_v8 = vmax.f32 %v889_v21, 0.0 }
 0x122   :  { %v1193_v4 = vmax.f32 %v538_v53, 0.0  ;;  %v1195_v7 = vmax.f32 %v891_v58, 0.0  ;;  %1829 = vmatmul.mubr.bf16.gmra.mrb[140].mxu1 %v3571_v18  ;;  %2118 = vmatmul.mubr.bf16.gmra.mrb[140].mxu0 %v3573_v19 }
 0x123   :  { %v1194_v5 = vmax.f32 %v540_v62, 0.0  ;;  %v1196_v6 = vmax.f32 %v893_v63, 0.0  ;;  %1836 = vmatprep.mubr.bf16.mxu1 %v3598_v56  ;;  %2125 = vmatprep.mubr.bf16.mxu0 %v3600_v57 }
 0x124   :  { %v3674_v46 = vpack.c.bf16 %v1193_v4, %v1189_v52  ;;  %v3676_v47 = vpack.c.bf16 %v1195_v7, %v1191_v3 }
 0x125   :  { %v3678_v11 = vpack.c.bf16 %v1194_v5, %v1190_v61  ;;  %v3680_v16 = vpack.c.bf16 %v1196_v6, %v1192_v8  ;;  %v543_v17 = vpop.f32.mrb[36].mxu0  ;;  %v896_v22 = vpop.f32.mrb[36].mxu1 }
 0x126   :  { %v544_v18 = vadd.f32 %v543_v17, %v3477_v12  ;;  %v897_v19 = vadd.f32 %v896_v22, %v3479_v13  ;;  %v545_v23 = vpop.f32.mrb[37].mxu0  ;;  %v898_v24 = vpop.f32.mrb[37].mxu1 }
 0x127   :  { %v546_v56 = vadd.f32 %v545_v23, %v3481_v14  ;;  %v899_v57 = vadd.f32 %v898_v24, %v3483_v15  ;;  %v547_v25 = vpop.f32.mrb[38].mxu0  ;;  %v900_v26 = vpop.f32.mrb[38].mxu1 }
 0x128   :  { %v1197_v27 = vmax.f32 %v544_v18, 0.0  ;;  %v548_v1 = vadd.f32 %v547_v25, %v3477_v12  ;;  %v901_v32 = vadd.f32 %v900_v26, %v3479_v13  ;;  %v549_v33 = vpop.f32.mrb[39].mxu0  ;;  %v902_v41 = vpop.f32.mrb[39].mxu1  ;;  %v1199_v38 = vmax.f32 %v897_v19, 0.0 }
 0x129   :  { %v1198_v42 = vmax.f32 %v546_v56, 0.0  ;;  %v550_v34 = vadd.f32 %v549_v33, %v3481_v14  ;;  %v903_v35 = vadd.f32 %v902_v41, %v3483_v15  ;;  %v1200_v45 = vmax.f32 %v899_v57, 0.0 }
 0x12a   :  { %v1201_v39 = vmax.f32 %v548_v1, 0.0  ;;  %v1203_v40 = vmax.f32 %v901_v32, 0.0  ;;  %1837 = vmatmul.mubr.bf16.gmra.mrb[144].mxu1 %v3594_v54  ;;  %2126 = vmatmul.mubr.bf16.gmra.mrb[144].mxu0 %v3596_v55 }
 0x12b   :  { %v1202_v48 = vmax.f32 %v550_v34, 0.0  ;;  %v1204_v49 = vmax.f32 %v903_v35, 0.0  ;;  %1844 = vmatprep.mubr.bf16.mxu1 %v3618_v30  ;;  %2133 = vmatprep.mubr.bf16.mxu0 %v3620_v31 }
 0x12c   :  { %v3694_v20 = vpack.c.bf16 %v1201_v39, %v1197_v27  ;;  %v3696_v21 = vpack.c.bf16 %v1203_v40, %v1199_v38 }
 0x12d   :  { %v3698_v50 = vpack.c.bf16 %v1202_v48, %v1198_v42  ;;  %v3700_v51 = vpack.c.bf16 %v1204_v49, %v1200_v45  ;;  %v553_v52 = vpop.f32.mrb[40].mxu0  ;;  %v906_v53 = vpop.f32.mrb[40].mxu1 }
 0x12e   :  { %v554_v54 = vadd.f32 %v553_v52, %v3477_v12  ;;  %v907_v55 = vadd.f32 %v906_v53, %v3479_v13  ;;  %v555_v58 = vpop.f32.mrb[41].mxu0  ;;  %v908_v59 = vpop.f32.mrb[41].mxu1 }
 0x12f   :  { %v556_v30 = vadd.f32 %v555_v58, %v3481_v14  ;;  %v909_v31 = vadd.f32 %v908_v59, %v3483_v15  ;;  %v557_v60 = vpop.f32.mrb[42].mxu0  ;;  %v910_v61 = vpop.f32.mrb[42].mxu1 }
 0x130   :  { %v1205_v62 = vmax.f32 %v554_v54, 0.0  ;;  %v558_v63 = vadd.f32 %v557_v60, %v3477_v12  ;;  %v911_v3 = vadd.f32 %v910_v61, %v3479_v13  ;;  %v559_v4 = vpop.f32.mrb[43].mxu0  ;;  %v912_v7 = vpop.f32.mrb[43].mxu1  ;;  %v1207_v17 = vmax.f32 %v907_v55, 0.0 }
 0x131   :  { %v1206_v8 = vmax.f32 %v556_v30, 0.0  ;;  %v560_v5 = vadd.f32 %v559_v4, %v3481_v14  ;;  %v913_v6 = vadd.f32 %v912_v7, %v3483_v15  ;;  %v1208_v19 = vmax.f32 %v909_v31, 0.0 }
 0x132   :  { %v1209_v22 = vmax.f32 %v558_v63, 0.0  ;;  %v1211_v18 = vmax.f32 %v911_v3, 0.0  ;;  %1845 = vmatmul.mubr.bf16.gmra.mrb[148].mxu1 %v3614_v28  ;;  %2134 = vmatmul.mubr.bf16.gmra.mrb[148].mxu0 %v3616_v29 }
 0x133   :  { %v1210_v23 = vmax.f32 %v560_v5, 0.0  ;;  %v1212_v24 = vmax.f32 %v913_v6, 0.0  ;;  %1852 = vmatprep.mubr.bf16.mxu1 %v3638_v0  ;;  %2141 = vmatprep.mubr.bf16.mxu0 %v3640_v2 }
 0x134   :  { %v3714_v56 = vpack.c.bf16 %v1209_v22, %v1205_v62  ;;  %v3716_v57 = vpack.c.bf16 %v1211_v18, %v1207_v17 }
 0x135   :  { %v3718_v25 = vpack.c.bf16 %v1210_v23, %v1206_v8  ;;  %v3720_v26 = vpack.c.bf16 %v1212_v24, %v1208_v19  ;;  %v563_v27 = vpop.f32.mrb[44].mxu0  ;;  %v916_v1 = vpop.f32.mrb[44].mxu1 }
 0x136   :  { %v564_v28 = vadd.f32 %v563_v27, %v3477_v12  ;;  %v917_v29 = vadd.f32 %v916_v1, %v3479_v13  ;;  %v565_v32 = vpop.f32.mrb[45].mxu0  ;;  %v918_v33 = vpop.f32.mrb[45].mxu1 }
 0x137   :  { %v566_v0 = vadd.f32 %v565_v32, %v3481_v14  ;;  %v919_v2 = vadd.f32 %v918_v33, %v3483_v15  ;;  %v567_v41 = vpop.f32.mrb[46].mxu0  ;;  %v920_v42 = vpop.f32.mrb[46].mxu1 }
 0x138   :  { %v1213_v34 = vmax.f32 %v564_v28, 0.0  ;;  %v568_v35 = vadd.f32 %v567_v41, %v3477_v12  ;;  %v921_v38 = vadd.f32 %v920_v42, %v3479_v13  ;;  %v569_v39 = vpop.f32.mrb[47].mxu0  ;;  %v922_v40 = vpop.f32.mrb[47].mxu1  ;;  %v1215_v52 = vmax.f32 %v917_v29, 0.0 }
 0x139   :  { %v1214_v45 = vmax.f32 %v566_v0, 0.0  ;;  %v570_v48 = vadd.f32 %v569_v39, %v3481_v14  ;;  %v923_v49 = vadd.f32 %v922_v40, %v3483_v15  ;;  %v1216_v55 = vmax.f32 %v919_v2, 0.0 }
 0x13a   :  { %v1217_v53 = vmax.f32 %v568_v35, 0.0  ;;  %v1219_v54 = vmax.f32 %v921_v38, 0.0  ;;  %1853 = vmatmul.mubr.bf16.gmra.mrb[152].mxu1 %v3634_v43  ;;  %2142 = vmatmul.mubr.bf16.gmra.mrb[152].mxu0 %v3636_v44 }
 0x13b   :  { %v1218_v58 = vmax.f32 %v570_v48, 0.0  ;;  %v1220_v59 = vmax.f32 %v923_v49, 0.0  ;;  %1860 = vmatprep.mubr.bf16.mxu1 %v3658_v36  ;;  %2149 = vmatprep.mubr.bf16.mxu0 %v3660_v37 }
 0x13c   :  { %v3734_v30 = vpack.c.bf16 %v1217_v53, %v1213_v34  ;;  %v3736_v31 = vpack.c.bf16 %v1219_v54, %v1215_v52 }
 0x13d   :  { %v3738_v60 = vpack.c.bf16 %v1218_v58, %v1214_v45  ;;  %v3740_v61 = vpack.c.bf16 %v1220_v59, %v1216_v55  ;;  %v573_v62 = vpop.f32.mrb[48].mxu0  ;;  %v926_v63 = vpop.f32.mrb[48].mxu1 }
 0x13e   :  { %v574_v43 = vadd.f32 %v573_v62, %v3477_v12  ;;  %v927_v44 = vadd.f32 %v926_v63, %v3479_v13  ;;  %v575_v3 = vpop.f32.mrb[49].mxu0  ;;  %v928_v4 = vpop.f32.mrb[49].mxu1 }
 0x13f   :  { %v576_v36 = vadd.f32 %v575_v3, %v3481_v14  ;;  %v929_v37 = vadd.f32 %v928_v4, %v3483_v15  ;;  %v577_v7 = vpop.f32.mrb[50].mxu0  ;;  %v930_v8 = vpop.f32.mrb[50].mxu1 }
 0x140   :  { %v1221_v5 = vmax.f32 %v574_v43, 0.0  ;;  %v578_v6 = vadd.f32 %v577_v7, %v3477_v12  ;;  %v931_v17 = vadd.f32 %v930_v8, %v3479_v13  ;;  %v579_v22 = vpop.f32.mrb[51].mxu0  ;;  %v932_v18 = vpop.f32.mrb[51].mxu1  ;;  %v1223_v27 = vmax.f32 %v927_v44, 0.0 }
 0x141   :  { %v1222_v19 = vmax.f32 %v576_v36, 0.0  ;;  %v580_v23 = vadd.f32 %v579_v22, %v3481_v14  ;;  %v933_v24 = vadd.f32 %v932_v18, %v3483_v15  ;;  %v1224_v29 = vmax.f32 %v929_v37, 0.0 }
 0x142   :  { %v1225_v1 = vmax.f32 %v578_v6, 0.0  ;;  %v1227_v28 = vmax.f32 %v931_v17, 0.0  ;;  %1861 = vmatmul.mubr.bf16.gmra.mrb[156].mxu1 %v3654_v9  ;;  %2150 = vmatmul.mubr.bf16.gmra.mrb[156].mxu0 %v3656_v10 }
 0x143   :  { %v1226_v32 = vmax.f32 %v580_v23, 0.0  ;;  %v1228_v33 = vmax.f32 %v933_v24, 0.0  ;;  %1868 = vmatprep.mubr.bf16.mxu1 %v3678_v11  ;;  %2157 = vmatprep.mubr.bf16.mxu0 %v3680_v16 }
 0x144   :  { %v3754_v0 = vpack.c.bf16 %v1225_v1, %v1221_v5  ;;  %v3756_v2 = vpack.c.bf16 %v1227_v28, %v1223_v27 }
 0x145   :  { %v3758_v41 = vpack.c.bf16 %v1226_v32, %v1222_v19  ;;  %v3760_v42 = vpack.c.bf16 %v1228_v33, %v1224_v29  ;;  %v583_v34 = vpop.f32.mrb[52].mxu0  ;;  %v936_v35 = vpop.f32.mrb[52].mxu1 }
 0x146   :  { %v584_v9 = vadd.f32 %v583_v34, %v3477_v12  ;;  %v937_v10 = vadd.f32 %v936_v35, %v3479_v13  ;;  %v585_v38 = vpop.f32.mrb[53].mxu0  ;;  %v938_v39 = vpop.f32.mrb[53].mxu1 }
 0x147   :  { %v586_v11 = vadd.f32 %v585_v38, %v3481_v14  ;;  %v939_v16 = vadd.f32 %v938_v39, %v3483_v15  ;;  %v587_v40 = vpop.f32.mrb[54].mxu0  ;;  %v940_v45 = vpop.f32.mrb[54].mxu1 }
 0x148   :  { %v1229_v48 = vmax.f32 %v584_v9, 0.0  ;;  %v588_v49 = vadd.f32 %v587_v40, %v3477_v12  ;;  %v941_v52 = vadd.f32 %v940_v45, %v3479_v13  ;;  %v589_v53 = vpop.f32.mrb[55].mxu0  ;;  %v942_v54 = vpop.f32.mrb[55].mxu1  ;;  %v1231_v62 = vmax.f32 %v937_v10, 0.0 }
 0x149   :  { %v1230_v55 = vmax.f32 %v586_v11, 0.0  ;;  %v590_v58 = vadd.f32 %v589_v53, %v3481_v14  ;;  %v943_v59 = vadd.f32 %v942_v54, %v3483_v15  ;;  %v1232_v44 = vmax.f32 %v939_v16, 0.0 }
 0x14a   :  { %v1233_v63 = vmax.f32 %v588_v49, 0.0  ;;  %v1235_v43 = vmax.f32 %v941_v52, 0.0  ;;  %1869 = vmatmul.mubr.bf16.gmra.mrb[160].mxu1 %v3674_v46  ;;  %2158 = vmatmul.mubr.bf16.gmra.mrb[160].mxu0 %v3676_v47 }
 0x14b   :  { %v1234_v3 = vmax.f32 %v590_v58, 0.0  ;;  %v1236_v4 = vmax.f32 %v943_v59, 0.0  ;;  %1876 = vmatprep.mubr.bf16.mxu1 %v3698_v50  ;;  %2165 = vmatprep.mubr.bf16.mxu0 %v3700_v51 }
 0x14c   :  { %v3774_v36 = vpack.c.bf16 %v1233_v63, %v1229_v48  ;;  %v3776_v37 = vpack.c.bf16 %v1235_v43, %v1231_v62 }
 0x14d   :  { %v3778_v7 = vpack.c.bf16 %v1234_v3, %v1230_v55  ;;  %v3780_v8 = vpack.c.bf16 %v1236_v4, %v1232_v44  ;;  %v593_v5 = vpop.f32.mrb[56].mxu0  ;;  %v946_v6 = vpop.f32.mrb[56].mxu1 }
 0x14e   :  { %v594_v46 = vadd.f32 %v593_v5, %v3477_v12  ;;  %v947_v47 = vadd.f32 %v946_v6, %v3479_v13  ;;  %v595_v17 = vpop.f32.mrb[57].mxu0  ;;  %v948_v22 = vpop.f32.mrb[57].mxu1 }
 0x14f   :  { %v596_v50 = vadd.f32 %v595_v17, %v3481_v14  ;;  %v949_v51 = vadd.f32 %v948_v22, %v3483_v15  ;;  %v597_v18 = vpop.f32.mrb[58].mxu0  ;;  %v950_v19 = vpop.f32.mrb[58].mxu1 }
 0x150   :  { %v1237_v23 = vmax.f32 %v594_v46, 0.0  ;;  %v598_v24 = vadd.f32 %v597_v18, %v3477_v12  ;;  %v951_v27 = vadd.f32 %v950_v19, %v3479_v13  ;;  %v599_v1 = vpop.f32.mrb[59].mxu0  ;;  %v952_v28 = vpop.f32.mrb[59].mxu1  ;;  %v1239_v34 = vmax.f32 %v947_v47, 0.0 }
 0x151   :  { %v1238_v29 = vmax.f32 %v596_v50, 0.0  ;;  %v600_v32 = vadd.f32 %v599_v1, %v3481_v14  ;;  %v953_v33 = vadd.f32 %v952_v28, %v3483_v15  ;;  %v1240_v10 = vmax.f32 %v949_v51, 0.0 }
 0x152   :  { %v1241_v35 = vmax.f32 %v598_v24, 0.0  ;;  %v1243_v9 = vmax.f32 %v951_v27, 0.0  ;;  %1877 = vmatmul.mubr.bf16.gmra.mrb[164].mxu1 %v3694_v20  ;;  %2166 = vmatmul.mubr.bf16.gmra.mrb[164].mxu0 %v3696_v21 }
 0x153   :  { %v1242_v38 = vmax.f32 %v600_v32, 0.0  ;;  %v1244_v39 = vmax.f32 %v953_v33, 0.0  ;;  %1884 = vmatprep.mubr.bf16.mxu1 %v3718_v25  ;;  %2173 = vmatprep.mubr.bf16.mxu0 %v3720_v26 }
 0x154   :  { %v3794_v11 = vpack.c.bf16 %v1241_v35, %v1237_v23  ;;  %v3796_v16 = vpack.c.bf16 %v1243_v9, %v1239_v34 }
 0x155   :  { %v3798_v40 = vpack.c.bf16 %v1242_v38, %v1238_v29  ;;  %v3800_v45 = vpack.c.bf16 %v1244_v39, %v1240_v10  ;;  %v603_v48 = vpop.f32.mrb[60].mxu0  ;;  %v956_v49 = vpop.f32.mrb[60].mxu1 }
 0x156   :  { %v604_v20 = vadd.f32 %v603_v48, %v3477_v12  ;;  %v957_v21 = vadd.f32 %v956_v49, %v3479_v13  ;;  %v605_v52 = vpop.f32.mrb[61].mxu0  ;;  %v958_v53 = vpop.f32.mrb[61].mxu1 }
 0x157   :  { %v606_v25 = vadd.f32 %v605_v52, %v3481_v14  ;;  %v959_v26 = vadd.f32 %v958_v53, %v3483_v15  ;;  %v607_v54 = vpop.f32.mrb[62].mxu0  ;;  %v960_v55 = vpop.f32.mrb[62].mxu1 }
 0x158   :  { %v1245_v58 = vmax.f32 %v604_v20, 0.0  ;;  %v608_v59 = vadd.f32 %v607_v54, %v3477_v12  ;;  %v961_v62 = vadd.f32 %v960_v55, %v3479_v13  ;;  %v609_v63 = vpop.f32.mrb[63].mxu0  ;;  %v962_v43 = vpop.f32.mrb[63].mxu1  ;;  %v1247_v5 = vmax.f32 %v957_v21, 0.0 }
 0x159   :  { %v1246_v44 = vmax.f32 %v606_v25, 0.0  ;;  %v610_v3 = vadd.f32 %v609_v63, %v3481_v14  ;;  %v963_v4 = vadd.f32 %v962_v43, %v3483_v15  ;;  %v1248_v47 = vmax.f32 %v959_v26, 0.0 }
 0x15a   :  { %v1249_v6 = vmax.f32 %v608_v59, 0.0  ;;  %v1251_v46 = vmax.f32 %v961_v62, 0.0  ;;  %1885 = vmatmul.mubr.bf16.gmra.mrb[168].mxu1 %v3714_v56  ;;  %2174 = vmatmul.mubr.bf16.gmra.mrb[168].mxu0 %v3716_v57 }
 0x15b   :  { %v1250_v17 = vmax.f32 %v610_v3, 0.0  ;;  %v1252_v22 = vmax.f32 %v963_v4, 0.0  ;;  %1892 = vmatprep.mubr.bf16.mxu1 %v3738_v60  ;;  %2181 = vmatprep.mubr.bf16.mxu0 %v3740_v61 }
 0x15c   :  { %v3814_v50 = vpack.c.bf16 %v1249_v6, %v1245_v58  ;;  %v3816_v51 = vpack.c.bf16 %v1251_v46, %v1247_v5 }
 0x15d   :  { %v3818_v18 = vpack.c.bf16 %v1250_v17, %v1246_v44  ;;  %v3820_v19 = vpack.c.bf16 %v1252_v22, %v1248_v47  ;;  %v613_v23 = vpop.f32.mrb[64].mxu0  ;;  %v966_v24 = vpop.f32.mrb[64].mxu1 }
 0x15e   :  { %v614_v56 = vadd.f32 %v613_v23, %v3477_v12  ;;  %v967_v57 = vadd.f32 %v966_v24, %v3479_v13  ;;  %v615_v27 = vpop.f32.mrb[65].mxu0  ;;  %v968_v1 = vpop.f32.mrb[65].mxu1 }
 0x15f   :  { %v616_v60 = vadd.f32 %v615_v27, %v3481_v14  ;;  %v969_v61 = vadd.f32 %v968_v1, %v3483_v15  ;;  %v617_v28 = vpop.f32.mrb[66].mxu0  ;;  %v970_v29 = vpop.f32.mrb[66].mxu1 }
 0x160   :  { %v1253_v32 = vmax.f32 %v614_v56, 0.0  ;;  %v618_v33 = vadd.f32 %v617_v28, %v3477_v12  ;;  %v971_v34 = vadd.f32 %v970_v29, %v3479_v13  ;;  %v619_v35 = vpop.f32.mrb[67].mxu0  ;;  %v972_v9 = vpop.f32.mrb[67].mxu1  ;;  %v1255_v48 = vmax.f32 %v967_v57, 0.0 }
 0x161   :  { %v1254_v10 = vmax.f32 %v616_v60, 0.0  ;;  %v620_v38 = vadd.f32 %v619_v35, %v3481_v14  ;;  %v973_v39 = vadd.f32 %v972_v9, %v3483_v15  ;;  %v1256_v21 = vmax.f32 %v969_v61, 0.0 }
 0x162   :  { %v1257_v49 = vmax.f32 %v618_v33, 0.0  ;;  %v1259_v20 = vmax.f32 %v971_v34, 0.0  ;;  %1893 = vmatmul.mubr.bf16.gmra.mrb[172].mxu1 %v3734_v30  ;;  %2182 = vmatmul.mubr.bf16.gmra.mrb[172].mxu0 %v3736_v31 }
 0x163   :  { %v1258_v52 = vmax.f32 %v620_v38, 0.0  ;;  %v1260_v53 = vmax.f32 %v973_v39, 0.0  ;;  %1900 = vmatprep.mubr.bf16.mxu1 %v3758_v41  ;;  %2189 = vmatprep.mubr.bf16.mxu0 %v3760_v42 }
 0x164   :  { %v3834_v25 = vpack.c.bf16 %v1257_v49, %v1253_v32  ;;  %v3836_v26 = vpack.c.bf16 %v1259_v20, %v1255_v48 }
 0x165   :  { %v3838_v54 = vpack.c.bf16 %v1258_v52, %v1254_v10  ;;  %v3840_v55 = vpack.c.bf16 %v1260_v53, %v1256_v21  ;;  %v623_v58 = vpop.f32.mrb[68].mxu0  ;;  %v976_v59 = vpop.f32.mrb[68].mxu1 }
 0x166   :  { %v624_v30 = vadd.f32 %v623_v58, %v3477_v12  ;;  %v977_v31 = vadd.f32 %v976_v59, %v3479_v13  ;;  %v625_v62 = vpop.f32.mrb[69].mxu0  ;;  %v978_v63 = vpop.f32.mrb[69].mxu1 }
 0x167   :  { %v626_v41 = vadd.f32 %v625_v62, %v3481_v14  ;;  %v979_v42 = vadd.f32 %v978_v63, %v3483_v15  ;;  %v627_v43 = vpop.f32.mrb[70].mxu0  ;;  %v980_v44 = vpop.f32.mrb[70].mxu1 }
 0x168   :  { %v1261_v3 = vmax.f32 %v624_v30, 0.0  ;;  %v628_v4 = vadd.f32 %v627_v43, %v3477_v12  ;;  %v981_v5 = vadd.f32 %v980_v44, %v3479_v13  ;;  %v629_v6 = vpop.f32.mrb[71].mxu0  ;;  %v982_v46 = vpop.f32.mrb[71].mxu1  ;;  %v1263_v23 = vmax.f32 %v977_v31, 0.0 }
 0x169   :  { %v1262_v47 = vmax.f32 %v626_v41, 0.0  ;;  %v630_v17 = vadd.f32 %v629_v6, %v3481_v14  ;;  %v983_v22 = vadd.f32 %v982_v46, %v3483_v15  ;;  %v1264_v57 = vmax.f32 %v979_v42, 0.0 }
 0x16a   :  { %v1265_v24 = vmax.f32 %v628_v4, 0.0  ;;  %v1267_v56 = vmax.f32 %v981_v5, 0.0  ;;  %1901 = vmatmul.mubr.bf16.gmra.mrb[176].mxu1 %v3754_v0  ;;  %2190 = vmatmul.mubr.bf16.gmra.mrb[176].mxu0 %v3756_v2 }
 0x16b   :  { %v1266_v27 = vmax.f32 %v630_v17, 0.0  ;;  %v1268_v1 = vmax.f32 %v983_v22, 0.0  ;;  %1908 = vmatprep.mubr.bf16.mxu1 %v3778_v7  ;;  %2197 = vmatprep.mubr.bf16.mxu0 %v3780_v8 }
 0x16c   :  { %v3854_v60 = vpack.c.bf16 %v1265_v24, %v1261_v3  ;;  %v3856_v61 = vpack.c.bf16 %v1267_v56, %v1263_v23 }
 0x16d   :  { %v3858_v28 = vpack.c.bf16 %v1266_v27, %v1262_v47  ;;  %v3860_v29 = vpack.c.bf16 %v1268_v1, %v1264_v57  ;;  %v633_v32 = vpop.f32.mrb[72].mxu0  ;;  %v986_v33 = vpop.f32.mrb[72].mxu1 }
 0x16e   :  { %v634_v0 = vadd.f32 %v633_v32, %v3477_v12  ;;  %v987_v2 = vadd.f32 %v986_v33, %v3479_v13  ;;  %v635_v34 = vpop.f32.mrb[73].mxu0  ;;  %v988_v35 = vpop.f32.mrb[73].mxu1 }
 0x16f   :  { %v636_v7 = vadd.f32 %v635_v34, %v3481_v14  ;;  %v989_v8 = vadd.f32 %v988_v35, %v3483_v15  ;;  %v637_v9 = vpop.f32.mrb[74].mxu0  ;;  %v990_v10 = vpop.f32.mrb[74].mxu1 }
 0x170   :  { %v1269_v38 = vmax.f32 %v634_v0, 0.0  ;;  %v638_v39 = vadd.f32 %v637_v9, %v3477_v12  ;;  %v991_v48 = vadd.f32 %v990_v10, %v3479_v13  ;;  %v639_v49 = vpop.f32.mrb[75].mxu0  ;;  %v992_v20 = vpop.f32.mrb[75].mxu1  ;;  %v1271_v58 = vmax.f32 %v987_v2, 0.0 }
 0x171   :  { %v1270_v21 = vmax.f32 %v636_v7, 0.0  ;;  %v640_v52 = vadd.f32 %v639_v49, %v3481_v14  ;;  %v993_v53 = vadd.f32 %v992_v20, %v3483_v15  ;;  %v1272_v31 = vmax.f32 %v989_v8, 0.0 }
 0x172   :  { %v1273_v59 = vmax.f32 %v638_v39, 0.0  ;;  %v1275_v30 = vmax.f32 %v991_v48, 0.0  ;;  %1909 = vmatmul.mubr.bf16.gmra.mrb[180].mxu1 %v3774_v36  ;;  %2198 = vmatmul.mubr.bf16.gmra.mrb[180].mxu0 %v3776_v37 }
 0x173   :  { %v1274_v62 = vmax.f32 %v640_v52, 0.0  ;;  %v1276_v63 = vmax.f32 %v993_v53, 0.0  ;;  %1916 = vmatprep.mubr.bf16.mxu1 %v3798_v40  ;;  %2205 = vmatprep.mubr.bf16.mxu0 %v3800_v45 }
 0x174   :  { %v3874_v41 = vpack.c.bf16 %v1273_v59, %v1269_v38  ;;  %v3876_v42 = vpack.c.bf16 %v1275_v30, %v1271_v58 }
 0x175   :  { %v3878_v43 = vpack.c.bf16 %v1274_v62, %v1270_v21  ;;  %v3880_v44 = vpack.c.bf16 %v1276_v63, %v1272_v31  ;;  %v643_v3 = vpop.f32.mrb[76].mxu0  ;;  %v996_v4 = vpop.f32.mrb[76].mxu1 }
 0x176   :  { %v644_v36 = vadd.f32 %v643_v3, %v3477_v12  ;;  %v997_v37 = vadd.f32 %v996_v4, %v3479_v13  ;;  %v645_v5 = vpop.f32.mrb[77].mxu0  ;;  %v998_v6 = vpop.f32.mrb[77].mxu1 }
 0x177   :  { %v646_v40 = vadd.f32 %v645_v5, %v3481_v14  ;;  %v999_v45 = vadd.f32 %v998_v6, %v3483_v15  ;;  %v647_v46 = vpop.f32.mrb[78].mxu0  ;;  %v1000_v47 = vpop.f32.mrb[78].mxu1 }
 0x178   :  { %v1277_v17 = vmax.f32 %v644_v36, 0.0  ;;  %v648_v22 = vadd.f32 %v647_v46, %v3477_v12  ;;  %v1001_v23 = vadd.f32 %v1000_v47, %v3479_v13  ;;  %v649_v24 = vpop.f32.mrb[79].mxu0  ;;  %v1002_v56 = vpop.f32.mrb[79].mxu1  ;;  %v1279_v32 = vmax.f32 %v997_v37, 0.0 }
 0x179   :  { %v1278_v57 = vmax.f32 %v646_v40, 0.0  ;;  %v650_v27 = vadd.f32 %v649_v24, %v3481_v14  ;;  %v1003_v1 = vadd.f32 %v1002_v56, %v3483_v15  ;;  %v1280_v2 = vmax.f32 %v999_v45, 0.0 }
 0x17a   :  { %v1281_v33 = vmax.f32 %v648_v22, 0.0  ;;  %v1283_v0 = vmax.f32 %v1001_v23, 0.0  ;;  %1917 = vmatmul.mubr.bf16.gmra.mrb[184].mxu1 %v3794_v11  ;;  %2206 = vmatmul.mubr.bf16.gmra.mrb[184].mxu0 %v3796_v16 }
 0x17b   :  { %v1282_v34 = vmax.f32 %v650_v27, 0.0  ;;  %v1284_v35 = vmax.f32 %v1003_v1, 0.0  ;;  %1924 = vmatprep.mubr.bf16.mxu1 %v3818_v18  ;;  %2213 = vmatprep.mubr.bf16.mxu0 %v3820_v19 }
 0x17c   :  { %v3894_v7 = vpack.c.bf16 %v1281_v33, %v1277_v17  ;;  %v3896_v8 = vpack.c.bf16 %v1283_v0, %v1279_v32 }
 0x17d   :  { %v3898_v9 = vpack.c.bf16 %v1282_v34, %v1278_v57  ;;  %v3900_v10 = vpack.c.bf16 %v1284_v35, %v1280_v2  ;;  %v653_v38 = vpop.f32.mrb[80].mxu0  ;;  %v1006_v39 = vpop.f32.mrb[80].mxu1 }
 0x17e   :  { %v654_v11 = vadd.f32 %v653_v38, %v3477_v12  ;;  %v1007_v16 = vadd.f32 %v1006_v39, %v3479_v13  ;;  %v655_v48 = vpop.f32.mrb[81].mxu0  ;;  %v1008_v49 = vpop.f32.mrb[81].mxu1 }
 0x17f   :  { %v656_v18 = vadd.f32 %v655_v48, %v3481_v14  ;;  %v1009_v19 = vadd.f32 %v1008_v49, %v3483_v15  ;;  %v657_v20 = vpop.f32.mrb[82].mxu0  ;;  %v1010_v21 = vpop.f32.mrb[82].mxu1 }
 0x180   :  { %v1285_v52 = vmax.f32 %v654_v11, 0.0  ;;  %v658_v53 = vadd.f32 %v657_v20, %v3477_v12  ;;  %v1011_v58 = vadd.f32 %v1010_v21, %v3479_v13  ;;  %v659_v59 = vpop.f32.mrb[83].mxu0  ;;  %v1012_v30 = vpop.f32.mrb[83].mxu1  ;;  %v1287_v3 = vmax.f32 %v1007_v16, 0.0 }
 0x181   :  { %v1286_v31 = vmax.f32 %v656_v18, 0.0  ;;  %v660_v62 = vadd.f32 %v659_v59, %v3481_v14  ;;  %v1013_v63 = vadd.f32 %v1012_v30, %v3483_v15  ;;  %v1288_v37 = vmax.f32 %v1009_v19, 0.0 }
 0x182   :  { %v1289_v4 = vmax.f32 %v658_v53, 0.0  ;;  %v1291_v36 = vmax.f32 %v1011_v58, 0.0  ;;  %1925 = vmatmul.mubr.bf16.gmra.mrb[188].mxu1 %v3814_v50  ;;  %2214 = vmatmul.mubr.bf16.gmra.mrb[188].mxu0 %v3816_v51 }
 0x183   :  { %v1290_v5 = vmax.f32 %v660_v62, 0.0  ;;  %v1292_v6 = vmax.f32 %v1013_v63, 0.0  ;;  %1932 = vmatprep.mubr.bf16.mxu1 %v3838_v54  ;;  %2221 = vmatprep.mubr.bf16.mxu0 %v3840_v55 }
 0x184   :  { %v3914_v40 = vpack.c.bf16 %v1289_v4, %v1285_v52  ;;  %v3916_v45 = vpack.c.bf16 %v1291_v36, %v1287_v3 }
 0x185   :  { %v3918_v46 = vpack.c.bf16 %v1290_v5, %v1286_v31  ;;  %v3920_v47 = vpack.c.bf16 %v1292_v6, %v1288_v37  ;;  %v663_v17 = vpop.f32.mrb[84].mxu0  ;;  %v1016_v22 = vpop.f32.mrb[84].mxu1 }
 0x186   :  { %v664_v50 = vadd.f32 %v663_v17, %v3477_v12  ;;  %v1017_v51 = vadd.f32 %v1016_v22, %v3479_v13  ;;  %v665_v23 = vpop.f32.mrb[85].mxu0  ;;  %v1018_v24 = vpop.f32.mrb[85].mxu1 }
 0x187   :  { %v666_v54 = vadd.f32 %v665_v23, %v3481_v14  ;;  %v1019_v55 = vadd.f32 %v1018_v24, %v3483_v15  ;;  %v667_v56 = vpop.f32.mrb[86].mxu0  ;;  %v1020_v57 = vpop.f32.mrb[86].mxu1 }
 0x188   :  { %v1293_v27 = vmax.f32 %v664_v50, 0.0  ;;  %v668_v1 = vadd.f32 %v667_v56, %v3477_v12  ;;  %v1021_v32 = vadd.f32 %v1020_v57, %v3479_v13  ;;  %v669_v33 = vpop.f32.mrb[87].mxu0  ;;  %v1022_v0 = vpop.f32.mrb[87].mxu1  ;;  %v1295_v38 = vmax.f32 %v1017_v51, 0.0 }
 0x189   :  { %v1294_v2 = vmax.f32 %v666_v54, 0.0  ;;  %v670_v34 = vadd.f32 %v669_v33, %v3481_v14  ;;  %v1023_v35 = vadd.f32 %v1022_v0, %v3483_v15  ;;  %v1296_v16 = vmax.f32 %v1019_v55, 0.0 }
 0x18a   :  { %v1297_v39 = vmax.f32 %v668_v1, 0.0  ;;  %v1299_v11 = vmax.f32 %v1021_v32, 0.0  ;;  %1933 = vmatmul.mubr.bf16.gmra.mrb[192].mxu1 %v3834_v25  ;;  %2222 = vmatmul.mubr.bf16.gmra.mrb[192].mxu0 %v3836_v26 }
 0x18b   :  { %v1298_v48 = vmax.f32 %v670_v34, 0.0  ;;  %v1300_v49 = vmax.f32 %v1023_v35, 0.0  ;;  %1940 = vmatprep.mubr.bf16.mxu1 %v3858_v28  ;;  %2229 = vmatprep.mubr.bf16.mxu0 %v3860_v29 }
 0x18c   :  { %v3934_v18 = vpack.c.bf16 %v1297_v39, %v1293_v27  ;;  %v3936_v19 = vpack.c.bf16 %v1299_v11, %v1295_v38 }
 0x18d   :  { %v3938_v20 = vpack.c.bf16 %v1298_v48, %v1294_v2  ;;  %v3940_v21 = vpack.c.bf16 %v1300_v49, %v1296_v16  ;;  %v673_v52 = vpop.f32.mrb[88].mxu0  ;;  %v1026_v53 = vpop.f32.mrb[88].mxu1 }
 0x18e   :  { %v674_v25 = vadd.f32 %v673_v52, %v3477_v12  ;;  %v1027_v26 = vadd.f32 %v1026_v53, %v3479_v13  ;;  %v675_v58 = vpop.f32.mrb[89].mxu0  ;;  %v1028_v59 = vpop.f32.mrb[89].mxu1 }
 0x18f   :  { %v676_v28 = vadd.f32 %v675_v58, %v3481_v14  ;;  %v1029_v29 = vadd.f32 %v1028_v59, %v3483_v15  ;;  %v677_v30 = vpop.f32.mrb[90].mxu0  ;;  %v1030_v31 = vpop.f32.mrb[90].mxu1 }
 0x190   :  { %v1301_v62 = vmax.f32 %v674_v25, 0.0  ;;  %v678_v63 = vadd.f32 %v677_v30, %v3477_v12  ;;  %v1031_v3 = vadd.f32 %v1030_v31, %v3479_v13  ;;  %v679_v4 = vpop.f32.mrb[91].mxu0  ;;  %v1032_v36 = vpop.f32.mrb[91].mxu1  ;;  %v1303_v17 = vmax.f32 %v1027_v26, 0.0 }
 0x191   :  { %v1302_v37 = vmax.f32 %v676_v28, 0.0  ;;  %v680_v5 = vadd.f32 %v679_v4, %v3481_v14  ;;  %v1033_v6 = vadd.f32 %v1032_v36, %v3483_v15  ;;  %v1304_v51 = vmax.f32 %v1029_v29, 0.0 }
 0x192   :  { %v1305_v22 = vmax.f32 %v678_v63, 0.0  ;;  %v1307_v50 = vmax.f32 %v1031_v3, 0.0  ;;  %1941 = vmatmul.mubr.bf16.gmra.mrb[196].mxu1 %v3854_v60  ;;  %2230 = vmatmul.mubr.bf16.gmra.mrb[196].mxu0 %v3856_v61 }
 0x193   :  { %v1306_v23 = vmax.f32 %v680_v5, 0.0  ;;  %v1308_v24 = vmax.f32 %v1033_v6, 0.0  ;;  %1948 = vmatprep.mubr.bf16.mxu1 %v3878_v43  ;;  %2237 = vmatprep.mubr.bf16.mxu0 %v3880_v44 }
 0x194   :  { %v3954_v54 = vpack.c.bf16 %v1305_v22, %v1301_v62  ;;  %v3956_v55 = vpack.c.bf16 %v1307_v50, %v1303_v17 }
 0x195   :  { %v3958_v56 = vpack.c.bf16 %v1306_v23, %v1302_v37  ;;  %v3960_v57 = vpack.c.bf16 %v1308_v24, %v1304_v51  ;;  %v683_v27 = vpop.f32.mrb[92].mxu0  ;;  %v1036_v1 = vpop.f32.mrb[92].mxu1 }
 0x196   :  { %v684_v60 = vadd.f32 %v683_v27, %v3477_v12  ;;  %v1037_v61 = vadd.f32 %v1036_v1, %v3479_v13  ;;  %v685_v32 = vpop.f32.mrb[93].mxu0  ;;  %v1038_v33 = vpop.f32.mrb[93].mxu1 }
 0x197   :  { %v686_v43 = vadd.f32 %v685_v32, %v3481_v14  ;;  %v1039_v44 = vadd.f32 %v1038_v33, %v3483_v15  ;;  %v687_v0 = vpop.f32.mrb[94].mxu0  ;;  %v1040_v2 = vpop.f32.mrb[94].mxu1 }
 0x198   :  { %v1309_v34 = vmax.f32 %v684_v60, 0.0  ;;  %v688_v35 = vadd.f32 %v687_v0, %v3477_v12  ;;  %v1041_v38 = vadd.f32 %v1040_v2, %v3479_v13  ;;  %v689_v39 = vpop.f32.mrb[95].mxu0  ;;  %v1042_v11 = vpop.f32.mrb[95].mxu1  ;;  %v1311_v52 = vmax.f32 %v1037_v61, 0.0 }
 0x199   :  { %v1310_v16 = vmax.f32 %v686_v43, 0.0  ;;  %v690_v48 = vadd.f32 %v689_v39, %v3481_v14  ;;  %v1043_v49 = vadd.f32 %v1042_v11, %v3483_v15  ;;  %v1312_v26 = vmax.f32 %v1039_v44, 0.0 }
 0x19a   :  { %v1313_v53 = vmax.f32 %v688_v35, 0.0  ;;  %v1315_v25 = vmax.f32 %v1041_v38, 0.0  ;;  %1949 = vmatmul.mubr.bf16.gmra.mrb[200].mxu1 %v3874_v41  ;;  %2238 = vmatmul.mubr.bf16.gmra.mrb[200].mxu0 %v3876_v42 }
 0x19b   :  { %v1314_v58 = vmax.f32 %v690_v48, 0.0  ;;  %v1316_v59 = vmax.f32 %v1043_v49, 0.0  ;;  %1956 = vmatprep.mubr.bf16.mxu1 %v3898_v9  ;;  %2245 = vmatprep.mubr.bf16.mxu0 %v3900_v10 }
 0x19c   :  { %v3974_v28 = vpack.c.bf16 %v1313_v53, %v1309_v34  ;;  %v3976_v29 = vpack.c.bf16 %v1315_v25, %v1311_v52 }
 0x19d   :  { %v3978_v30 = vpack.c.bf16 %v1314_v58, %v1310_v16  ;;  %v3980_v31 = vpack.c.bf16 %v1316_v59, %v1312_v26  ;;  %v693_v62 = vpop.f32.mrb[96].mxu0  ;;  %v1046_v63 = vpop.f32.mrb[96].mxu1 }
 0x19e   :  { %v694_v41 = vadd.f32 %v693_v62, %v3477_v12  ;;  %v1047_v42 = vadd.f32 %v1046_v63, %v3479_v13  ;;  %v695_v3 = vpop.f32.mrb[97].mxu0  ;;  %v1048_v4 = vpop.f32.mrb[97].mxu1 }
 0x19f   :  { %v696_v9 = vadd.f32 %v695_v3, %v3481_v14  ;;  %v1049_v10 = vadd.f32 %v1048_v4, %v3483_v15  ;;  %v697_v36 = vpop.f32.mrb[98].mxu0  ;;  %v1050_v37 = vpop.f32.mrb[98].mxu1 }
 0x1a0   :  { %v1317_v5 = vmax.f32 %v694_v41, 0.0  ;;  %v698_v6 = vadd.f32 %v697_v36, %v3477_v12  ;;  %v1051_v17 = vadd.f32 %v1050_v37, %v3479_v13  ;;  %v699_v22 = vpop.f32.mrb[99].mxu0  ;;  %v1052_v50 = vpop.f32.mrb[99].mxu1  ;;  %v1319_v27 = vmax.f32 %v1047_v42, 0.0 }
 0x1a1   :  { %v1318_v51 = vmax.f32 %v696_v9, 0.0  ;;  %v700_v23 = vadd.f32 %v699_v22, %v3481_v14  ;;  %v1053_v24 = vadd.f32 %v1052_v50, %v3483_v15  ;;  %v1320_v61 = vmax.f32 %v1049_v10, 0.0 }
 0x1a2   :  { %v1321_v1 = vmax.f32 %v698_v6, 0.0  ;;  %v1323_v60 = vmax.f32 %v1051_v17, 0.0  ;;  %1957 = vmatmul.mubr.bf16.gmra.mrb[204].mxu1 %v3894_v7  ;;  %2246 = vmatmul.mubr.bf16.gmra.mrb[204].mxu0 %v3896_v8 }
 0x1a3   :  { %v1322_v32 = vmax.f32 %v700_v23, 0.0  ;;  %v1324_v33 = vmax.f32 %v1053_v24, 0.0  ;;  %1964 = vmatprep.mubr.bf16.mxu1 %v3918_v46  ;;  %2253 = vmatprep.mubr.bf16.mxu0 %v3920_v47 }
 0x1a4   :  { %v3994_v43 = vpack.c.bf16 %v1321_v1, %v1317_v5  ;;  %v3996_v44 = vpack.c.bf16 %v1323_v60, %v1319_v27 }
 0x1a5   :  { %v3998_v0 = vpack.c.bf16 %v1322_v32, %v1318_v51  ;;  %v4000_v2 = vpack.c.bf16 %v1324_v33, %v1320_v61  ;;  %v703_v34 = vpop.f32.mrb[100].mxu0  ;;  %v1056_v35 = vpop.f32.mrb[100].mxu1 }
 0x1a6   :  { %v704_v7 = vadd.f32 %v703_v34, %v3477_v12  ;;  %v1057_v8 = vadd.f32 %v1056_v35, %v3479_v13  ;;  %v705_v38 = vpop.f32.mrb[101].mxu0  ;;  %v1058_v39 = vpop.f32.mrb[101].mxu1 }
 0x1a7   :  { %v706_v46 = vadd.f32 %v705_v38, %v3481_v14  ;;  %v1059_v47 = vadd.f32 %v1058_v39, %v3483_v15  ;;  %v707_v11 = vpop.f32.mrb[102].mxu0  ;;  %v1060_v16 = vpop.f32.mrb[102].mxu1 }
 0x1a8   :  { %v1325_v48 = vmax.f32 %v704_v7, 0.0  ;;  %v708_v49 = vadd.f32 %v707_v11, %v3477_v12  ;;  %v1061_v52 = vadd.f32 %v1060_v16, %v3479_v13  ;;  %v709_v53 = vpop.f32.mrb[103].mxu0  ;;  %v1062_v25 = vpop.f32.mrb[103].mxu1  ;;  %v1327_v62 = vmax.f32 %v1057_v8, 0.0 }
 0x1a9   :  { %v1326_v26 = vmax.f32 %v706_v46, 0.0  ;;  %v710_v58 = vadd.f32 %v709_v53, %v3481_v14  ;;  %v1063_v59 = vadd.f32 %v1062_v25, %v3483_v15  ;;  %v1328_v42 = vmax.f32 %v1059_v47, 0.0 }
 0x1aa   :  { %v1329_v63 = vmax.f32 %v708_v49, 0.0  ;;  %v1331_v41 = vmax.f32 %v1061_v52, 0.0  ;;  %1965 = vmatmul.mubr.bf16.gmra.mrb[208].mxu1 %v3914_v40  ;;  %2254 = vmatmul.mubr.bf16.gmra.mrb[208].mxu0 %v3916_v45 }
 0x1ab   :  { %v1330_v3 = vmax.f32 %v710_v58, 0.0  ;;  %v1332_v4 = vmax.f32 %v1063_v59, 0.0  ;;  %1972 = vmatprep.mubr.bf16.mxu1 %v3938_v20  ;;  %2261 = vmatprep.mubr.bf16.mxu0 %v3940_v21 }
 0x1ac   :  { %v4014_v9 = vpack.c.bf16 %v1329_v63, %v1325_v48  ;;  %v4016_v10 = vpack.c.bf16 %v1331_v41, %v1327_v62 }
 0x1ad   :  { %v4018_v36 = vpack.c.bf16 %v1330_v3, %v1326_v26  ;;  %v4020_v37 = vpack.c.bf16 %v1332_v4, %v1328_v42  ;;  %v713_v5 = vpop.f32.mrb[104].mxu0  ;;  %v1066_v6 = vpop.f32.mrb[104].mxu1 }
 0x1ae   :  { %v714_v40 = vadd.f32 %v713_v5, %v3477_v12  ;;  %v1067_v45 = vadd.f32 %v1066_v6, %v3479_v13  ;;  %v715_v17 = vpop.f32.mrb[105].mxu0  ;;  %v1068_v22 = vpop.f32.mrb[105].mxu1 }
 0x1af   :  { %v716_v20 = vadd.f32 %v715_v17, %v3481_v14  ;;  %v1069_v21 = vadd.f32 %v1068_v22, %v3483_v15  ;;  %v717_v50 = vpop.f32.mrb[106].mxu0  ;;  %v1070_v51 = vpop.f32.mrb[106].mxu1 }
 0x1b0   :  { %v1333_v23 = vmax.f32 %v714_v40, 0.0  ;;  %v718_v24 = vadd.f32 %v717_v50, %v3477_v12  ;;  %v1071_v27 = vadd.f32 %v1070_v51, %v3479_v13  ;;  %v719_v1 = vpop.f32.mrb[107].mxu0  ;;  %v1072_v60 = vpop.f32.mrb[107].mxu1  ;;  %v1335_v34 = vmax.f32 %v1067_v45, 0.0 }
 0x1b1   :  { %v1334_v61 = vmax.f32 %v716_v20, 0.0  ;;  %v720_v32 = vadd.f32 %v719_v1, %v3481_v14  ;;  %v1073_v33 = vadd.f32 %v1072_v60, %v3483_v15  ;;  %v1336_v8 = vmax.f32 %v1069_v21, 0.0 }
 0x1b2   :  { %v1337_v35 = vmax.f32 %v718_v24, 0.0  ;;  %v1339_v7 = vmax.f32 %v1071_v27, 0.0  ;;  %1973 = vmatmul.mubr.bf16.gmra.mrb[212].mxu1 %v3934_v18  ;;  %2262 = vmatmul.mubr.bf16.gmra.mrb[212].mxu0 %v3936_v19 }
 0x1b3   :  { %v1338_v38 = vmax.f32 %v720_v32, 0.0  ;;  %v1340_v39 = vmax.f32 %v1073_v33, 0.0  ;;  %1980 = vmatprep.mubr.bf16.mxu1 %v3958_v56  ;;  %2269 = vmatprep.mubr.bf16.mxu0 %v3960_v57 }
 0x1b4   :  { %v4034_v46 = vpack.c.bf16 %v1337_v35, %v1333_v23  ;;  %v4036_v47 = vpack.c.bf16 %v1339_v7, %v1335_v34 }
 0x1b5   :  { %v4038_v11 = vpack.c.bf16 %v1338_v38, %v1334_v61  ;;  %v4040_v16 = vpack.c.bf16 %v1340_v39, %v1336_v8  ;;  %v723_v48 = vpop.f32.mrb[108].mxu0  ;;  %v1076_v49 = vpop.f32.mrb[108].mxu1 }
 0x1b6   :  { %v724_v18 = vadd.f32 %v723_v48, %v3477_v12  ;;  %v1077_v19 = vadd.f32 %v1076_v49, %v3479_v13  ;;  %v725_v52 = vpop.f32.mrb[109].mxu0  ;;  %v1078_v53 = vpop.f32.mrb[109].mxu1 }
 0x1b7   :  { %v726_v56 = vadd.f32 %v725_v52, %v3481_v14  ;;  %v1079_v57 = vadd.f32 %v1078_v53, %v3483_v15  ;;  %v727_v25 = vpop.f32.mrb[110].mxu0  ;;  %v1080_v26 = vpop.f32.mrb[110].mxu1 }
 0x1b8   :  { %v1341_v58 = vmax.f32 %v724_v18, 0.0  ;;  %v728_v59 = vadd.f32 %v727_v25, %v3477_v12  ;;  %v1081_v62 = vadd.f32 %v1080_v26, %v3479_v13  ;;  %v729_v63 = vpop.f32.mrb[111].mxu0  ;;  %v1082_v41 = vpop.f32.mrb[111].mxu1  ;;  %v1343_v5 = vmax.f32 %v1077_v19, 0.0 }
 0x1b9   :  { %v1342_v42 = vmax.f32 %v726_v56, 0.0  ;;  %v730_v3 = vadd.f32 %v729_v63, %v3481_v14  ;;  %v1083_v4 = vadd.f32 %v1082_v41, %v3483_v15  ;;  %v1344_v45 = vmax.f32 %v1079_v57, 0.0 }
 0x1ba   :  { %v1345_v6 = vmax.f32 %v728_v59, 0.0  ;;  %v1347_v40 = vmax.f32 %v1081_v62, 0.0  ;;  %1981 = vmatmul.mubr.bf16.gmra.mrb[216].mxu1 %v3954_v54  ;;  %2270 = vmatmul.mubr.bf16.gmra.mrb[216].mxu0 %v3956_v55 }
 0x1bb   :  { %v1346_v17 = vmax.f32 %v730_v3, 0.0  ;;  %v1348_v22 = vmax.f32 %v1083_v4, 0.0  ;;  %1988 = vmatprep.mubr.bf16.mxu1 %v3978_v30  ;;  %2277 = vmatprep.mubr.bf16.mxu0 %v3980_v31 }
 0x1bc   :  { %v4054_v20 = vpack.c.bf16 %v1345_v6, %v1341_v58  ;;  %v4056_v21 = vpack.c.bf16 %v1347_v40, %v1343_v5 }
 0x1bd   :  { %v4058_v50 = vpack.c.bf16 %v1346_v17, %v1342_v42  ;;  %v4060_v51 = vpack.c.bf16 %v1348_v22, %v1344_v45  ;;  %v733_v23 = vpop.f32.mrb[112].mxu0  ;;  %v1086_v24 = vpop.f32.mrb[112].mxu1 }
 0x1be   :  { %v734_v54 = vadd.f32 %v733_v23, %v3477_v12  ;;  %v1087_v55 = vadd.f32 %v1086_v24, %v3479_v13  ;;  %v735_v27 = vpop.f32.mrb[113].mxu0  ;;  %v1088_v1 = vpop.f32.mrb[113].mxu1 }
 0x1bf   :  { %v736_v30 = vadd.f32 %v735_v27, %v3481_v14  ;;  %v1089_v31 = vadd.f32 %v1088_v1, %v3483_v15  ;;  %v737_v60 = vpop.f32.mrb[114].mxu0  ;;  %v1090_v61 = vpop.f32.mrb[114].mxu1 }
 0x1c0   :  { %v1349_v32 = vmax.f32 %v734_v54, 0.0  ;;  %v738_v33 = vadd.f32 %v737_v60, %v3477_v12  ;;  %v1091_v34 = vadd.f32 %v1090_v61, %v3479_v13  ;;  %v739_v35 = vpop.f32.mrb[115].mxu0  ;;  %v1092_v7 = vpop.f32.mrb[115].mxu1  ;;  %v1351_v48 = vmax.f32 %v1087_v55, 0.0 }
 0x1c1   :  { %v1350_v8 = vmax.f32 %v736_v30, 0.0  ;;  %v740_v38 = vadd.f32 %v739_v35, %v3481_v14  ;;  %v1093_v39 = vadd.f32 %v1092_v7, %v3483_v15  ;;  %v1352_v19 = vmax.f32 %v1089_v31, 0.0 }
 0x1c2   :  { %v1353_v49 = vmax.f32 %v738_v33, 0.0  ;;  %v1355_v18 = vmax.f32 %v1091_v34, 0.0  ;;  %1989 = vmatmul.mubr.bf16.gmra.mrb[220].mxu1 %v3974_v28  ;;  %2278 = vmatmul.mubr.bf16.gmra.mrb[220].mxu0 %v3976_v29 }
 0x1c3   :  { %v1354_v52 = vmax.f32 %v740_v38, 0.0  ;;  %v1356_v53 = vmax.f32 %v1093_v39, 0.0  ;;  %1996 = vmatprep.mubr.bf16.mxu1 %v3998_v0  ;;  %2285 = vmatprep.mubr.bf16.mxu0 %v4000_v2 }
 0x1c4   :  { %v4074_v56 = vpack.c.bf16 %v1353_v49, %v1349_v32  ;;  %v4076_v57 = vpack.c.bf16 %v1355_v18, %v1351_v48 }
 0x1c5   :  { %v4078_v25 = vpack.c.bf16 %v1354_v52, %v1350_v8  ;;  %v4080_v26 = vpack.c.bf16 %v1356_v53, %v1352_v19  ;;  %v743_v58 = vpop.f32.mrb[116].mxu0  ;;  %v1096_v59 = vpop.f32.mrb[116].mxu1 }
 0x1c6   :  { %v744_v28 = vadd.f32 %v743_v58, %v3477_v12  ;;  %v1097_v29 = vadd.f32 %v1096_v59, %v3479_v13  ;;  %v745_v62 = vpop.f32.mrb[117].mxu0  ;;  %v1098_v63 = vpop.f32.mrb[117].mxu1 }
 0x1c7   :  { %v746_v0 = vadd.f32 %v745_v62, %v3481_v14  ;;  %v1099_v2 = vadd.f32 %v1098_v63, %v3483_v15  ;;  %v747_v41 = vpop.f32.mrb[118].mxu0  ;;  %v1100_v42 = vpop.f32.mrb[118].mxu1 }
 0x1c8   :  { %v1357_v3 = vmax.f32 %v744_v28, 0.0  ;;  %v748_v4 = vadd.f32 %v747_v41, %v3477_v12  ;;  %v1101_v5 = vadd.f32 %v1100_v42, %v3479_v13  ;;  %v749_v6 = vpop.f32.mrb[119].mxu0  ;;  %v1102_v40 = vpop.f32.mrb[119].mxu1  ;;  %v1359_v23 = vmax.f32 %v1097_v29, 0.0 }
 0x1c9   :  { %v1358_v45 = vmax.f32 %v746_v0, 0.0  ;;  %v750_v17 = vadd.f32 %v749_v6, %v3481_v14  ;;  %v1103_v22 = vadd.f32 %v1102_v40, %v3483_v15  ;;  %v1360_v55 = vmax.f32 %v1099_v2, 0.0 }
 0x1ca   :  { %v1361_v24 = vmax.f32 %v748_v4, 0.0  ;;  %v1363_v54 = vmax.f32 %v1101_v5, 0.0  ;;  %1997 = vmatmul.mubr.bf16.gmra.mrb[224].mxu1 %v3994_v43  ;;  %2286 = vmatmul.mubr.bf16.gmra.mrb[224].mxu0 %v3996_v44 }
 0x1cb   :  { %v1362_v27 = vmax.f32 %v750_v17, 0.0  ;;  %v1364_v1 = vmax.f32 %v1103_v22, 0.0  ;;  %2004 = vmatprep.mubr.bf16.mxu1 %v4018_v36  ;;  %2293 = vmatprep.mubr.bf16.mxu0 %v4020_v37 }
 0x1cc   :  { %v4094_v30 = vpack.c.bf16 %v1361_v24, %v1357_v3  ;;  %v4096_v31 = vpack.c.bf16 %v1363_v54, %v1359_v23 }
 0x1cd   :  { %v4098_v60 = vpack.c.bf16 %v1362_v27, %v1358_v45  ;;  %v4100_v61 = vpack.c.bf16 %v1364_v1, %v1360_v55  ;;  %v753_v32 = vpop.f32.mrb[120].mxu0  ;;  %v1106_v33 = vpop.f32.mrb[120].mxu1 }
 0x1ce   :  { %v754_v43 = vadd.f32 %v753_v32, %v3477_v12  ;;  %v1107_v44 = vadd.f32 %v1106_v33, %v3479_v13  ;;  %v755_v34 = vpop.f32.mrb[121].mxu0  ;;  %v1108_v35 = vpop.f32.mrb[121].mxu1 }
 0x1cf   :  { %v756_v36 = vadd.f32 %v755_v34, %v3481_v14  ;;  %v1109_v37 = vadd.f32 %v1108_v35, %v3483_v15  ;;  %v757_v7 = vpop.f32.mrb[122].mxu0  ;;  %v1110_v8 = vpop.f32.mrb[122].mxu1 }
 0x1d0   :  { %v1365_v38 = vmax.f32 %v754_v43, 0.0  ;;  %v758_v39 = vadd.f32 %v757_v7, %v3477_v12  ;;  %v1111_v48 = vadd.f32 %v1110_v8, %v3479_v13  ;;  %v759_v49 = vpop.f32.mrb[123].mxu0  ;;  %v1112_v18 = vpop.f32.mrb[123].mxu1  ;;  %v1367_v58 = vmax.f32 %v1107_v44, 0.0 }
 0x1d1   :  { %v1366_v19 = vmax.f32 %v756_v36, 0.0  ;;  %v760_v52 = vadd.f32 %v759_v49, %v3481_v14  ;;  %v1113_v53 = vadd.f32 %v1112_v18, %v3483_v15  ;;  %v1368_v29 = vmax.f32 %v1109_v37, 0.0  ;;  %v4152_v18 = vld [vmem:[%s4574_s5] ss:$0 sm:$0xff] }
 0x1d2   :  { %v1369_v59 = vmax.f32 %v758_v39, 0.0  ;;  %v1371_v28 = vmax.f32 %v1111_v48, 0.0  ;;  %2005 = vmatmul.mubr.bf16.gmra.mrb[228].mxu1 %v4014_v9  ;;  %2294 = vmatmul.mubr.bf16.gmra.mrb[228].mxu0 %v4016_v10 }
 0x1d3   :  { %v1370_v62 = vmax.f32 %v760_v52, 0.0  ;;  %v1372_v63 = vmax.f32 %v1113_v53, 0.0  ;;  %2012 = vmatprep.mubr.bf16.mxu1 %v4038_v11  ;;  %2301 = vmatprep.mubr.bf16.mxu0 %v4040_v16 }
 0x1d4   :  { %v4114_v0 = vpack.c.bf16 %v1369_v59, %v1365_v38  ;;  %v4116_v2 = vpack.c.bf16 %v1371_v28, %v1367_v58 }
 0x1d5   :  { %v4118_v41 = vpack.c.bf16 %v1370_v62, %v1366_v19  ;;  %v4120_v42 = vpack.c.bf16 %v1372_v63, %v1368_v29  ;;  %v763_v3 = vpop.f32.mrb[124].mxu0  ;;  %v1116_v4 = vpop.f32.mrb[124].mxu1 }
 0x1d6   :  { %v764_v9 = vadd.f32 %v763_v3, %v3477_v12  ;;  %v1117_v10 = vadd.f32 %v1116_v4, %v3479_v13  ;;  %v765_v5 = vpop.f32.mrb[125].mxu0  ;;  %v1118_v6 = vpop.f32.mrb[125].mxu1 }
 0x1d7   :  { %v766_v11 = vadd.f32 %v765_v5, %v3481_v14  ;;  %v1119_v16 = vadd.f32 %v1118_v6, %v3483_v15  ;;  %v767_v40 = vpop.f32.mrb[126].mxu0  ;;  %v1120_v45 = vpop.f32.mrb[126].mxu1 }
 0x1d8   :  { %v1373_v17 = vmax.f32 %v764_v9, 0.0  ;;  %v768_v22 = vadd.f32 %v767_v40, %v3477_v12  ;;  %v1121_v23 = vadd.f32 %v1120_v45, %v3479_v13  ;;  %v769_v24 = vpop.f32.mrb[127].mxu0  ;;  %v1122_v54 = vpop.f32.mrb[127].mxu1  ;;  %v1375_v32 = vmax.f32 %v1117_v10, 0.0  ;;  %v4137_v12 = vld [vmem:[%s4573_s4] ss:$0 sm:$0xff] }
 0x1d9   :  { %v1374_v55 = vmax.f32 %v766_v11, 0.0  ;;  %v770_v27 = vadd.f32 %v769_v24, %v3481_v14  ;;  %v1123_v1 = vadd.f32 %v1122_v54, %v3483_v15  ;;  %v1376_v44 = vmax.f32 %v1119_v16, 0.0 }
 0x1da   :  { %v1377_v33 = vmax.f32 %v768_v22, 0.0  ;;  %v1379_v43 = vmax.f32 %v1121_v23, 0.0  ;;  %2013 = vmatmul.mubr.bf16.gmra.mrb[232].mxu1 %v4034_v46  ;;  %2302 = vmatmul.mubr.bf16.gmra.mrb[232].mxu0 %v4036_v47 }
 0x1db   :  { %v1378_v34 = vmax.f32 %v770_v27, 0.0  ;;  %v1380_v35 = vmax.f32 %v1123_v1, 0.0  ;;  %2020 = vmatprep.mubr.bf16.mxu1 %v4058_v50  ;;  %2309 = vmatprep.mubr.bf16.mxu0 %v4060_v51 }
 0x1dc   :  { %v4139_v13 = vpack.c.bf16 %v1377_v33, %v1373_v17  ;;  %v4141_v14 = vpack.c.bf16 %v1379_v43, %v1375_v32 }
 0x1dd   :  { %v4143_v15 = vpack.c.bf16 %v1378_v34, %v1374_v55  ;;  %v4145_v46 = vpack.c.bf16 %v1380_v35, %v1376_v44  ;;  %v1806_v47 = vpop.f32.mrb[128].mxu1  ;;  %v2095_v36 = vpop.f32.mrb[128].mxu0 }
 0x1de   :  { %v1807_v37 = vadd.f32 %v4137_v12, %v1806_v47  ;;  %v1808_v50 = vpop.f32.mrb[129].mxu1  ;;  %v2097_v7 = vpop.f32.mrb[129].mxu0 }
 0x1df   :  { %v1809_v51 = vpop.f32.mrb[130].mxu1  ;;  %v2098_v8 = vpop.f32.mrb[130].mxu0 }
 0x1e0   :  { %v2096_v38 = vadd.f32 %v2095_v36, %v1807_v37  ;;  %v1810_v39 = vadd.f32 %v4137_v12, %v1809_v51  ;;  %v1811_v48 = vpop.f32.mrb[131].mxu1  ;;  %v2100_v49 = vpop.f32.mrb[131].mxu0 }
 0x1e2   :  { %v2350_v19 = vmax.f32 %v2096_v38, 0.0  ;;  %v2099_v52 = vadd.f32 %v2098_v8, %v1810_v39  ;;  %2021 = vmatmul.mubr.bf16.gmra.mrb[236].mxu1 %v4054_v20  ;;  %2310 = vmatmul.mubr.bf16.gmra.mrb[236].mxu0 %v4056_v21 }
 0x1e3   :  { %2028 = vmatprep.mubr.bf16.mxu1 %v4078_v25  ;;  %2317 = vmatprep.mubr.bf16.mxu0 %v4080_v26 }
 0x1e4   :  { %v2421_v53 = vmul.f32 %v4152_v18, %v2350_v19  ;;  %v2351_v58 = vmax.f32 %v2099_v52, 0.0 }
 0x1e5   :  { %v1814_v59 = vpop.f32.mrb[132].mxu1  ;;  %v2103_v28 = vpop.f32.mrb[132].mxu0 }
 0x1e6   :  { %v1815_v29 = vadd.f32 %v4137_v12, %v1814_v59  ;;  %v1816_v62 = vpop.f32.mrb[133].mxu1  ;;  %v2105_v63 = vpop.f32.mrb[133].mxu0  ;;  %2485 = vadd.xlane.f32.xlu0 %v2421_v53  ;;  %v2422_v25 = vmul.f32 %v4152_v18, %v2351_v58 }
 0x1e7   :  { %v1817_v3 = vpop.f32.mrb[134].mxu1  ;;  %v2106_v4 = vpop.f32.mrb[134].mxu0 }
 0x1e8   :  { %v2104_v9 = vadd.f32 %v2103_v28, %v1815_v29  ;;  %v1818_v20 = vadd.f32 %v4137_v12, %v1817_v3  ;;  %v1819_v21 = vpop.f32.mrb[135].mxu1  ;;  %v2108_v10 = vpop.f32.mrb[135].mxu0 }
 0x1ea   :  { %v2352_v26 = vmax.f32 %v2104_v9, 0.0  ;;  %v2107_v5 = vadd.f32 %v2106_v4, %v1818_v20  ;;  %2029 = vmatmul.mubr.bf16.gmra.mrb[240].mxu1 %v4074_v56  ;;  %2318 = vmatmul.mubr.bf16.gmra.mrb[240].mxu0 %v4076_v57 }
 0x1eb   :  { %2487 = vadd.xlane.f32.xlu0 %v2422_v25  ;;  %2036 = vmatprep.mubr.bf16.mxu1 %v4098_v60 }
 0x1ec   :  { %2325 = vmatprep.mubr.bf16.mxu0 %v4100_v61  ;;  %v2423_v6 = vmul.f32 %v4152_v18, %v2352_v26  ;;  %v2353_v11 = vmax.f32 %v2107_v5, 0.0 }
 0x1ed   :  { %v1822_v16 = vpop.f32.mrb[136].mxu1  ;;  %v2111_v40 = vpop.f32.mrb[136].mxu0 }
 0x1ee   :  { %v1823_v45 = vadd.f32 %v4137_v12, %v1822_v16  ;;  %v1824_v17 = vpop.f32.mrb[137].mxu1  ;;  %v2113_v22 = vpop.f32.mrb[137].mxu0  ;;  %2489 = vadd.xlane.f32.xlu1 %v2423_v6  ;;  %v2424_v60 = vmul.f32 %v4152_v18, %v2353_v11 }
 0x1ef   :  { %v1825_v23 = vpop.f32.mrb[138].mxu1  ;;  %v2114_v24 = vpop.f32.mrb[138].mxu0 }
 0x1f0   :  { %v2112_v56 = vadd.f32 %v2111_v40, %v1823_v45  ;;  %v1826_v57 = vadd.f32 %v4137_v12, %v1825_v23  ;;  %v1827_v54 = vpop.f32.mrb[139].mxu1  ;;  %v2116_v55 = vpop.f32.mrb[139].mxu0 }
 0x1f2   :  { %v2354_v61 = vmax.f32 %v2112_v56, 0.0  ;;  %v2115_v27 = vadd.f32 %v2114_v24, %v1826_v57  ;;  %2037 = vmatmul.mubr.bf16.gmra.mrb[244].mxu1 %v4094_v30  ;;  %2326 = vmatmul.mubr.bf16.gmra.mrb[244].mxu0 %v4096_v31 }
 0x1f3   :  { %2491 = vadd.xlane.f32.xlu1 %v2424_v60  ;;  %2044 = vmatprep.mubr.bf16.mxu1 %v4118_v41 }
 0x1f4   :  { %v2355_v1 = vmax.f32 %v2115_v27, 0.0  ;;  %2333 = vmatprep.mubr.bf16.mxu0 %v4120_v42  ;;  %v2425_v32 = vmul.f32 %v4152_v18, %v2354_v61 }
 0x1f5   :  { %v1830_v33 = vpop.f32.mrb[140].mxu1  ;;  %v2119_v43 = vpop.f32.mrb[140].mxu0 }
 0x1f6   :  { %v1831_v44 = vadd.f32 %v4137_v12, %v1830_v33  ;;  %v1832_v34 = vpop.f32.mrb[141].mxu1  ;;  %v2121_v35 = vpop.f32.mrb[141].mxu0  ;;  %2493 = vadd.xlane.f32.xlu0 %v2425_v32  ;;  %v2426_v47 = vmul.f32 %v4152_v18, %v2355_v1 }
 0x1f7   :  { %v1833_v30 = vpop.f32.mrb[142].mxu1  ;;  %v2122_v36 = vpop.f32.mrb[142].mxu0 }
 0x1f8   :  { %v2120_v31 = vadd.f32 %v2119_v43, %v1831_v44  ;;  %v1834_v37 = vadd.f32 %v4137_v12, %v1833_v30  ;;  %v1835_v41 = vpop.f32.mrb[143].mxu1  ;;  %v2124_v50 = vpop.f32.mrb[143].mxu0  ;;  %2495 = vadd.xlane.f32.xlu1 %v2426_v47 }
 0x1fa   :  { %v2356_v42 = vmax.f32 %v2120_v31, 0.0  ;;  %v2123_v7 = vadd.f32 %v2122_v36, %v1834_v37  ;;  %2045 = vmatmul.mubr.bf16.gmra.mrb[248].mxu1 %v4114_v0  ;;  %2334 = vmatmul.mubr.bf16.gmra.mrb[248].mxu0 %v4116_v2 }
 0x1fb   :  { %2052 = vmatprep.mubr.bf16.mxu1 %v4143_v15  ;;  %2341 = vmatprep.mubr.bf16.mxu0 %v4145_v46 }
 0x1fc   :  { %v2357_v51 = vmax.f32 %v2123_v7, 0.0  ;;  %v2427_v8 = vmul.f32 %v4152_v18, %v2356_v42 }
 0x1fd   :  { %v1838_v38 = vpop.f32.mrb[144].mxu1  ;;  %v2127_v39 = vpop.f32.mrb[144].mxu0 }
 0x1fe   :  { %v1839_v48 = vadd.f32 %v4137_v12, %v1838_v38  ;;  %v1840_v49 = vpop.f32.mrb[145].mxu1  ;;  %v2129_v19 = vpop.f32.mrb[145].mxu0  ;;  %2497 = vadd.xlane.f32.xlu0 %v2427_v8  ;;  %v2428_v52 = vmul.f32 %v4152_v18, %v2357_v51 }
 0x1ff   :  { %v1841_v53 = vpop.f32.mrb[146].mxu1  ;;  %v2130_v0 = vpop.f32.mrb[146].mxu0 }
 0x200   :  { %v2128_v58 = vadd.f32 %v2127_v39, %v1839_v48  ;;  %v1842_v2 = vadd.f32 %v4137_v12, %v1841_v53  ;;  %v1843_v15 = vpop.f32.mrb[147].mxu1  ;;  %v2132_v59 = vpop.f32.mrb[147].mxu0  ;;  %2499 = vadd.xlane.f32.xlu1 %v2428_v52 }
 0x202   :  { %v2358_v46 = vmax.f32 %v2128_v58, 0.0  ;;  %v2131_v28 = vadd.f32 %v2130_v0, %v1842_v2  ;;  %2053 = vmatmul.mubr.bf16.gmra.mrb[252].mxu1 %v4139_v13  ;;  %2342 = vmatmul.mubr.bf16.gmra.mrb[252].mxu0 %v4141_v14 }
 0x204   :  { %v2359_v29 = vmax.f32 %v2131_v28, 0.0  ;;  %v2429_v62 = vmul.f32 %v4152_v18, %v2358_v46 }
 0x205   :  { %v1846_v63 = vpop.f32.mrb[148].mxu1  ;;  %v2135_v3 = vpop.f32.mrb[148].mxu0 }
 0x206   :  { %v1847_v4 = vadd.f32 %v4137_v12, %v1846_v63  ;;  %v1848_v9 = vpop.f32.mrb[149].mxu1  ;;  %v2137_v20 = vpop.f32.mrb[149].mxu0  ;;  %2501 = vadd.xlane.f32.xlu0 %v2429_v62  ;;  %v2430_v21 = vmul.f32 %v4152_v18, %v2359_v29 }
 0x207   :  { %v1849_v10 = vpop.f32.mrb[150].mxu1  ;;  %v2138_v25 = vpop.f32.mrb[150].mxu0 }
 0x208   :  { %v2136_v26 = vadd.f32 %v2135_v3, %v1847_v4  ;;  %v1850_v5 = vadd.f32 %v4137_v12, %v1849_v10  ;;  %v1851_v13 = vpop.f32.mrb[151].mxu1  ;;  %v2140_v6 = vpop.f32.mrb[151].mxu0  ;;  %2503 = vadd.xlane.f32.xlu1 %v2430_v21 }
 0x20a   :  { %v2360_v14 = vmax.f32 %v2136_v26, 0.0  ;;  %v2139_v11 = vadd.f32 %v2138_v25, %v1850_v5 }
 0x20c   :  { %v2361_v16 = vmax.f32 %v2139_v11, 0.0  ;;  %v2431_v40 = vmul.f32 %v4152_v18, %v2360_v14 }
 0x20d   :  { %v1854_v45 = vpop.f32.mrb[152].mxu1  ;;  %v2143_v17 = vpop.f32.mrb[152].mxu0 }
 0x20e   :  { %v1855_v22 = vadd.f32 %v4137_v12, %v1854_v45  ;;  %v1856_v23 = vpop.f32.mrb[153].mxu1  ;;  %v2145_v24 = vpop.f32.mrb[153].mxu0  ;;  %2505 = vadd.xlane.f32.xlu0 %v2431_v40  ;;  %v2432_v56 = vmul.f32 %v4152_v18, %v2361_v16 }
 0x20f   :  { %v1857_v57 = vpop.f32.mrb[154].mxu1  ;;  %v2146_v54 = vpop.f32.mrb[154].mxu0 }
 0x210   :  { %v2144_v55 = vadd.f32 %v2143_v17, %v1855_v22  ;;  %v1858_v60 = vadd.f32 %v4137_v12, %v1857_v57  ;;  %v1859_v61 = vpop.f32.mrb[155].mxu1  ;;  %v2148_v27 = vpop.f32.mrb[155].mxu0  ;;  %2507 = vadd.xlane.f32.xlu1 %v2432_v56 }
 0x212   :  { %v2362_v1 = vmax.f32 %v2144_v55, 0.0  ;;  %v2147_v32 = vadd.f32 %v2146_v54, %v1858_v60 }
 0x214   :  { %v2363_v33 = vmax.f32 %v2147_v32, 0.0  ;;  %v2433_v43 = vmul.f32 %v4152_v18, %v2362_v1 }
 0x215   :  { %v1862_v44 = vpop.f32.mrb[156].mxu1  ;;  %v2151_v34 = vpop.f32.mrb[156].mxu0 }
 0x216   :  { %v1863_v35 = vadd.f32 %v4137_v12, %v1862_v44  ;;  %v1864_v47 = vpop.f32.mrb[157].mxu1  ;;  %v2153_v30 = vpop.f32.mrb[157].mxu0  ;;  %2509 = vadd.xlane.f32.xlu0 %v2433_v43  ;;  %v2434_v36 = vmul.f32 %v4152_v18, %v2363_v33 }
 0x217   :  { %v1865_v31 = vpop.f32.mrb[158].mxu1  ;;  %v2154_v37 = vpop.f32.mrb[158].mxu0 }
 0x218   :  { %v2152_v41 = vadd.f32 %v2151_v34, %v1863_v35  ;;  %v1866_v50 = vadd.f32 %v4137_v12, %v1865_v31  ;;  %v1867_v42 = vpop.f32.mrb[159].mxu1  ;;  %v2156_v7 = vpop.f32.mrb[159].mxu0  ;;  %2511 = vadd.xlane.f32.xlu1 %v2434_v36 }
 0x21a   :  { %v2364_v51 = vmax.f32 %v2152_v41, 0.0  ;;  %v2155_v8 = vadd.f32 %v2154_v37, %v1866_v50 }
 0x21c   :  { %v2365_v38 = vmax.f32 %v2155_v8, 0.0  ;;  %v2435_v39 = vmul.f32 %v4152_v18, %v2364_v51 }
 0x21d   :  { %v1870_v48 = vpop.f32.mrb[160].mxu1  ;;  %v2159_v49 = vpop.f32.mrb[160].mxu0 }
 0x21e   :  { %v1871_v19 = vadd.f32 %v4137_v12, %v1870_v48  ;;  %v1872_v52 = vpop.f32.mrb[161].mxu1  ;;  %v2161_v53 = vpop.f32.mrb[161].mxu0  ;;  %2513 = vadd.xlane.f32.xlu0 %v2435_v39  ;;  %v2436_v0 = vmul.f32 %v4152_v18, %v2365_v38 }
 0x21f   :  { %v1873_v58 = vpop.f32.mrb[162].mxu1  ;;  %v2162_v2 = vpop.f32.mrb[162].mxu0 }
 0x220   :  { %v2160_v15 = vadd.f32 %v2159_v49, %v1871_v19  ;;  %v1874_v59 = vadd.f32 %v4137_v12, %v1873_v58  ;;  %v1875_v46 = vpop.f32.mrb[163].mxu1  ;;  %v2164_v28 = vpop.f32.mrb[163].mxu0  ;;  %2515 = vadd.xlane.f32.xlu1 %v2436_v0 }
 0x222   :  { %v2366_v29 = vmax.f32 %v2160_v15, 0.0  ;;  %v2163_v62 = vadd.f32 %v2162_v2, %v1874_v59 }
 0x224   :  { %v2367_v63 = vmax.f32 %v2163_v62, 0.0  ;;  %v2437_v3 = vmul.f32 %v4152_v18, %v2366_v29 }
 0x225   :  { %v1878_v4 = vpop.f32.mrb[164].mxu1  ;;  %v2167_v9 = vpop.f32.mrb[164].mxu0 }
 0x226   :  { %v1879_v20 = vadd.f32 %v4137_v12, %v1878_v4  ;;  %v1880_v21 = vpop.f32.mrb[165].mxu1  ;;  %v2169_v10 = vpop.f32.mrb[165].mxu0  ;;  %2517 = vadd.xlane.f32.xlu0 %v2437_v3  ;;  %v2438_v25 = vmul.f32 %v4152_v18, %v2367_v63 }
 0x227   :  { %v1881_v26 = vpop.f32.mrb[166].mxu1  ;;  %v2170_v5 = vpop.f32.mrb[166].mxu0 }
 0x228   :  { %v2168_v13 = vadd.f32 %v2167_v9, %v1879_v20  ;;  %v1882_v6 = vadd.f32 %v4137_v12, %v1881_v26  ;;  %v1883_v14 = vpop.f32.mrb[167].mxu1  ;;  %v2172_v11 = vpop.f32.mrb[167].mxu0  ;;  %2519 = vadd.xlane.f32.xlu1 %v2438_v25 }
 0x22a   :  { %v2368_v16 = vmax.f32 %v2168_v13, 0.0  ;;  %v2171_v40 = vadd.f32 %v2170_v5, %v1882_v6 }
 0x22c   :  { %v2369_v45 = vmax.f32 %v2171_v40, 0.0  ;;  %v2439_v17 = vmul.f32 %v4152_v18, %v2368_v16 }
 0x22d   :  { %v1886_v22 = vpop.f32.mrb[168].mxu1  ;;  %v2175_v23 = vpop.f32.mrb[168].mxu0 }
 0x22e   :  { %v1887_v24 = vadd.f32 %v4137_v12, %v1886_v22  ;;  %v1888_v56 = vpop.f32.mrb[169].mxu1  ;;  %v2177_v57 = vpop.f32.mrb[169].mxu0  ;;  %2521 = vadd.xlane.f32.xlu0 %v2439_v17  ;;  %v2440_v54 = vmul.f32 %v4152_v18, %v2369_v45 }
 0x22f   :  { %v1889_v55 = vpop.f32.mrb[170].mxu1  ;;  %v2178_v60 = vpop.f32.mrb[170].mxu0 }
 0x230   :  { %v2176_v61 = vadd.f32 %v2175_v23, %v1887_v24  ;;  %v1890_v27 = vadd.f32 %v4137_v12, %v1889_v55  ;;  %v1891_v1 = vpop.f32.mrb[171].mxu1  ;;  %v2180_v32 = vpop.f32.mrb[171].mxu0  ;;  %2523 = vadd.xlane.f32.xlu1 %v2440_v54 }
 0x232   :  { %v2370_v33 = vmax.f32 %v2176_v61, 0.0  ;;  %v2179_v43 = vadd.f32 %v2178_v60, %v1890_v27 }
 0x234   :  { %v2371_v44 = vmax.f32 %v2179_v43, 0.0  ;;  %v2441_v34 = vmul.f32 %v4152_v18, %v2370_v33 }
 0x235   :  { %v1894_v35 = vpop.f32.mrb[172].mxu1  ;;  %v2183_v47 = vpop.f32.mrb[172].mxu0 }
 0x236   :  { %v1895_v30 = vadd.f32 %v4137_v12, %v1894_v35  ;;  %v1896_v36 = vpop.f32.mrb[173].mxu1  ;;  %v2185_v31 = vpop.f32.mrb[173].mxu0  ;;  %2525 = vadd.xlane.f32.xlu0 %v2441_v34  ;;  %v2442_v37 = vmul.f32 %v4152_v18, %v2371_v44 }
 0x237   :  { %v1897_v41 = vpop.f32.mrb[174].mxu1  ;;  %v2186_v50 = vpop.f32.mrb[174].mxu0 }
 0x238   :  { %v2184_v42 = vadd.f32 %v2183_v47, %v1895_v30  ;;  %v1898_v7 = vadd.f32 %v4137_v12, %v1897_v41  ;;  %v1899_v51 = vpop.f32.mrb[175].mxu1  ;;  %v2188_v8 = vpop.f32.mrb[175].mxu0  ;;  %2527 = vadd.xlane.f32.xlu1 %v2442_v37 }
 0x23a   :  { %v2372_v38 = vmax.f32 %v2184_v42, 0.0  ;;  %v2187_v39 = vadd.f32 %v2186_v50, %v1898_v7 }
 0x23c   :  { %v2373_v48 = vmax.f32 %v2187_v39, 0.0  ;;  %v2443_v49 = vmul.f32 %v4152_v18, %v2372_v38 }
 0x23d   :  { %v1902_v19 = vpop.f32.mrb[176].mxu1  ;;  %v2191_v52 = vpop.f32.mrb[176].mxu0 }
 0x23e   :  { %v1903_v53 = vadd.f32 %v4137_v12, %v1902_v19  ;;  %v1904_v0 = vpop.f32.mrb[177].mxu1  ;;  %v2193_v58 = vpop.f32.mrb[177].mxu0  ;;  %2529 = vadd.xlane.f32.xlu0 %v2443_v49  ;;  %v2444_v2 = vmul.f32 %v4152_v18, %v2373_v48 }
 0x23f   :  { %v1905_v15 = vpop.f32.mrb[178].mxu1  ;;  %v2194_v59 = vpop.f32.mrb[178].mxu0 }
 0x240   :  { %v2192_v46 = vadd.f32 %v2191_v52, %v1903_v53  ;;  %v1906_v28 = vadd.f32 %v4137_v12, %v1905_v15  ;;  %v1907_v29 = vpop.f32.mrb[179].mxu1  ;;  %v2196_v62 = vpop.f32.mrb[179].mxu0  ;;  %2531 = vadd.xlane.f32.xlu1 %v2444_v2 }
 0x242   :  { %v2374_v63 = vmax.f32 %v2192_v46, 0.0  ;;  %v2195_v3 = vadd.f32 %v2194_v59, %v1906_v28 }
 0x244   :  { %v2375_v4 = vmax.f32 %v2195_v3, 0.0  ;;  %v2445_v9 = vmul.f32 %v4152_v18, %v2374_v63 }
 0x245   :  { %v1910_v20 = vpop.f32.mrb[180].mxu1  ;;  %v2199_v21 = vpop.f32.mrb[180].mxu0 }
 0x246   :  { %v1911_v10 = vadd.f32 %v4137_v12, %v1910_v20  ;;  %v1912_v25 = vpop.f32.mrb[181].mxu1  ;;  %v2201_v26 = vpop.f32.mrb[181].mxu0  ;;  %2533 = vadd.xlane.f32.xlu0 %v2445_v9  ;;  %v2446_v5 = vmul.f32 %v4152_v18, %v2375_v4 }
 0x247   :  { %v1913_v13 = vpop.f32.mrb[182].mxu1  ;;  %v2202_v6 = vpop.f32.mrb[182].mxu0 }
 0x248   :  { %v2200_v14 = vadd.f32 %v2199_v21, %v1911_v10  ;;  %v1914_v11 = vadd.f32 %v4137_v12, %v1913_v13  ;;  %v1915_v16 = vpop.f32.mrb[183].mxu1  ;;  %v2204_v40 = vpop.f32.mrb[183].mxu0  ;;  %2535 = vadd.xlane.f32.xlu1 %v2446_v5 }
 0x24a   :  { %v2376_v45 = vmax.f32 %v2200_v14, 0.0  ;;  %v2203_v17 = vadd.f32 %v2202_v6, %v1914_v11 }
 0x24c   :  { %v2377_v22 = vmax.f32 %v2203_v17, 0.0  ;;  %v2447_v23 = vmul.f32 %v4152_v18, %v2376_v45 }
 0x24d   :  { %v1918_v24 = vpop.f32.mrb[184].mxu1  ;;  %v2207_v56 = vpop.f32.mrb[184].mxu0 }
 0x24e   :  { %v1919_v57 = vadd.f32 %v4137_v12, %v1918_v24  ;;  %v1920_v54 = vpop.f32.mrb[185].mxu1  ;;  %v2209_v55 = vpop.f32.mrb[185].mxu0  ;;  %2537 = vadd.xlane.f32.xlu0 %v2447_v23  ;;  %v2448_v60 = vmul.f32 %v4152_v18, %v2377_v22 }
 0x24f   :  { %v1921_v61 = vpop.f32.mrb[186].mxu1  ;;  %v2210_v27 = vpop.f32.mrb[186].mxu0 }
 0x250   :  { %v2208_v1 = vadd.f32 %v2207_v56, %v1919_v57  ;;  %v1922_v32 = vadd.f32 %v4137_v12, %v1921_v61  ;;  %v1923_v33 = vpop.f32.mrb[187].mxu1  ;;  %v2212_v43 = vpop.f32.mrb[187].mxu0  ;;  %2539 = vadd.xlane.f32.xlu1 %v2448_v60 }
 0x252   :  { %v2378_v44 = vmax.f32 %v2208_v1, 0.0  ;;  %v2211_v34 = vadd.f32 %v2210_v27, %v1922_v32 }
 0x254   :  { %v2379_v35 = vmax.f32 %v2211_v34, 0.0  ;;  %v2449_v47 = vmul.f32 %v4152_v18, %v2378_v44 }
 0x255   :  { %v1926_v30 = vpop.f32.mrb[188].mxu1  ;;  %v2215_v36 = vpop.f32.mrb[188].mxu0 }
 0x256   :  { %v1927_v31 = vadd.f32 %v4137_v12, %v1926_v30  ;;  %v1928_v37 = vpop.f32.mrb[189].mxu1  ;;  %v2217_v41 = vpop.f32.mrb[189].mxu0  ;;  %2541 = vadd.xlane.f32.xlu0 %v2449_v47  ;;  %v2450_v50 = vmul.f32 %v4152_v18, %v2379_v35  ;;  %v4247_v35 = vstv %s4575_s6 }
 0x257   :  { %v1929_v42 = vpop.f32.mrb[190].mxu1  ;;  %v2218_v7 = vpop.f32.mrb[190].mxu0 }
 0x258   :  { %v2216_v51 = vadd.f32 %v2215_v36, %v1927_v31  ;;  %v1930_v8 = vadd.f32 %v4137_v12, %v1929_v42  ;;  %v1931_v38 = vpop.f32.mrb[191].mxu1  ;;  %v2220_v39 = vpop.f32.mrb[191].mxu0  ;;  %2543 = vadd.xlane.f32.xlu1 %v2450_v50 }
 0x25a   :  { %v2380_v48 = vmax.f32 %v2216_v51, 0.0  ;;  %v2219_v49 = vadd.f32 %v2218_v7, %v1930_v8 }
 0x25c   :  { %v2381_v19 = vmax.f32 %v2219_v49, 0.0  ;;  %v2451_v52 = vmul.f32 %v4152_v18, %v2380_v48 }
 0x25d   :  { %v1934_v53 = vpop.f32.mrb[192].mxu1  ;;  %v2223_v0 = vpop.f32.mrb[192].mxu0 }
 0x25e   :  { %v1935_v58 = vadd.f32 %v4137_v12, %v1934_v53  ;;  %v1936_v2 = vpop.f32.mrb[193].mxu1  ;;  %v2225_v15 = vpop.f32.mrb[193].mxu0  ;;  %2545 = vadd.xlane.f32.xlu0 %v2451_v52  ;;  %v2452_v59 = vmul.f32 %v4152_v18, %v2381_v19 }
 0x25f   :  { %v1937_v46 = vpop.f32.mrb[194].mxu1  ;;  %v2226_v28 = vpop.f32.mrb[194].mxu0 }
 0x260   :  { %v2224_v29 = vadd.f32 %v2223_v0, %v1935_v58  ;;  %v1938_v62 = vadd.f32 %v4137_v12, %v1937_v46  ;;  %v1939_v63 = vpop.f32.mrb[195].mxu1  ;;  %v2228_v3 = vpop.f32.mrb[195].mxu0  ;;  %2547 = vadd.xlane.f32.xlu1 %v2452_v59 }
 0x262   :  { %v2382_v4 = vmax.f32 %v2224_v29, 0.0  ;;  %v2227_v9 = vadd.f32 %v2226_v28, %v1938_v62 }
 0x264   :  { %v2383_v20 = vmax.f32 %v2227_v9, 0.0  ;;  %v2453_v21 = vmul.f32 %v4152_v18, %v2382_v4 }
 0x265   :  { %v1942_v10 = vpop.f32.mrb[196].mxu1  ;;  %v2231_v25 = vpop.f32.mrb[196].mxu0 }
 0x266   :  { %v1943_v26 = vadd.f32 %v4137_v12, %v1942_v10  ;;  %v1944_v5 = vpop.f32.mrb[197].mxu1  ;;  %v2233_v13 = vpop.f32.mrb[197].mxu0  ;;  %2549 = vadd.xlane.f32.xlu0 %v2453_v21  ;;  %v2454_v6 = vmul.f32 %v4152_v18, %v2383_v20 }
 0x267   :  { %v1945_v14 = vpop.f32.mrb[198].mxu1  ;;  %v2234_v11 = vpop.f32.mrb[198].mxu0 }
 0x268   :  { %v2232_v16 = vadd.f32 %v2231_v25, %v1943_v26  ;;  %v1946_v40 = vadd.f32 %v4137_v12, %v1945_v14  ;;  %v1947_v45 = vpop.f32.mrb[199].mxu1  ;;  %v2236_v17 = vpop.f32.mrb[199].mxu0  ;;  %2551 = vadd.xlane.f32.xlu1 %v2454_v6 }
 0x26a   :  { %v2384_v22 = vmax.f32 %v2232_v16, 0.0  ;;  %v2235_v23 = vadd.f32 %v2234_v11, %v1946_v40 }
 0x26c   :  { %v2385_v24 = vmax.f32 %v2235_v23, 0.0  ;;  %v2455_v56 = vmul.f32 %v4152_v18, %v2384_v22 }
 0x26d   :  { %v1950_v57 = vpop.f32.mrb[200].mxu1  ;;  %v2239_v54 = vpop.f32.mrb[200].mxu0 }
 0x26e   :  { %v1951_v55 = vadd.f32 %v4137_v12, %v1950_v57  ;;  %v1952_v60 = vpop.f32.mrb[201].mxu1  ;;  %v2241_v61 = vpop.f32.mrb[201].mxu0  ;;  %2553 = vadd.xlane.f32.xlu0 %v2455_v56  ;;  %v2456_v27 = vmul.f32 %v4152_v18, %v2385_v24 }
 0x26f   :  { %v1953_v1 = vpop.f32.mrb[202].mxu1  ;;  %v2242_v32 = vpop.f32.mrb[202].mxu0 }
 0x270   :  { %v2240_v33 = vadd.f32 %v2239_v54, %v1951_v55  ;;  %v1954_v43 = vadd.f32 %v4137_v12, %v1953_v1  ;;  %v1955_v44 = vpop.f32.mrb[203].mxu1  ;;  %v2244_v34 = vpop.f32.mrb[203].mxu0  ;;  %2555 = vadd.xlane.f32.xlu1 %v2456_v27 }
 0x272   :  { %v2386_v47 = vmax.f32 %v2240_v33, 0.0  ;;  %v2243_v30 = vadd.f32 %v2242_v32, %v1954_v43 }
 0x273   :  { %v2486_v36 = vpop.xlane.xlu0 %2485 }
 0x274   :  { %v2387_v31 = vmax.f32 %v2243_v30, 0.0  ;;  %v2615_v37 = vadd.f32 %v4247_v35, %v2486_v36  ;;  %v2457_v41 = vmul.f32 %v4152_v18, %v2386_v47 }
 0x275   :  { %v1958_v50 = vpop.f32.mrb[204].mxu1  ;;  %v2247_v42 = vpop.f32.mrb[204].mxu0 }
 0x276   :  { %2679 = vst [vmem:[%s4576_s7] sm:$0xff] %v2615_v37  ;;  %v1959_v7 = vadd.f32 %v4137_v12, %v1958_v50  ;;  %v1960_v51 = vpop.f32.mrb[205].mxu1  ;;  %v2249_v8 = vpop.f32.mrb[205].mxu0  ;;  %2557 = vadd.xlane.f32.xlu0 %v2457_v41  ;;  %v2458_v38 = vmul.f32 %v4152_v18, %v2387_v31 }
 0x277   :  { %v1961_v39 = vpop.f32.mrb[206].mxu1  ;;  %v2250_v48 = vpop.f32.mrb[206].mxu0 }
 0x278   :  { %v2248_v49 = vadd.f32 %v2247_v42, %v1959_v7  ;;  %v1962_v19 = vadd.f32 %v4137_v12, %v1961_v39  ;;  %v2488_v52 = vpop.xlane.xlu0 %2487  ;;  %v1963_v53 = vpop.f32.mrb[207].mxu1  ;;  %2559 = vadd.xlane.f32.xlu1 %v2458_v38 }
 0x279   :  { %v2616_v0 = vadd.f32 %v4247_v35, %v2488_v52  ;;  %v2252_v58 = vpop.f32.mrb[207].mxu0 }
 0x27a   :  { %v2388_v2 = vmax.f32 %v2248_v49, 0.0  ;;  %v2251_v15 = vadd.f32 %v2250_v48, %v1962_v19 }
 0x27b   :  { %2680 = vst [vmem:[%s4576_s7 + $0x8] sm:$0xff] %v2616_v0  ;;  %v2490_v59 = vpop.xlane.xlu1 %2489 }
 0x27c   :  { %v2389_v46 = vmax.f32 %v2251_v15, 0.0  ;;  %v2617_v28 = vadd.f32 %v4247_v35, %v2490_v59  ;;  %v2459_v29 = vmul.f32 %v4152_v18, %v2388_v2 }
 0x27d   :  { %v1966_v62 = vpop.f32.mrb[208].mxu1  ;;  %v2255_v63 = vpop.f32.mrb[208].mxu0 }
 0x27e   :  { %2681 = vst [vmem:[%s4576_s7 + $0x10] sm:$0xff] %v2617_v28  ;;  %v1967_v3 = vadd.f32 %v4137_v12, %v1966_v62  ;;  %v1968_v4 = vpop.f32.mrb[209].mxu1  ;;  %v2257_v9 = vpop.f32.mrb[209].mxu0  ;;  %2561 = vadd.xlane.f32.xlu0 %v2459_v29  ;;  %v2460_v20 = vmul.f32 %v4152_v18, %v2389_v46 }
 0x27f   :  { %v1969_v21 = vpop.f32.mrb[210].mxu1  ;;  %v2258_v10 = vpop.f32.mrb[210].mxu0 }
 0x280   :  { %v2256_v25 = vadd.f32 %v2255_v63, %v1967_v3  ;;  %v1970_v26 = vadd.f32 %v4137_v12, %v1969_v21  ;;  %v2492_v5 = vpop.xlane.xlu1 %2491  ;;  %v1971_v13 = vpop.f32.mrb[211].mxu1  ;;  %2563 = vadd.xlane.f32.xlu1 %v2460_v20 }
 0x281   :  { %v2618_v6 = vadd.f32 %v4247_v35, %v2492_v5  ;;  %v2260_v14 = vpop.f32.mrb[211].mxu0 }
 0x282   :  { %v2390_v11 = vmax.f32 %v2256_v25, 0.0  ;;  %v2259_v16 = vadd.f32 %v2258_v10, %v1970_v26 }
 0x283   :  { %2682 = vst [vmem:[%s4576_s7 + $0x18] sm:$0xff] %v2618_v6  ;;  %v2494_v40 = vpop.xlane.xlu0 %2493 }
 0x284   :  { %v2391_v45 = vmax.f32 %v2259_v16, 0.0  ;;  %v2619_v17 = vadd.f32 %v4247_v35, %v2494_v40  ;;  %v2461_v22 = vmul.f32 %v4152_v18, %v2390_v11 }
 0x285   :  { %v1974_v23 = vpop.f32.mrb[212].mxu1  ;;  %v2263_v24 = vpop.f32.mrb[212].mxu0 }
 0x286   :  { %2683 = vst [vmem:[%s4576_s7 + $0x20] sm:$0xff] %v2619_v17  ;;  %v1975_v56 = vadd.f32 %v4137_v12, %v1974_v23  ;;  %v2496_v57 = vpop.xlane.xlu1 %2495  ;;  %v1976_v54 = vpop.f32.mrb[213].mxu1  ;;  %2565 = vadd.xlane.f32.xlu0 %v2461_v22  ;;  %v2462_v55 = vmul.f32 %v4152_v18, %v2391_v45 }
 0x287   :  { %v2620_v60 = vadd.f32 %v4247_v35, %v2496_v57  ;;  %v2265_v61 = vpop.f32.mrb[213].mxu0  ;;  %v1977_v27 = vpop.f32.mrb[214].mxu1 }
 0x288   :  { %v2264_v1 = vadd.f32 %v2263_v24, %v1975_v56  ;;  %v1978_v32 = vadd.f32 %v4137_v12, %v1977_v27  ;;  %v2266_v33 = vpop.f32.mrb[214].mxu0  ;;  %v1979_v43 = vpop.f32.mrb[215].mxu1  ;;  %2567 = vadd.xlane.f32.xlu1 %v2462_v55 }
 0x289   :  { %2684 = vst [vmem:[%s4576_s7 + $0x28] sm:$0xff] %v2620_v60  ;;  %v2268_v44 = vpop.f32.mrb[215].mxu0 }
 0x28a   :  { %v2392_v34 = vmax.f32 %v2264_v1, 0.0  ;;  %v2267_v47 = vadd.f32 %v2266_v33, %v1978_v32 }
 0x28b   :  { %v2498_v30 = vpop.xlane.xlu0 %2497 }
 0x28c   :  { %v2393_v36 = vmax.f32 %v2267_v47, 0.0  ;;  %v2621_v31 = vadd.f32 %v4247_v35, %v2498_v30  ;;  %v2463_v37 = vmul.f32 %v4152_v18, %v2392_v34 }
 0x28d   :  { %v1982_v41 = vpop.f32.mrb[216].mxu1  ;;  %v2271_v50 = vpop.f32.mrb[216].mxu0 }
 0x28e   :  { %2685 = vst [vmem:[%s4576_s7 + $0x30] sm:$0xff] %v2621_v31  ;;  %v1983_v42 = vadd.f32 %v4137_v12, %v1982_v41  ;;  %v2500_v7 = vpop.xlane.xlu1 %2499  ;;  %v1984_v51 = vpop.f32.mrb[217].mxu1  ;;  %2569 = vadd.xlane.f32.xlu0 %v2463_v37  ;;  %v2464_v8 = vmul.f32 %v4152_v18, %v2393_v36 }
 0x28f   :  { %v2622_v38 = vadd.f32 %v4247_v35, %v2500_v7  ;;  %v2273_v39 = vpop.f32.mrb[217].mxu0  ;;  %v1985_v48 = vpop.f32.mrb[218].mxu1 }
 0x290   :  { %v2272_v49 = vadd.f32 %v2271_v50, %v1983_v42  ;;  %v1986_v19 = vadd.f32 %v4137_v12, %v1985_v48  ;;  %v2274_v52 = vpop.f32.mrb[218].mxu0  ;;  %v1987_v53 = vpop.f32.mrb[219].mxu1  ;;  %2571 = vadd.xlane.f32.xlu1 %v2464_v8 }
 0x291   :  { %2686 = vst [vmem:[%s4576_s7 + $0x38] sm:$0xff] %v2622_v38  ;;  %v2276_v0 = vpop.f32.mrb[219].mxu0 }
 0x292   :  { %v2394_v58 = vmax.f32 %v2272_v49, 0.0  ;;  %v2275_v2 = vadd.f32 %v2274_v52, %v1986_v19 }
 0x293   :  { %v2502_v15 = vpop.xlane.xlu0 %2501 }
 0x294   :  { %v2395_v59 = vmax.f32 %v2275_v2, 0.0  ;;  %v2623_v46 = vadd.f32 %v4247_v35, %v2502_v15  ;;  %v2465_v28 = vmul.f32 %v4152_v18, %v2394_v58 }
 0x295   :  { %v1990_v29 = vpop.f32.mrb[220].mxu1  ;;  %v2279_v62 = vpop.f32.mrb[220].mxu0 }
 0x296   :  { %2687 = vst [vmem:[%s4576_s7 + $0x40] sm:$0xff] %v2623_v46  ;;  %v1991_v63 = vadd.f32 %v4137_v12, %v1990_v29  ;;  %v2504_v3 = vpop.xlane.xlu1 %2503  ;;  %v1992_v4 = vpop.f32.mrb[221].mxu1  ;;  %2573 = vadd.xlane.f32.xlu0 %v2465_v28  ;;  %v2466_v9 = vmul.f32 %v4152_v18, %v2395_v59  ;;  %v4342_v59 = vld [vmem:[%s4574_s5] ss:$0 sm:$0xff] }
 0x297   :  { %v2624_v20 = vadd.f32 %v4247_v35, %v2504_v3  ;;  %v2281_v21 = vpop.f32.mrb[221].mxu0  ;;  %v1993_v10 = vpop.f32.mrb[222].mxu1 }
 0x298   :  { %v2280_v25 = vadd.f32 %v2279_v62, %v1991_v63  ;;  %v1994_v26 = vadd.f32 %v4137_v12, %v1993_v10  ;;  %v2282_v5 = vpop.f32.mrb[222].mxu0  ;;  %v1995_v13 = vpop.f32.mrb[223].mxu1  ;;  %2575 = vadd.xlane.f32.xlu1 %v2466_v9 }
 0x299   :  { %2688 = vst [vmem:[%s4576_s7 + $0x48] sm:$0xff] %v2624_v20  ;;  %v2284_v6 = vpop.f32.mrb[223].mxu0 }
 0x29a   :  { %v2396_v14 = vmax.f32 %v2280_v25, 0.0  ;;  %v2283_v11 = vadd.f32 %v2282_v5, %v1994_v26 }
 0x29b   :  { %v2506_v16 = vpop.xlane.xlu0 %2505 }
 0x29c   :  { %v2397_v40 = vmax.f32 %v2283_v11, 0.0  ;;  %v2625_v45 = vadd.f32 %v4247_v35, %v2506_v16  ;;  %v2467_v17 = vmul.f32 %v4152_v18, %v2396_v14 }
 0x29d   :  { %v1998_v22 = vpop.f32.mrb[224].mxu1  ;;  %v2287_v23 = vpop.f32.mrb[224].mxu0 }
 0x29e   :  { %2689 = vst [vmem:[%s4576_s7 + $0x50] sm:$0xff] %v2625_v45  ;;  %v1999_v24 = vadd.f32 %v4137_v12, %v1998_v22  ;;  %v2508_v56 = vpop.xlane.xlu1 %2507  ;;  %v2000_v57 = vpop.f32.mrb[225].mxu1  ;;  %2577 = vadd.xlane.f32.xlu0 %v2467_v17  ;;  %v2468_v54 = vmul.f32 %v4152_v18, %v2397_v40 }
 0x29f   :  { %v2626_v55 = vadd.f32 %v4247_v35, %v2508_v56  ;;  %v2289_v60 = vpop.f32.mrb[225].mxu0  ;;  %v2001_v61 = vpop.f32.mrb[226].mxu1 }
 0x2a0   :  { %v2288_v27 = vadd.f32 %v2287_v23, %v1999_v24  ;;  %v2002_v1 = vadd.f32 %v4137_v12, %v2001_v61  ;;  %v2290_v32 = vpop.f32.mrb[226].mxu0  ;;  %v2003_v33 = vpop.f32.mrb[227].mxu1  ;;  %2579 = vadd.xlane.f32.xlu1 %v2468_v54  ;;  %v4329_v12 = vld [vmem:[%s4573_s4] ss:$0 sm:$0xff] }
 0x2a1   :  { %2690 = vst [vmem:[%s4576_s7 + $0x58] sm:$0xff] %v2626_v55  ;;  %v2292_v43 = vpop.f32.mrb[227].mxu0 }
 0x2a2   :  { %v2398_v44 = vmax.f32 %v2288_v27, 0.0  ;;  %v2291_v34 = vadd.f32 %v2290_v32, %v2002_v1 }
 0x2a3   :  { %v2510_v47 = vpop.xlane.xlu0 %2509 }
 0x2a4   :  { %v2399_v30 = vmax.f32 %v2291_v34, 0.0  ;;  %v2627_v36 = vadd.f32 %v4247_v35, %v2510_v47  ;;  %v2469_v31 = vmul.f32 %v4152_v18, %v2398_v44 }
 0x2a5   :  { %v2006_v37 = vpop.f32.mrb[228].mxu1  ;;  %v2295_v41 = vpop.f32.mrb[228].mxu0 }
 0x2a6   :  { %2691 = vst [vmem:[%s4576_s7 + $0x60] sm:$0xff] %v2627_v36  ;;  %v2007_v50 = vadd.f32 %v4329_v12, %v2006_v37  ;;  %v2512_v42 = vpop.xlane.xlu1 %2511  ;;  %v2008_v7 = vpop.f32.mrb[229].mxu1  ;;  %2581 = vadd.xlane.f32.xlu0 %v2469_v31  ;;  %v2470_v51 = vmul.f32 %v4152_v18, %v2399_v30 }
 0x2a7   :  { %v2628_v8 = vadd.f32 %v4247_v35, %v2512_v42  ;;  %v2297_v38 = vpop.f32.mrb[229].mxu0  ;;  %v2009_v39 = vpop.f32.mrb[230].mxu1 }
 0x2a8   :  { %v2296_v48 = vadd.f32 %v2295_v41, %v2007_v50  ;;  %v2010_v49 = vadd.f32 %v4329_v12, %v2009_v39  ;;  %v2298_v19 = vpop.f32.mrb[230].mxu0  ;;  %v2011_v52 = vpop.f32.mrb[231].mxu1  ;;  %2583 = vadd.xlane.f32.xlu1 %v2470_v51 }
 0x2a9   :  { %2692 = vst [vmem:[%s4576_s7 + $0x68] sm:$0xff] %v2628_v8  ;;  %v2300_v53 = vpop.f32.mrb[231].mxu0 }
 0x2aa   :  { %v2400_v0 = vmax.f32 %v2296_v48, 0.0  ;;  %v2299_v58 = vadd.f32 %v2298_v19, %v2010_v49 }
 0x2ab   :  { %v2514_v2 = vpop.xlane.xlu0 %2513 }
 0x2ac   :  { %v2401_v15 = vmax.f32 %v2299_v58, 0.0  ;;  %v2629_v18 = vadd.f32 %v4247_v35, %v2514_v2  ;;  %v2471_v46 = vmul.f32 %v4342_v59, %v2400_v0 }
 0x2ad   :  { %v2014_v28 = vpop.f32.mrb[232].mxu1  ;;  %v2303_v29 = vpop.f32.mrb[232].mxu0 }
 0x2ae   :  { %2693 = vst [vmem:[%s4576_s7 + $0x70] sm:$0xff] %v2629_v18  ;;  %v2015_v62 = vadd.f32 %v4329_v12, %v2014_v28  ;;  %v2516_v63 = vpop.xlane.xlu1 %2515  ;;  %v2016_v3 = vpop.f32.mrb[233].mxu1  ;;  %2585 = vadd.xlane.f32.xlu0 %v2471_v46  ;;  %v2472_v4 = vmul.f32 %v4342_v59, %v2401_v15 }
 0x2af   :  { %v2630_v9 = vadd.f32 %v4247_v35, %v2516_v63  ;;  %v2305_v20 = vpop.f32.mrb[233].mxu0  ;;  %v2017_v21 = vpop.f32.mrb[234].mxu1 }
 0x2b0   :  { %v2304_v10 = vadd.f32 %v2303_v29, %v2015_v62  ;;  %v2018_v25 = vadd.f32 %v4329_v12, %v2017_v21  ;;  %v2306_v26 = vpop.f32.mrb[234].mxu0  ;;  %v2019_v5 = vpop.f32.mrb[235].mxu1  ;;  %2587 = vadd.xlane.f32.xlu1 %v2472_v4 }
 0x2b1   :  { %2694 = vst [vmem:[%s4576_s7 + $0x78] sm:$0xff] %v2630_v9  ;;  %v2308_v13 = vpop.f32.mrb[235].mxu0 }
 0x2b2   :  { %v2402_v6 = vmax.f32 %v2304_v10, 0.0  ;;  %v2307_v14 = vadd.f32 %v2306_v26, %v2018_v25 }
 0x2b3   :  { %v2518_v11 = vpop.xlane.xlu0 %2517 }
 0x2b4   :  { %v2403_v16 = vmax.f32 %v2307_v14, 0.0  ;;  %v2631_v40 = vadd.f32 %v4247_v35, %v2518_v11  ;;  %v2473_v45 = vmul.f32 %v4342_v59, %v2402_v6 }
 0x2b5   :  { %v2022_v17 = vpop.f32.mrb[236].mxu1  ;;  %v2311_v22 = vpop.f32.mrb[236].mxu0 }
 0x2b6   :  { %2695 = vst [vmem:[%s4576_s7 + $0x80] sm:$0xff] %v2631_v40  ;;  %v2023_v23 = vadd.f32 %v4329_v12, %v2022_v17  ;;  %v2520_v24 = vpop.xlane.xlu1 %2519  ;;  %v2024_v56 = vpop.f32.mrb[237].mxu1  ;;  %2589 = vadd.xlane.f32.xlu0 %v2473_v45  ;;  %v2474_v57 = vmul.f32 %v4342_v59, %v2403_v16 }
 0x2b7   :  { %v2632_v54 = vadd.f32 %v4247_v35, %v2520_v24  ;;  %v2313_v55 = vpop.f32.mrb[237].mxu0  ;;  %v2025_v60 = vpop.f32.mrb[238].mxu1 }
 0x2b8   :  { %v2312_v61 = vadd.f32 %v2311_v22, %v2023_v23  ;;  %v2026_v27 = vadd.f32 %v4329_v12, %v2025_v60  ;;  %v2314_v1 = vpop.f32.mrb[238].mxu0  ;;  %v2027_v32 = vpop.f32.mrb[239].mxu1  ;;  %2591 = vadd.xlane.f32.xlu1 %v2474_v57 }
 0x2b9   :  { %2696 = vst [vmem:[%s4576_s7 + $0x88] sm:$0xff] %v2632_v54  ;;  %v2316_v33 = vpop.f32.mrb[239].mxu0 }
 0x2ba   :  { %v2404_v43 = vmax.f32 %v2312_v61, 0.0  ;;  %v2315_v44 = vadd.f32 %v2314_v1, %v2026_v27 }
 0x2bb   :  { %v2522_v34 = vpop.xlane.xlu0 %2521 }
 0x2bc   :  { %v2405_v47 = vmax.f32 %v2315_v44, 0.0  ;;  %v2633_v30 = vadd.f32 %v4247_v35, %v2522_v34  ;;  %v2475_v36 = vmul.f32 %v4342_v59, %v2404_v43 }
 0x2bd   :  { %v2030_v31 = vpop.f32.mrb[240].mxu1  ;;  %v2319_v37 = vpop.f32.mrb[240].mxu0 }
 0x2be   :  { %2697 = vst [vmem:[%s4576_s7 + $0x90] sm:$0xff] %v2633_v30  ;;  %v2031_v41 = vadd.f32 %v4329_v12, %v2030_v31  ;;  %v2524_v50 = vpop.xlane.xlu1 %2523  ;;  %v2032_v42 = vpop.f32.mrb[241].mxu1  ;;  %2593 = vadd.xlane.f32.xlu0 %v2475_v36  ;;  %v2476_v7 = vmul.f32 %v4342_v59, %v2405_v47 }
 0x2bf   :  { %v2634_v51 = vadd.f32 %v4247_v35, %v2524_v50  ;;  %v2321_v8 = vpop.f32.mrb[241].mxu0  ;;  %v2033_v38 = vpop.f32.mrb[242].mxu1 }
 0x2c0   :  { %v2320_v39 = vadd.f32 %v2319_v37, %v2031_v41  ;;  %v2034_v48 = vadd.f32 %v4329_v12, %v2033_v38  ;;  %v2322_v49 = vpop.f32.mrb[242].mxu0  ;;  %v2035_v19 = vpop.f32.mrb[243].mxu1  ;;  %2595 = vadd.xlane.f32.xlu1 %v2476_v7 }
 0x2c1   :  { %2698 = vst [vmem:[%s4576_s7 + $0x98] sm:$0xff] %v2634_v51  ;;  %v2324_v52 = vpop.f32.mrb[243].mxu0 }
 0x2c2   :  { %v2406_v53 = vmax.f32 %v2320_v39, 0.0  ;;  %v2323_v0 = vadd.f32 %v2322_v49, %v2034_v48 }
 0x2c3   :  { %v2526_v58 = vpop.xlane.xlu0 %2525 }
 0x2c4   :  { %v2407_v2 = vmax.f32 %v2323_v0, 0.0  ;;  %v2635_v15 = vadd.f32 %v4247_v35, %v2526_v58  ;;  %v2477_v18 = vmul.f32 %v4342_v59, %v2406_v53 }
 0x2c5   :  { %v2038_v46 = vpop.f32.mrb[244].mxu1  ;;  %v2327_v28 = vpop.f32.mrb[244].mxu0 }
 0x2c6   :  { %2699 = vst [vmem:[%s4576_s7 + $0xa0] sm:$0xff] %v2635_v15  ;;  %v2039_v29 = vadd.f32 %v4329_v12, %v2038_v46  ;;  %v2528_v62 = vpop.xlane.xlu1 %2527  ;;  %v2040_v63 = vpop.f32.mrb[245].mxu1  ;;  %2597 = vadd.xlane.f32.xlu0 %v2477_v18  ;;  %v2478_v3 = vmul.f32 %v4342_v59, %v2407_v2 }
 0x2c7   :  { %v2636_v4 = vadd.f32 %v4247_v35, %v2528_v62  ;;  %v2329_v9 = vpop.f32.mrb[245].mxu0  ;;  %v2041_v20 = vpop.f32.mrb[246].mxu1 }
 0x2c8   :  { %v2328_v21 = vadd.f32 %v2327_v28, %v2039_v29  ;;  %v2042_v10 = vadd.f32 %v4329_v12, %v2041_v20  ;;  %v2330_v25 = vpop.f32.mrb[246].mxu0  ;;  %v2043_v26 = vpop.f32.mrb[247].mxu1  ;;  %2599 = vadd.xlane.f32.xlu1 %v2478_v3 }
 0x2c9   :  { %2700 = vst [vmem:[%s4576_s7 + $0xa8] sm:$0xff] %v2636_v4  ;;  %v2332_v5 = vpop.f32.mrb[247].mxu0 }
 0x2ca   :  { %v2408_v13 = vmax.f32 %v2328_v21, 0.0  ;;  %v2331_v6 = vadd.f32 %v2330_v25, %v2042_v10 }
 0x2cb   :  { %v2530_v14 = vpop.xlane.xlu0 %2529 }
 0x2cc   :  { %v2409_v11 = vmax.f32 %v2331_v6, 0.0  ;;  %v2637_v16 = vadd.f32 %v4247_v35, %v2530_v14  ;;  %v2479_v40 = vmul.f32 %v4342_v59, %v2408_v13 }
 0x2cd   :  { %v2046_v45 = vpop.f32.mrb[248].mxu1  ;;  %v2335_v17 = vpop.f32.mrb[248].mxu0 }
 0x2ce   :  { %2701 = vst [vmem:[%s4576_s7 + $0xb0] sm:$0xff] %v2637_v16  ;;  %v2047_v22 = vadd.f32 %v4329_v12, %v2046_v45  ;;  %v2532_v23 = vpop.xlane.xlu1 %2531  ;;  %v2048_v24 = vpop.f32.mrb[249].mxu1  ;;  %2601 = vadd.xlane.f32.xlu0 %v2479_v40  ;;  %v2480_v56 = vmul.f32 %v4342_v59, %v2409_v11 }
 0x2cf   :  { %v2638_v57 = vadd.f32 %v4247_v35, %v2532_v23  ;;  %v2337_v54 = vpop.f32.mrb[249].mxu0  ;;  %v2049_v55 = vpop.f32.mrb[250].mxu1 }
 0x2d0   :  { %v2336_v60 = vadd.f32 %v2335_v17, %v2047_v22  ;;  %v2050_v61 = vadd.f32 %v4329_v12, %v2049_v55  ;;  %v2338_v27 = vpop.f32.mrb[250].mxu0  ;;  %v2051_v1 = vpop.f32.mrb[251].mxu1  ;;  %2603 = vadd.xlane.f32.xlu1 %v2480_v56 }
 0x2d1   :  { %2702 = vst [vmem:[%s4576_s7 + $0xb8] sm:$0xff] %v2638_v57  ;;  %v2340_v32 = vpop.f32.mrb[251].mxu0 }
 0x2d2   :  { %v2410_v33 = vmax.f32 %v2336_v60, 0.0  ;;  %v2339_v43 = vadd.f32 %v2338_v27, %v2050_v61 }
 0x2d3   :  { %v2534_v44 = vpop.xlane.xlu0 %2533 }
 0x2d4   :  { %v2411_v34 = vmax.f32 %v2339_v43, 0.0  ;;  %v2639_v47 = vadd.f32 %v4247_v35, %v2534_v44  ;;  %v2481_v30 = vmul.f32 %v4342_v59, %v2410_v33 }
 0x2d5   :  { %v2054_v36 = vpop.f32.mrb[252].mxu1  ;;  %v2343_v31 = vpop.f32.mrb[252].mxu0 }
 0x2d6   :  { %2703 = vst [vmem:[%s4576_s7 + $0xc0] sm:$0xff] %v2639_v47  ;;  %v2055_v37 = vadd.f32 %v4329_v12, %v2054_v36  ;;  %v2536_v41 = vpop.xlane.xlu1 %2535  ;;  %v2056_v50 = vpop.f32.mrb[253].mxu1  ;;  %2605 = vadd.xlane.f32.xlu0 %v2481_v30  ;;  %v2482_v42 = vmul.f32 %v4342_v59, %v2411_v34 }
 0x2d7   :  { %v2640_v7 = vadd.f32 %v4247_v35, %v2536_v41  ;;  %v2345_v51 = vpop.f32.mrb[253].mxu0  ;;  %v2057_v8 = vpop.f32.mrb[254].mxu1 }
 0x2d8   :  { %v2344_v38 = vadd.f32 %v2343_v31, %v2055_v37  ;;  %v2058_v39 = vadd.f32 %v4329_v12, %v2057_v8  ;;  %v2346_v48 = vpop.f32.mrb[254].mxu0  ;;  %v2059_v49 = vpop.f32.mrb[255].mxu1  ;;  %2607 = vadd.xlane.f32.xlu1 %v2482_v42 }
 0x2d9   :  { %2704 = vst [vmem:[%s4576_s7 + $0xc8] sm:$0xff] %v2640_v7  ;;  %v2348_v19 = vpop.f32.mrb[255].mxu0 }
 0x2da   :  { %v2412_v52 = vmax.f32 %v2344_v38, 0.0  ;;  %v2347_v53 = vadd.f32 %v2346_v48, %v2058_v39 }
 0x2db   :  { %v2538_v0 = vpop.xlane.xlu0 %2537 }
 0x2dc   :  { %v2413_v58 = vmax.f32 %v2347_v53, 0.0  ;;  %v2641_v2 = vadd.f32 %v4247_v35, %v2538_v0  ;;  %v2483_v15 = vmul.f32 %v4342_v59, %v2412_v52 }
 0x2dd   :  { %v2540_v18 = vpop.xlane.xlu1 %2539 }
 0x2de   :  { %2705 = vst [vmem:[%s4576_s7 + $0xd0] sm:$0xff] %v2641_v2  ;;  %v2642_v12 = vadd.f32 %v4247_v35, %v2540_v18  ;;  %2609 = vadd.xlane.f32.xlu0 %v2483_v15  ;;  %v2484_v46 = vmul.f32 %v4342_v59, %v2413_v58 }
 0x2e0   :  { %2706 = vst [vmem:[%s4576_s7 + $0xd8] sm:$0xff] %v2642_v12  ;;  %2611 = vadd.xlane.f32.xlu1 %v2484_v46 }
 0x2e3   :  { %v2542_v28 = vpop.xlane.xlu0 %2541 }
 0x2e4   :  { %v2643_v29 = vadd.f32 %v4247_v35, %v2542_v28 }
 0x2e5   :  { %v2544_v62 = vpop.xlane.xlu1 %2543 }
 0x2e6   :  { %2707 = vst [vmem:[%s4576_s7 + $0xe0] sm:$0xff] %v2643_v29  ;;  %v2644_v63 = vadd.f32 %v4247_v35, %v2544_v62 }
 0x2e8   :  { %2708 = vst [vmem:[%s4576_s7 + $0xe8] sm:$0xff] %v2644_v63 }
 0x2eb   :  { %v2546_v59 = vpop.xlane.xlu0 %2545 }
 0x2ec   :  { %v2645_v3 = vadd.f32 %v4247_v35, %v2546_v59 }
 0x2ed   :  { %v2548_v4 = vpop.xlane.xlu1 %2547 }
 0x2ee   :  { %2709 = vst [vmem:[%s4576_s7 + $0xf0] sm:$0xff] %v2645_v3  ;;  %v2646_v9 = vadd.f32 %v4247_v35, %v2548_v4 }
 0x2f0   :  { %2710 = vst [vmem:[%s4576_s7 + $0xf8] sm:$0xff] %v2646_v9 }
 0x2f3   :  { %v2550_v20 = vpop.xlane.xlu0 %2549 }
 0x2f4   :  { %v2647_v21 = vadd.f32 %v4247_v35, %v2550_v20 }
 0x2f5   :  { %v2552_v10 = vpop.xlane.xlu1 %2551 }
 0x2f6   :  { %2711 = vst [vmem:[%s4576_s7 + $0x100] sm:$0xff] %v2647_v21  ;;  %v2648_v25 = vadd.f32 %v4247_v35, %v2552_v10 }
 0x2f8   :  { %2712 = vst [vmem:[%s4576_s7 + $0x108] sm:$0xff] %v2648_v25 }
 0x2fb   :  { %v2554_v26 = vpop.xlane.xlu0 %2553 }
 0x2fc   :  { %v2649_v5 = vadd.f32 %v4247_v35, %v2554_v26 }
 0x2fd   :  { %v2556_v13 = vpop.xlane.xlu1 %2555 }
 0x2fe   :  { %2713 = vst [vmem:[%s4576_s7 + $0x110] sm:$0xff] %v2649_v5  ;;  %v2650_v6 = vadd.f32 %v4247_v35, %v2556_v13 }
 0x300   :  { %2714 = vst [vmem:[%s4576_s7 + $0x118] sm:$0xff] %v2650_v6 }
 0x303   :  { %v2558_v14 = vpop.xlane.xlu0 %2557 }
 0x304   :  { %v2651_v11 = vadd.f32 %v4247_v35, %v2558_v14 }
 0x305   :  { %v2560_v16 = vpop.xlane.xlu1 %2559 }
 0x306   :  { %2715 = vst [vmem:[%s4576_s7 + $0x120] sm:$0xff] %v2651_v11  ;;  %v2652_v40 = vadd.f32 %v4247_v35, %v2560_v16 }
 0x308   :  { %2716 = vst [vmem:[%s4576_s7 + $0x128] sm:$0xff] %v2652_v40 }
 0x30b   :  { %v2562_v45 = vpop.xlane.xlu0 %2561 }
 0x30c   :  { %v2653_v17 = vadd.f32 %v4247_v35, %v2562_v45 }
 0x30d   :  { %v2564_v22 = vpop.xlane.xlu1 %2563 }
 0x30e   :  { %2717 = vst [vmem:[%s4576_s7 + $0x130] sm:$0xff] %v2653_v17  ;;  %v2654_v23 = vadd.f32 %v4247_v35, %v2564_v22 }
 0x310   :  { %2718 = vst [vmem:[%s4576_s7 + $0x138] sm:$0xff] %v2654_v23 }
 0x313   :  { %v2566_v24 = vpop.xlane.xlu0 %2565 }
 0x314   :  { %v2655_v56 = vadd.f32 %v4247_v35, %v2566_v24 }
 0x315   :  { %v2568_v57 = vpop.xlane.xlu1 %2567 }
 0x316   :  { %2719 = vst [vmem:[%s4576_s7 + $0x140] sm:$0xff] %v2655_v56  ;;  %v2656_v54 = vadd.f32 %v4247_v35, %v2568_v57 }
 0x318   :  { %2720 = vst [vmem:[%s4576_s7 + $0x148] sm:$0xff] %v2656_v54 }
 0x31b   :  { %v2570_v55 = vpop.xlane.xlu0 %2569 }
 0x31c   :  { %v2657_v60 = vadd.f32 %v4247_v35, %v2570_v55 }
 0x31d   :  { %v2572_v61 = vpop.xlane.xlu1 %2571 }
 0x31e   :  { %2721 = vst [vmem:[%s4576_s7 + $0x150] sm:$0xff] %v2657_v60  ;;  %v2658_v27 = vadd.f32 %v4247_v35, %v2572_v61 }
 0x320   :  { %2722 = vst [vmem:[%s4576_s7 + $0x158] sm:$0xff] %v2658_v27 }
 0x323   :  { %v2574_v1 = vpop.xlane.xlu0 %2573 }
 0x324   :  { %v2659_v32 = vadd.f32 %v4247_v35, %v2574_v1 }
 0x325   :  { %v2576_v33 = vpop.xlane.xlu1 %2575 }
 0x326   :  { %2723 = vst [vmem:[%s4576_s7 + $0x160] sm:$0xff] %v2659_v32  ;;  %v2660_v43 = vadd.f32 %v4247_v35, %v2576_v33 }
 0x328   :  { %2724 = vst [vmem:[%s4576_s7 + $0x168] sm:$0xff] %v2660_v43 }
 0x32b   :  { %v2578_v44 = vpop.xlane.xlu0 %2577 }
 0x32c   :  { %v2661_v34 = vadd.f32 %v4247_v35, %v2578_v44 }
 0x32d   :  { %v2580_v47 = vpop.xlane.xlu1 %2579 }
 0x32e   :  { %2725 = vst [vmem:[%s4576_s7 + $0x170] sm:$0xff] %v2661_v34  ;;  %v2662_v30 = vadd.f32 %v4247_v35, %v2580_v47 }
 0x330   :  { %2726 = vst [vmem:[%s4576_s7 + $0x178] sm:$0xff] %v2662_v30 }
 0x333   :  { %v2582_v36 = vpop.xlane.xlu0 %2581 }
 0x334   :  { %v2663_v31 = vadd.f32 %v4247_v35, %v2582_v36 }
 0x335   :  { %v2584_v37 = vpop.xlane.xlu1 %2583 }
 0x336   :  { %2727 = vst [vmem:[%s4576_s7 + $0x180] sm:$0xff] %v2663_v31  ;;  %v2664_v41 = vadd.f32 %v4247_v35, %v2584_v37 }
 0x338   :  { %2728 = vst [vmem:[%s4576_s7 + $0x188] sm:$0xff] %v2664_v41 }
 0x33b   :  { %v2586_v50 = vpop.xlane.xlu0 %2585 }
 0x33c   :  { %v2665_v42 = vadd.f32 %v4247_v35, %v2586_v50 }
 0x33d   :  { %v2588_v7 = vpop.xlane.xlu1 %2587 }
 0x33e   :  { %2729 = vst [vmem:[%s4576_s7 + $0x190] sm:$0xff] %v2665_v42  ;;  %v2666_v51 = vadd.f32 %v4247_v35, %v2588_v7 }
 0x340   :  { %2730 = vst [vmem:[%s4576_s7 + $0x198] sm:$0xff] %v2666_v51 }
 0x343   :  { %v2590_v8 = vpop.xlane.xlu0 %2589 }
 0x344   :  { %v2667_v38 = vadd.f32 %v4247_v35, %v2590_v8 }
 0x345   :  { %v2592_v39 = vpop.xlane.xlu1 %2591 }
 0x346   :  { %2731 = vst [vmem:[%s4576_s7 + $0x1a0] sm:$0xff] %v2667_v38  ;;  %v2668_v48 = vadd.f32 %v4247_v35, %v2592_v39 }
 0x348   :  { %2732 = vst [vmem:[%s4576_s7 + $0x1a8] sm:$0xff] %v2668_v48 }
 0x34b   :  { %v2594_v49 = vpop.xlane.xlu0 %2593 }
 0x34c   :  { %v2669_v19 = vadd.f32 %v4247_v35, %v2594_v49 }
 0x34d   :  { %v2596_v52 = vpop.xlane.xlu1 %2595 }
 0x34e   :  { %2733 = vst [vmem:[%s4576_s7 + $0x1b0] sm:$0xff] %v2669_v19  ;;  %v2670_v53 = vadd.f32 %v4247_v35, %v2596_v52 }
 0x350   :  { %2734 = vst [vmem:[%s4576_s7 + $0x1b8] sm:$0xff] %v2670_v53 }
 0x353   :  { %v2598_v0 = vpop.xlane.xlu0 %2597 }
 0x354   :  { %v2671_v58 = vadd.f32 %v4247_v35, %v2598_v0 }
 0x355   :  { %v2600_v2 = vpop.xlane.xlu1 %2599 }
 0x356   :  { %2735 = vst [vmem:[%s4576_s7 + $0x1c0] sm:$0xff] %v2671_v58  ;;  %v2672_v15 = vadd.f32 %v4247_v35, %v2600_v2 }
 0x358   :  { %2736 = vst [vmem:[%s4576_s7 + $0x1c8] sm:$0xff] %v2672_v15 }
 0x35b   :  { %v2602_v18 = vpop.xlane.xlu0 %2601 }
 0x35c   :  { %v2673_v12 = vadd.f32 %v4247_v35, %v2602_v18 }
 0x35d   :  { %v2604_v46 = vpop.xlane.xlu1 %2603 }
 0x35e   :  { %2737 = vst [vmem:[%s4576_s7 + $0x1d0] sm:$0xff] %v2673_v12  ;;  %v2674_v28 = vadd.f32 %v4247_v35, %v2604_v46 }
 0x360   :  { %2738 = vst [vmem:[%s4576_s7 + $0x1d8] sm:$0xff] %v2674_v28 }
 0x363   :  { %v2606_v29 = vpop.xlane.xlu0 %2605 }
 0x364   :  { %v2675_v62 = vadd.f32 %v4247_v35, %v2606_v29 }
 0x365   :  { %v2608_v63 = vpop.xlane.xlu1 %2607 }
 0x366   :  { %2739 = vst [vmem:[%s4576_s7 + $0x1e0] sm:$0xff] %v2675_v62  ;;  %v2676_v59 = vadd.f32 %v4247_v35, %v2608_v63 }
 0x368   :  { %2740 = vst [vmem:[%s4576_s7 + $0x1e8] sm:$0xff] %v2676_v59 }
 0x36b   :  { %v2610_v3 = vpop.xlane.xlu0 %2609 }
 0x36c   :  { %v2677_v4 = vadd.f32 %v4247_v35, %v2610_v3 }
 0x36d   :  { %v2612_v9 = vpop.xlane.xlu1 %2611 }
 0x36e   :  { %2741 = vst [vmem:[%s4576_s7 + $0x1f0] sm:$0xff] %v2677_v4  ;;  %v2678_v20 = vadd.f32 %v4247_v35, %v2612_v9 }
 0x370   :  { %2742 = vst [vmem:[%s4576_s7 + $0x1f8] sm:$0xff] %v2678_v20 }

</bundles_post_ra>
